<compile_context>
chip_gen: v6e
topology: v6e:2x2x1
jax: 0.10.0
libtpu: 0.0.40
codegen_flags: <defaults>
</compile_context>

<pallas_src>
import functools

import numpy as np
import jax
import jax.numpy as jnp
from jax import lax
from jax.experimental import pallas as pl
from jax.experimental.pallas import tpu as pltpu


KH = 5                       # conv kernel size (5x5)
H_IN, W_IN, C_IN = 32, 32, 3
H_PAD = 40                   # per-image padded row count in the input slab
LANE = 128                   # padded lane width of all intermediates / weights


def _dims(nb):
    """Row counts of the per-block intermediate slabs (nb images per block)."""
    m1 = H_PAD * nb - 8            # conv1 rows computed (per-image stride 40)
    p1 = m1 // 2                   # pooled1 rows        (per-image stride 20)
    m2 = (H_PAD // 2) * nb - 8     # conv2 rows computed (per-image stride 20)
    return m1, p1, m2


# -----------------------------------------------------------------------------
# The fused kernel.  One grid step = `nb` images.
#   x_ref  : (nb*40, 96)   f32  images, channels-minor (H, W*C), H padded to 40
#   w1/w2  : (5, K, 256)   bf16 banded conv weights, even|odd output columns
#   b1/b2  : (1, 128)      f32  per-output-column bias rows (zero padded)
#   fw1    : (5, 128, 128) bf16 fc1 split into 5 chunks (one per pooled-H row)
#   fw2/3  : (128,128)/(128,10) bf16, fb* f32
#   o_ref  : (nb, 10)      f32  logits
# -----------------------------------------------------------------------------
def _net_kernel(x_ref, w1_ref, b1_ref, w2_ref, b2_ref,
                fw1_ref, fb1_ref, fw2_ref, fb2_ref, fw3_ref, fb3_ref,
                o_ref,
                a1_ref, s1_ref, p1_ref, a2_ref, s2_ref, *, nb):
    f32, bf16 = jnp.float32, jnp.bfloat16
    m1, p1_rows, m2 = _dims(nb)
    s2_stride = H_PAD // 2          # per-image row stride of the conv2 slab

    # ---- conv1: KH banded MXU matmuls (even|odd output cols concatenated) ----
    for ki in range(KH):
        lhs = x_ref[pl.ds(ki, m1), :].astype(bf16)               # (m1, 96)
        prod = jnp.dot(lhs, w1_ref[ki], preferred_element_type=f32)
        if ki == 0:
            a1_ref[...] = prod
        else:
            a1_ref[...] += prod

    # W-direction pool (even vs odd output columns) + bias + ReLU.
    # Exact: bias is a per-channel constant under max, ReLU is monotone.
    s1_ref[...] = jnp.maximum(
        jnp.maximum(a1_ref[:, 0:LANE], a1_ref[:, LANE:2 * LANE]) + b1_ref[...],
        0.0)

    # H-direction pool: max of even/odd conv rows (stride-2 sublane reads).
    p1_ref[...] = jnp.maximum(s1_ref[pl.ds(0, p1_rows, 2), :],
                              s1_ref[pl.ds(1, p1_rows, 2), :])

    # ---- conv2 (input = pooled1 slab: 84 valid lanes, zero padded to 128) ----
    for ki in range(KH):
        lhs = p1_ref[pl.ds(ki, m2), :].astype(bf16)              # (m2, 128)
        prod = jnp.dot(lhs, w2_ref[ki], preferred_element_type=f32)
        if ki == 0:
            a2_ref[...] = prod
        else:
            a2_ref[...] += prod
    s2_ref[...] = jnp.maximum(
        jnp.maximum(a2_ref[:, 0:LANE], a2_ref[:, LANE:2 * LANE]) + b2_ref[...],
        0.0)

    # ---- fc1: 2x2 H-pool of conv2 + torch flatten folded into 5 matmuls ----
    h = jnp.zeros((nb, LANE), f32)
    for hp in range(5):
        even = s2_ref[pl.ds(2 * hp, nb, s2_stride), :]           # (nb, 128)
        odd = s2_ref[pl.ds(2 * hp + 1, nb, s2_stride), :]
        lhs = jnp.maximum(even, odd).astype(bf16)                # pooled row hp
        h = h + jnp.dot(lhs, fw1_ref[hp], preferred_element_type=f32)
    h = jnp.maximum(h + fb1_ref[...], 0.0).astype(bf16)          # (nb, 128)

    # ---- fc2 -> ReLU -> fc3 ----
    h = jnp.dot(h, fw2_ref[...], preferred_element_type=f32)
    h = jnp.maximum(h + fb2_ref[...], 0.0).astype(bf16)
    o_ref[...] = (jnp.dot(h, fw3_ref[...], preferred_element_type=f32)
                  + fb3_ref[...])


# -----------------------------------------------------------------------------
# Forward pass wrapper: exactly ONE pallas_call.
# -----------------------------------------------------------------------------
def _forward_impl(kp, x, block_n=8):
    n = x.shape[0]
    nb = block_n
    n_pad = ((n + nb - 1) // nb) * nb

    # NCHW -> per-image (H, W*C) channels-minor layout, pad H 32 -> 40, pad N.
    x2d = jnp.transpose(x, (0, 2, 3, 1)).reshape(n, H_IN, W_IN * C_IN)
    x2d = jnp.pad(x2d, ((0, n_pad - n), (0, H_PAD - H_IN), (0, 0)))
    x2d = x2d.reshape(n_pad * H_PAD, W_IN * C_IN).astype(jnp.float32)

    m1, p1_rows, m2 = _dims(nb)
    out = pl.pallas_call(
        functools.partial(_net_kernel, nb=nb),
        out_shape=jax.ShapeDtypeStruct((n_pad, 10), jnp.float32),
        grid=(n_pad // nb,),
        in_specs=[
            pl.BlockSpec((nb * H_PAD, W_IN * C_IN), lambda i: (i, 0)),
            pl.BlockSpec(kp["w1"].shape, lambda i: (0, 0, 0)),
            pl.BlockSpec(kp["b1"].shape, lambda i: (0, 0)),
            pl.BlockSpec(kp["w2"].shape, lambda i: (0, 0, 0)),
            pl.BlockSpec(kp["b2"].shape, lambda i: (0, 0)),
            pl.BlockSpec(kp["fw1"].shape, lambda i: (0, 0, 0)),
            pl.BlockSpec(kp["fb1"].shape, lambda i: (0, 0)),
            pl.BlockSpec(kp["fw2"].shape, lambda i: (0, 0)),
            pl.BlockSpec(kp["fb2"].shape, lambda i: (0, 0)),
            pl.BlockSpec(kp["fw3"].shape, lambda i: (0, 0)),
            pl.BlockSpec(kp["fb3"].shape, lambda i: (0, 0)),
        ],
        out_specs=pl.BlockSpec((nb, 10), lambda i: (i, 0)),
        scratch_shapes=[
            pltpu.VMEM((m1, 2 * LANE), jnp.float32),   # a1: conv1 accumulator
            pltpu.VMEM((m1, LANE), jnp.float32),       # s1: conv1 act, pre H-pool
            pltpu.VMEM((p1_rows, LANE), jnp.float32),  # p1: pooled1 (conv2 input)
            pltpu.VMEM((m2, 2 * LANE), jnp.float32),   # a2: conv2 accumulator
            pltpu.VMEM((m2, LANE), jnp.float32),       # s2: conv2 act, pre H-pool
        ],
        compiler_params=pltpu.CompilerParams(
            dimension_semantics=("parallel",)),
    )(x2d, kp["w1"], kp["b1"], kp["w2"], kp["b2"],
      kp["fw1"], kp["fb1"], kp["fw2"], kp["fb2"], kp["fw3"], kp["fb3"])
    return out[:n]


net_forward = jax.jit(_forward_impl, static_argnames=("block_n",))


# -----------------------------------------------------------------------------
# Host-side, one-time parameter preparation: valid-conv im2col folded into
# "banded" weight matrices (even|odd output columns concatenated, 128-aligned),
# biases tiled per output column, fc weights pre-transposed / flatten-permuted,
# all lane widths padded to 128 with zeros, bf16 casts for the MXU.
# -----------------------------------------------------------------------------
def _banded_conv_weights_cat(w, in_w, k_pad, n_half):
    """w: (cout, cin, kh, kw) torch layout -> (kh, k_pad, 2*n_half) banded."""
    w = np.asarray(w, np.float32)
    cout, cin, kh, kw = w.shape
    wp = (in_w - kw + 1) // 2
    out = np.zeros((kh, k_pad, 2 * n_half), np.float32)
    for ki in range(kh):
        for s in range(wp):
            for kj in range(kw):
                blk = w[:, :, ki, kj].T                       # (cin, cout)
                re = (2 * s + kj) * cin                       # even output col 2s
                ro = (2 * s + 1 + kj) * cin                   # odd output col 2s+1
                out[ki, re:re + cin, s * cout:(s + 1) * cout] = blk
                out[ki, ro:ro + cin, n_half + s * cout:n_half + (s + 1) * cout] = blk
    return out


def prepare_params(p):
    bf = jnp.bfloat16
    w1 = _banded_conv_weights_cat(p["conv1_w"], in_w=32, k_pad=96, n_half=LANE)
    w2 = _banded_conv_weights_cat(p["conv2_w"], in_w=14, k_pad=LANE, n_half=LANE)

    b1 = np.zeros((1, LANE), np.float32)
    b1[0, :14 * 6] = np.tile(np.asarray(p["conv1_b"], np.float32), 14)
    b2 = np.zeros((1, LANE), np.float32)
    b2[0, :5 * 16] = np.tile(np.asarray(p["conv2_b"], np.float32), 5)

    # fc1 split into 5 chunks (one per pooled-H row); chunk rows follow the
    # kernel lane layout (w*16 + c); torch flatten order is c*25 + h*5 + w.
    fc1 = np.asarray(p["fc1_w"], np.float32)                  # (120, 400)
    fw1 = np.zeros((5, LANE, LANE), np.float32)
    for hp in range(5):
        for w in range(5):
            for c in range(16):
                fw1[hp, w * 16 + c, :120] = fc1[:, c * 25 + hp * 5 + w]
    fb1 = np.zeros((1, LANE), np.float32)
    fb1[0, :120] = np.asarray(p["fc1_b"], np.float32)

    fw2 = np.zeros((LANE, LANE), np.float32)
    fw2[:120, :84] = np.asarray(p["fc2_w"], np.float32).T
    fb2 = np.zeros((1, LANE), np.float32)
    fb2[0, :84] = np.asarray(p["fc2_b"], np.float32)

    fw3 = np.zeros((LANE, 10), np.float32)
    fw3[:84, :] = np.asarray(p["fc3_w"], np.float32).T
    fb3 = np.asarray(p["fc3_b"], np.float32).reshape(1, 10)

    return {
        "w1": jnp.asarray(w1, bf), "b1": jnp.asarray(b1),
        "w2": jnp.asarray(w2, bf), "b2": jnp.asarray(b2),
        "fw1": jnp.asarray(fw1, bf), "fb1": jnp.asarray(fb1),
        "fw2": jnp.asarray(fw2, bf), "fb2": jnp.asarray(fb2),
        "fw3": jnp.asarray(fw3, bf), "fb3": jnp.asarray(fb3),
    }


def init_params(key):
    ks = jax.random.split(key, 10)

    def uni(k, shape, fan_in):
        bound = 1.0 / np.sqrt(fan_in)
        return jax.random.uniform(k, shape, jnp.float32, -bound, bound)

    return {
        "conv1_w": uni(ks[0], (6, 3, 5, 5), 3 * 5 * 5),
        "conv1_b": uni(ks[1], (6,), 3 * 5 * 5),
        "conv2_w": uni(ks[2], (16, 6, 5, 5), 6 * 5 * 5),
        "conv2_b": uni(ks[3], (16,), 6 * 5 * 5),
        "fc1_w": uni(ks[4], (120, 400), 400),
        "fc1_b": uni(ks[5], (120,), 400),
        "fc2_w": uni(ks[6], (84, 120), 120),
        "fc2_b": uni(ks[7], (84,), 120),
        "fc3_w": uni(ks[8], (10, 84), 84),
        "fc3_b": uni(ks[9], (10,), 84),
    }


# Pure-JAX reference (PyTorch layout/semantics; matmul/conv inputs rounded to
# bf16 to mirror the kernel's MXU precision, accumulation in f32).
def net_forward_ref(params, x):
    q = lambda a: a.astype(jnp.bfloat16).astype(jnp.float32)

    def conv(x, w, b):
        y = lax.conv_general_dilated(q(x), q(w), (1, 1), "VALID",
                                     dimension_numbers=("NCHW", "OIHW", "NCHW"))
        return jnp.maximum(y + b[None, :, None, None], 0.0)

    def pool(x):
        n, c, h, w = x.shape
        return x.reshape(n, c, h // 2, 2, w // 2, 2).max(axis=(3, 5))

    x = pool(conv(x, params["conv1_w"], params["conv1_b"]))
    x = pool(conv(x, params["conv2_w"], params["conv2_b"]))
    x = x.reshape(x.shape[0], -1)
    x = jnp.maximum(jnp.dot(q(x), q(params["fc1_w"]).T) + params["fc1_b"], 0.0)
    x = jnp.maximum(jnp.dot(q(x), q(params["fc2_w"]).T) + params["fc2_b"], 0.0)
    return jnp.dot(q(x), q(params["fc3_w"]).T) + params["fc3_b"]


if __name__ == "__main__":
    key = jax.random.PRNGKey(0)
    pkey, xkey = jax.random.split(key)
    params = init_params(pkey)
    kparams = prepare_params(params)

    # 3x32x32 input so 16*5*5 = 400 lines up with fc1; 16 images -> grid of 2
    # batch blocks of 8 ("parallel", splits across v7x's two TensorCores).
    x = jax.random.normal(xkey, (16, 3, 32, 32), jnp.float32)

    out = jax.block_until_ready(net_forward(kparams, x))
    assert out.shape == (16, 10), out.shape

    ref = net_forward_ref(params, x)
    err = float(jnp.max(jnp.abs(out - ref)))
    assert jnp.allclose(out, ref, atol=1e-2, rtol=1e-2), err

    print("KERNEL_OK")
</pallas_src>

<mosaic_0001>
module attributes {stable_mosaic.version = 11 : i64} {
  func.func @_net_kernel(%arg0: i32, %arg1: memref<320x96xf32, #tpu.memory_space<vmem>>, %arg2: memref<5x96x256xbf16, #tpu.memory_space<vmem>>, %arg3: memref<1x128xf32, #tpu.memory_space<vmem>>, %arg4: memref<5x128x256xbf16, #tpu.memory_space<vmem>>, %arg5: memref<1x128xf32, #tpu.memory_space<vmem>>, %arg6: memref<5x128x128xbf16, #tpu.memory_space<vmem>>, %arg7: memref<1x128xf32, #tpu.memory_space<vmem>>, %arg8: memref<128x128xbf16, #tpu.memory_space<vmem>>, %arg9: memref<1x128xf32, #tpu.memory_space<vmem>>, %arg10: memref<128x10xbf16, #tpu.memory_space<vmem>>, %arg11: memref<1x10xf32, #tpu.memory_space<vmem>>, %arg12: memref<8x10xf32, #tpu.memory_space<vmem>>, %arg13: memref<312x256xf32, #tpu.memory_space<vmem>>, %arg14: memref<312x128xf32, #tpu.memory_space<vmem>>, %arg15: memref<156x128xf32, #tpu.memory_space<vmem>>, %arg16: memref<152x256xf32, #tpu.memory_space<vmem>>, %arg17: memref<152x128xf32, #tpu.memory_space<vmem>>) attributes {dimension_semantics = [#tpu.dimension_semantics<parallel>], iteration_bounds = array<i64: 2>, scalar_prefetch = 0 : i64, scratch_operands = 5 : i64, tpu.core_type = #tpu.core_type<tc>, window_params = [{transform_indices = @transform_0, window_bounds = array<i64: 320, 96>}, {pipeline_mode = #tpu.pipeline_mode<synchronous>, transform_indices = @transform_1, window_bounds = array<i64: 5, 96, 256>}, {pipeline_mode = #tpu.pipeline_mode<synchronous>, transform_indices = @transform_2, window_bounds = array<i64: 1, 128>}, {pipeline_mode = #tpu.pipeline_mode<synchronous>, transform_indices = @transform_3, window_bounds = array<i64: 5, 128, 256>}, {pipeline_mode = #tpu.pipeline_mode<synchronous>, transform_indices = @transform_4, window_bounds = array<i64: 1, 128>}, {pipeline_mode = #tpu.pipeline_mode<synchronous>, transform_indices = @transform_5, window_bounds = array<i64: 5, 128, 128>}, {pipeline_mode = #tpu.pipeline_mode<synchronous>, transform_indices = @transform_6, window_bounds = array<i64: 1, 128>}, {pipeline_mode = #tpu.pipeline_mode<synchronous>, transform_indices = @transform_7, window_bounds = array<i64: 128, 128>}, {pipeline_mode = #tpu.pipeline_mode<synchronous>, transform_indices = @transform_8, window_bounds = array<i64: 1, 128>}, {pipeline_mode = #tpu.pipeline_mode<synchronous>, transform_indices = @transform_9, window_bounds = array<i64: 128, 10>}, {pipeline_mode = #tpu.pipeline_mode<synchronous>, transform_indices = @transform_10, window_bounds = array<i64: 1, 10>}, {transform_indices = @transform_11, window_bounds = array<i64: 8, 10>}]} {
    %c0 = arith.constant 0 : index
    %c0_0 = arith.constant 0 : index
    %0 = vector.load %arg1[%c0, %c0_0] : memref<320x96xf32, #tpu.memory_space<vmem>>, vector<312x96xf32>
    %1 = arith.truncf %0 : vector<312x96xf32> to vector<312x96xbf16>
    %c0_1 = arith.constant 0 : index
    %c0_2 = arith.constant 0 : index
    %c0_3 = arith.constant 0 : index
    %2 = vector.load %arg2[%c0_1, %c0_2, %c0_3] : memref<5x96x256xbf16, #tpu.memory_space<vmem>>, vector<1x96x256xbf16>
    %3 = vector.shape_cast %2 : vector<1x96x256xbf16> to vector<96x256xbf16>
    %cst = arith.constant dense<0.000000e+00> : vector<312x256xf32>
    %4 = tpu.matmul %1, %3, %cst {dimension_numbers = #tpu.dot_dimension_numbers<[1], [0], [0], [1], [0, 0, 1, 1], [], []>} : vector<312x96xbf16>, vector<96x256xbf16>, vector<312x256xf32> -> vector<312x256xf32>
    %c0_4 = arith.constant 0 : index
    %c0_5 = arith.constant 0 : index
    %5 = vector.load %arg13[%c0_4, %c0_5] : memref<312x256xf32, #tpu.memory_space<vmem>>, vector<312x256xf32>
    tpu.vector_store %arg13[%c0_4, %c0_5], %4 {strides = array<i32>} : memref<312x256xf32, #tpu.memory_space<vmem>>, vector<312x256xf32>,
    %c1 = arith.constant 1 : index
    %c0_6 = arith.constant 0 : index
    %6 = vector.load %arg1[%c1, %c0_6] : memref<320x96xf32, #tpu.memory_space<vmem>>, vector<312x96xf32>
    %7 = arith.truncf %6 : vector<312x96xf32> to vector<312x96xbf16>
    %c1_7 = arith.constant 1 : index
    %c0_8 = arith.constant 0 : index
    %c0_9 = arith.constant 0 : index
    %8 = vector.load %arg2[%c1_7, %c0_8, %c0_9] : memref<5x96x256xbf16, #tpu.memory_space<vmem>>, vector<1x96x256xbf16>
    %9 = vector.shape_cast %8 : vector<1x96x256xbf16> to vector<96x256xbf16>
    %cst_10 = arith.constant dense<0.000000e+00> : vector<312x256xf32>
    %10 = tpu.matmul %7, %9, %cst_10 {dimension_numbers = #tpu.dot_dimension_numbers<[1], [0], [0], [1], [0, 0, 1, 1], [], []>} : vector<312x96xbf16>, vector<96x256xbf16>, vector<312x256xf32> -> vector<312x256xf32>
    %c0_11 = arith.constant 0 : index
    %c0_12 = arith.constant 0 : index
    %11 = vector.load %arg13[%c0_11, %c0_12] : memref<312x256xf32, #tpu.memory_space<vmem>>, vector<312x256xf32>
    %12 = arith.addf %11, %10 : vector<312x256xf32>
    %c0_13 = arith.constant 0 : index
    %c0_14 = arith.constant 0 : index
    %13 = vector.load %arg13[%c0_13, %c0_14] : memref<312x256xf32, #tpu.memory_space<vmem>>, vector<312x256xf32>
    tpu.vector_store %arg13[%c0_13, %c0_14], %12 {strides = array<i32>} : memref<312x256xf32, #tpu.memory_space<vmem>>, vector<312x256xf32>,
    %c2 = arith.constant 2 : index
    %c0_15 = arith.constant 0 : index
    %14 = vector.load %arg1[%c2, %c0_15] : memref<320x96xf32, #tpu.memory_space<vmem>>, vector<312x96xf32>
    %15 = arith.truncf %14 : vector<312x96xf32> to vector<312x96xbf16>
    %c2_16 = arith.constant 2 : index
    %c0_17 = arith.constant 0 : index
    %c0_18 = arith.constant 0 : index
    %16 = vector.load %arg2[%c2_16, %c0_17, %c0_18] : memref<5x96x256xbf16, #tpu.memory_space<vmem>>, vector<1x96x256xbf16>
    %17 = vector.shape_cast %16 : vector<1x96x256xbf16> to vector<96x256xbf16>
    %cst_19 = arith.constant dense<0.000000e+00> : vector<312x256xf32>
    %18 = tpu.matmul %15, %17, %cst_19 {dimension_numbers = #tpu.dot_dimension_numbers<[1], [0], [0], [1], [0, 0, 1, 1], [], []>} : vector<312x96xbf16>, vector<96x256xbf16>, vector<312x256xf32> -> vector<312x256xf32>
    %c0_20 = arith.constant 0 : index
    %c0_21 = arith.constant 0 : index
    %19 = vector.load %arg13[%c0_20, %c0_21] : memref<312x256xf32, #tpu.memory_space<vmem>>, vector<312x256xf32>
    %20 = arith.addf %19, %18 : vector<312x256xf32>
    %c0_22 = arith.constant 0 : index
    %c0_23 = arith.constant 0 : index
    %21 = vector.load %arg13[%c0_22, %c0_23] : memref<312x256xf32, #tpu.memory_space<vmem>>, vector<312x256xf32>
    tpu.vector_store %arg13[%c0_22, %c0_23], %20 {strides = array<i32>} : memref<312x256xf32, #tpu.memory_space<vmem>>, vector<312x256xf32>,
    %c3 = arith.constant 3 : index
    %c0_24 = arith.constant 0 : index
    %22 = vector.load %arg1[%c3, %c0_24] : memref<320x96xf32, #tpu.memory_space<vmem>>, vector<312x96xf32>
    %23 = arith.truncf %22 : vector<312x96xf32> to vector<312x96xbf16>
    %c3_25 = arith.constant 3 : index
    %c0_26 = arith.constant 0 : index
    %c0_27 = arith.constant 0 : index
    %24 = vector.load %arg2[%c3_25, %c0_26, %c0_27] : memref<5x96x256xbf16, #tpu.memory_space<vmem>>, vector<1x96x256xbf16>
    %25 = vector.shape_cast %24 : vector<1x96x256xbf16> to vector<96x256xbf16>
    %cst_28 = arith.constant dense<0.000000e+00> : vector<312x256xf32>
    %26 = tpu.matmul %23, %25, %cst_28 {dimension_numbers = #tpu.dot_dimension_numbers<[1], [0], [0], [1], [0, 0, 1, 1], [], []>} : vector<312x96xbf16>, vector<96x256xbf16>, vector<312x256xf32> -> vector<312x256xf32>
    %c0_29 = arith.constant 0 : index
    %c0_30 = arith.constant 0 : index
    %27 = vector.load %arg13[%c0_29, %c0_30] : memref<312x256xf32, #tpu.memory_space<vmem>>, vector<312x256xf32>
    %28 = arith.addf %27, %26 : vector<312x256xf32>
    %c0_31 = arith.constant 0 : index
    %c0_32 = arith.constant 0 : index
    %29 = vector.load %arg13[%c0_31, %c0_32] : memref<312x256xf32, #tpu.memory_space<vmem>>, vector<312x256xf32>
    tpu.vector_store %arg13[%c0_31, %c0_32], %28 {strides = array<i32>} : memref<312x256xf32, #tpu.memory_space<vmem>>, vector<312x256xf32>,
    %c4 = arith.constant 4 : index
    %c0_33 = arith.constant 0 : index
    %30 = vector.load %arg1[%c4, %c0_33] : memref<320x96xf32, #tpu.memory_space<vmem>>, vector<312x96xf32>
    %31 = arith.truncf %30 : vector<312x96xf32> to vector<312x96xbf16>
    %c4_34 = arith.constant 4 : index
    %c0_35 = arith.constant 0 : index
    %c0_36 = arith.constant 0 : index
    %32 = vector.load %arg2[%c4_34, %c0_35, %c0_36] : memref<5x96x256xbf16, #tpu.memory_space<vmem>>, vector<1x96x256xbf16>
    %33 = vector.shape_cast %32 : vector<1x96x256xbf16> to vector<96x256xbf16>
    %cst_37 = arith.constant dense<0.000000e+00> : vector<312x256xf32>
    %34 = tpu.matmul %31, %33, %cst_37 {dimension_numbers = #tpu.dot_dimension_numbers<[1], [0], [0], [1], [0, 0, 1, 1], [], []>} : vector<312x96xbf16>, vector<96x256xbf16>, vector<312x256xf32> -> vector<312x256xf32>
    %c0_38 = arith.constant 0 : index
    %c0_39 = arith.constant 0 : index
    %35 = vector.load %arg13[%c0_38, %c0_39] : memref<312x256xf32, #tpu.memory_space<vmem>>, vector<312x256xf32>
    %36 = arith.addf %35, %34 : vector<312x256xf32>
    %c0_40 = arith.constant 0 : index
    %c0_41 = arith.constant 0 : index
    %37 = vector.load %arg13[%c0_40, %c0_41] : memref<312x256xf32, #tpu.memory_space<vmem>>, vector<312x256xf32>
    tpu.vector_store %arg13[%c0_40, %c0_41], %36 {strides = array<i32>} : memref<312x256xf32, #tpu.memory_space<vmem>>, vector<312x256xf32>,
    %c0_42 = arith.constant 0 : index
    %c0_43 = arith.constant 0 : index
    %38 = vector.load %arg13[%c0_42, %c0_43] : memref<312x256xf32, #tpu.memory_space<vmem>>, vector<312x128xf32>
    %c0_44 = arith.constant 0 : index
    %c128 = arith.constant 128 : index
    %39 = vector.load %arg13[%c0_44, %c128] : memref<312x256xf32, #tpu.memory_space<vmem>>, vector<312x128xf32>
    %40 = arith.maximumf %38, %39 : vector<312x128xf32>
    %c0_45 = arith.constant 0 : index
    %c0_46 = arith.constant 0 : index
    %41 = vector.load %arg3[%c0_45, %c0_46] : memref<1x128xf32, #tpu.memory_space<vmem>>, vector<1x128xf32>
    %42 = vector.broadcast %41 : vector<1x128xf32> to vector<312x128xf32>
    %43 = arith.addf %40, %42 : vector<312x128xf32>
    %cst_47 = arith.constant 0.000000e+00 : f32
    %44 = vector.broadcast %cst_47 : f32 to vector<312x128xf32>
    %45 = arith.maximumf %43, %44 : vector<312x128xf32>
    %c0_48 = arith.constant 0 : index
    %c0_49 = arith.constant 0 : index
    %46 = vector.load %arg14[%c0_48, %c0_49] : memref<312x128xf32, #tpu.memory_space<vmem>>, vector<312x128xf32>
    tpu.vector_store %arg14[%c0_48, %c0_49], %45 {strides = array<i32>} : memref<312x128xf32, #tpu.memory_space<vmem>>, vector<312x128xf32>,
    %c0_50 = arith.constant 0 : index
    %c0_51 = arith.constant 0 : index
    %47 = tpu.strided_load %arg14[%c0_50, %c0_51] {strides = array<i32: 2, 1>} : memref<312x128xf32, #tpu.memory_space<vmem>>, vector<156x128xf32>
    %c1_52 = arith.constant 1 : index
    %c0_53 = arith.constant 0 : index
    %48 = tpu.strided_load %arg14[%c1_52, %c0_53] {strides = array<i32: 2, 1>} : memref<312x128xf32, #tpu.memory_space<vmem>>, vector<156x128xf32>
    %49 = arith.maximumf %47, %48 : vector<156x128xf32>
    %c0_54 = arith.constant 0 : index
    %c0_55 = arith.constant 0 : index
    %50 = vector.load %arg15[%c0_54, %c0_55] : memref<156x128xf32, #tpu.memory_space<vmem>>, vector<156x128xf32>
    tpu.vector_store %arg15[%c0_54, %c0_55], %49 {strides = array<i32>} : memref<156x128xf32, #tpu.memory_space<vmem>>, vector<156x128xf32>,
    %c0_56 = arith.constant 0 : index
    %c0_57 = arith.constant 0 : index
    %51 = vector.load %arg15[%c0_56, %c0_57] : memref<156x128xf32, #tpu.memory_space<vmem>>, vector<152x128xf32>
    %52 = arith.truncf %51 : vector<152x128xf32> to vector<152x128xbf16>
    %c0_58 = arith.constant 0 : index
    %c0_59 = arith.constant 0 : index
    %c0_60 = arith.constant 0 : index
    %53 = vector.load %arg4[%c0_58, %c0_59, %c0_60] : memref<5x128x256xbf16, #tpu.memory_space<vmem>>, vector<1x128x256xbf16>
    %54 = vector.shape_cast %53 : vector<1x128x256xbf16> to vector<128x256xbf16>
    %cst_61 = arith.constant dense<0.000000e+00> : vector<152x256xf32>
    %55 = tpu.matmul %52, %54, %cst_61 {dimension_numbers = #tpu.dot_dimension_numbers<[1], [0], [0], [1], [0, 0, 1, 1], [], []>} : vector<152x128xbf16>, vector<128x256xbf16>, vector<152x256xf32> -> vector<152x256xf32>
    %c0_62 = arith.constant 0 : index
    %c0_63 = arith.constant 0 : index
    %56 = vector.load %arg16[%c0_62, %c0_63] : memref<152x256xf32, #tpu.memory_space<vmem>>, vector<152x256xf32>
    tpu.vector_store %arg16[%c0_62, %c0_63], %55 {strides = array<i32>} : memref<152x256xf32, #tpu.memory_space<vmem>>, vector<152x256xf32>,
    %c1_64 = arith.constant 1 : index
    %c0_65 = arith.constant 0 : index
    %57 = vector.load %arg15[%c1_64, %c0_65] : memref<156x128xf32, #tpu.memory_space<vmem>>, vector<152x128xf32>
    %58 = arith.truncf %57 : vector<152x128xf32> to vector<152x128xbf16>
    %c1_66 = arith.constant 1 : index
    %c0_67 = arith.constant 0 : index
    %c0_68 = arith.constant 0 : index
    %59 = vector.load %arg4[%c1_66, %c0_67, %c0_68] : memref<5x128x256xbf16, #tpu.memory_space<vmem>>, vector<1x128x256xbf16>
    %60 = vector.shape_cast %59 : vector<1x128x256xbf16> to vector<128x256xbf16>
    %cst_69 = arith.constant dense<0.000000e+00> : vector<152x256xf32>
    %61 = tpu.matmul %58, %60, %cst_69 {dimension_numbers = #tpu.dot_dimension_numbers<[1], [0], [0], [1], [0, 0, 1, 1], [], []>} : vector<152x128xbf16>, vector<128x256xbf16>, vector<152x256xf32> -> vector<152x256xf32>
    %c0_70 = arith.constant 0 : index
    %c0_71 = arith.constant 0 : index
    %62 = vector.load %arg16[%c0_70, %c0_71] : memref<152x256xf32, #tpu.memory_space<vmem>>, vector<152x256xf32>
    %63 = arith.addf %62, %61 : vector<152x256xf32>
    %c0_72 = arith.constant 0 : index
    %c0_73 = arith.constant 0 : index
    %64 = vector.load %arg16[%c0_72, %c0_73] : memref<152x256xf32, #tpu.memory_space<vmem>>, vector<152x256xf32>
    tpu.vector_store %arg16[%c0_72, %c0_73], %63 {strides = array<i32>} : memref<152x256xf32, #tpu.memory_space<vmem>>, vector<152x256xf32>,
    %c2_74 = arith.constant 2 : index
    %c0_75 = arith.constant 0 : index
    %65 = vector.load %arg15[%c2_74, %c0_75] : memref<156x128xf32, #tpu.memory_space<vmem>>, vector<152x128xf32>
    %66 = arith.truncf %65 : vector<152x128xf32> to vector<152x128xbf16>
    %c2_76 = arith.constant 2 : index
    %c0_77 = arith.constant 0 : index
    %c0_78 = arith.constant 0 : index
    %67 = vector.load %arg4[%c2_76, %c0_77, %c0_78] : memref<5x128x256xbf16, #tpu.memory_space<vmem>>, vector<1x128x256xbf16>
    %68 = vector.shape_cast %67 : vector<1x128x256xbf16> to vector<128x256xbf16>
    %cst_79 = arith.constant dense<0.000000e+00> : vector<152x256xf32>
    %69 = tpu.matmul %66, %68, %cst_79 {dimension_numbers = #tpu.dot_dimension_numbers<[1], [0], [0], [1], [0, 0, 1, 1], [], []>} : vector<152x128xbf16>, vector<128x256xbf16>, vector<152x256xf32> -> vector<152x256xf32>
    %c0_80 = arith.constant 0 : index
    %c0_81 = arith.constant 0 : index
    %70 = vector.load %arg16[%c0_80, %c0_81] : memref<152x256xf32, #tpu.memory_space<vmem>>, vector<152x256xf32>
    %71 = arith.addf %70, %69 : vector<152x256xf32>
    %c0_82 = arith.constant 0 : index
    %c0_83 = arith.constant 0 : index
    %72 = vector.load %arg16[%c0_82, %c0_83] : memref<152x256xf32, #tpu.memory_space<vmem>>, vector<152x256xf32>
    tpu.vector_store %arg16[%c0_82, %c0_83], %71 {strides = array<i32>} : memref<152x256xf32, #tpu.memory_space<vmem>>, vector<152x256xf32>,
    %c3_84 = arith.constant 3 : index
    %c0_85 = arith.constant 0 : index
    %73 = vector.load %arg15[%c3_84, %c0_85] : memref<156x128xf32, #tpu.memory_space<vmem>>, vector<152x128xf32>
    %74 = arith.truncf %73 : vector<152x128xf32> to vector<152x128xbf16>
    %c3_86 = arith.constant 3 : index
    %c0_87 = arith.constant 0 : index
    %c0_88 = arith.constant 0 : index
    %75 = vector.load %arg4[%c3_86, %c0_87, %c0_88] : memref<5x128x256xbf16, #tpu.memory_space<vmem>>, vector<1x128x256xbf16>
    %76 = vector.shape_cast %75 : vector<1x128x256xbf16> to vector<128x256xbf16>
    %cst_89 = arith.constant dense<0.000000e+00> : vector<152x256xf32>
    %77 = tpu.matmul %74, %76, %cst_89 {dimension_numbers = #tpu.dot_dimension_numbers<[1], [0], [0], [1], [0, 0, 1, 1], [], []>} : vector<152x128xbf16>, vector<128x256xbf16>, vector<152x256xf32> -> vector<152x256xf32>
    %c0_90 = arith.constant 0 : index
    %c0_91 = arith.constant 0 : index
    %78 = vector.load %arg16[%c0_90, %c0_91] : memref<152x256xf32, #tpu.memory_space<vmem>>, vector<152x256xf32>
    %79 = arith.addf %78, %77 : vector<152x256xf32>
    %c0_92 = arith.constant 0 : index
    %c0_93 = arith.constant 0 : index
    %80 = vector.load %arg16[%c0_92, %c0_93] : memref<152x256xf32, #tpu.memory_space<vmem>>, vector<152x256xf32>
    tpu.vector_store %arg16[%c0_92, %c0_93], %79 {strides = array<i32>} : memref<152x256xf32, #tpu.memory_space<vmem>>, vector<152x256xf32>,
    %c4_94 = arith.constant 4 : index
    %c0_95 = arith.constant 0 : index
    %81 = vector.load %arg15[%c4_94, %c0_95] : memref<156x128xf32, #tpu.memory_space<vmem>>, vector<152x128xf32>
    %82 = arith.truncf %81 : vector<152x128xf32> to vector<152x128xbf16>
    %c4_96 = arith.constant 4 : index
    %c0_97 = arith.constant 0 : index
    %c0_98 = arith.constant 0 : index
    %83 = vector.load %arg4[%c4_96, %c0_97, %c0_98] : memref<5x128x256xbf16, #tpu.memory_space<vmem>>, vector<1x128x256xbf16>
    %84 = vector.shape_cast %83 : vector<1x128x256xbf16> to vector<128x256xbf16>
    %cst_99 = arith.constant dense<0.000000e+00> : vector<152x256xf32>
    %85 = tpu.matmul %82, %84, %cst_99 {dimension_numbers = #tpu.dot_dimension_numbers<[1], [0], [0], [1], [0, 0, 1, 1], [], []>} : vector<152x128xbf16>, vector<128x256xbf16>, vector<152x256xf32> -> vector<152x256xf32>
    %c0_100 = arith.constant 0 : index
    %c0_101 = arith.constant 0 : index
    %86 = vector.load %arg16[%c0_100, %c0_101] : memref<152x256xf32, #tpu.memory_space<vmem>>, vector<152x256xf32>
    %87 = arith.addf %86, %85 : vector<152x256xf32>
    %c0_102 = arith.constant 0 : index
    %c0_103 = arith.constant 0 : index
    %88 = vector.load %arg16[%c0_102, %c0_103] : memref<152x256xf32, #tpu.memory_space<vmem>>, vector<152x256xf32>
    tpu.vector_store %arg16[%c0_102, %c0_103], %87 {strides = array<i32>} : memref<152x256xf32, #tpu.memory_space<vmem>>, vector<152x256xf32>,
    %c0_104 = arith.constant 0 : index
    %c0_105 = arith.constant 0 : index
    %89 = vector.load %arg16[%c0_104, %c0_105] : memref<152x256xf32, #tpu.memory_space<vmem>>, vector<152x128xf32>
    %c0_106 = arith.constant 0 : index
    %c128_107 = arith.constant 128 : index
    %90 = vector.load %arg16[%c0_106, %c128_107] : memref<152x256xf32, #tpu.memory_space<vmem>>, vector<152x128xf32>
    %91 = arith.maximumf %89, %90 : vector<152x128xf32>
    %c0_108 = arith.constant 0 : index
    %c0_109 = arith.constant 0 : index
    %92 = vector.load %arg5[%c0_108, %c0_109] : memref<1x128xf32, #tpu.memory_space<vmem>>, vector<1x128xf32>
    %93 = vector.broadcast %92 : vector<1x128xf32> to vector<152x128xf32>
    %94 = arith.addf %91, %93 : vector<152x128xf32>
    %cst_110 = arith.constant 0.000000e+00 : f32
    %95 = vector.broadcast %cst_110 : f32 to vector<152x128xf32>
    %96 = arith.maximumf %94, %95 : vector<152x128xf32>
    %c0_111 = arith.constant 0 : index
    %c0_112 = arith.constant 0 : index
    %97 = vector.load %arg17[%c0_111, %c0_112] : memref<152x128xf32, #tpu.memory_space<vmem>>, vector<152x128xf32>
    tpu.vector_store %arg17[%c0_111, %c0_112], %96 {strides = array<i32>} : memref<152x128xf32, #tpu.memory_space<vmem>>, vector<152x128xf32>,
    %cst_113 = arith.constant 0.000000e+00 : f32
    %98 = vector.broadcast %cst_113 : f32 to vector<8x128xf32>
    %c0_114 = arith.constant 0 : index
    %c0_115 = arith.constant 0 : index
    %99 = tpu.strided_load %arg17[%c0_114, %c0_115] {strides = array<i32: 20, 1>} : memref<152x128xf32, #tpu.memory_space<vmem>>, vector<8x128xf32>
    %c1_116 = arith.constant 1 : index
    %c0_117 = arith.constant 0 : index
    %100 = tpu.strided_load %arg17[%c1_116, %c0_117] {strides = array<i32: 20, 1>} : memref<152x128xf32, #tpu.memory_space<vmem>>, vector<8x128xf32>
    %101 = arith.maximumf %99, %100 : vector<8x128xf32>
    %102 = arith.truncf %101 : vector<8x128xf32> to vector<8x128xbf16>
    %c0_118 = arith.constant 0 : index
    %c0_119 = arith.constant 0 : index
    %c0_120 = arith.constant 0 : index
    %103 = vector.load %arg6[%c0_118, %c0_119, %c0_120] : memref<5x128x128xbf16, #tpu.memory_space<vmem>>, vector<1x128x128xbf16>
    %104 = vector.shape_cast %103 : vector<1x128x128xbf16> to vector<128x128xbf16>
    %cst_121 = arith.constant dense<0.000000e+00> : vector<8x128xf32>
    %105 = tpu.matmul %102, %104, %cst_121 {dimension_numbers = #tpu.dot_dimension_numbers<[1], [0], [0], [1], [0, 0, 1, 1], [], []>} : vector<8x128xbf16>, vector<128x128xbf16>, vector<8x128xf32> -> vector<8x128xf32>
    %106 = arith.addf %98, %105 : vector<8x128xf32>
    %c2_122 = arith.constant 2 : index
    %c0_123 = arith.constant 0 : index
    %107 = tpu.strided_load %arg17[%c2_122, %c0_123] {strides = array<i32: 20, 1>} : memref<152x128xf32, #tpu.memory_space<vmem>>, vector<8x128xf32>
    %c3_124 = arith.constant 3 : index
    %c0_125 = arith.constant 0 : index
    %108 = tpu.strided_load %arg17[%c3_124, %c0_125] {strides = array<i32: 20, 1>} : memref<152x128xf32, #tpu.memory_space<vmem>>, vector<8x128xf32>
    %109 = arith.maximumf %107, %108 : vector<8x128xf32>
    %110 = arith.truncf %109 : vector<8x128xf32> to vector<8x128xbf16>
    %c1_126 = arith.constant 1 : index
    %c0_127 = arith.constant 0 : index
    %c0_128 = arith.constant 0 : index
    %111 = vector.load %arg6[%c1_126, %c0_127, %c0_128] : memref<5x128x128xbf16, #tpu.memory_space<vmem>>, vector<1x128x128xbf16>
    %112 = vector.shape_cast %111 : vector<1x128x128xbf16> to vector<128x128xbf16>
    %cst_129 = arith.constant dense<0.000000e+00> : vector<8x128xf32>
    %113 = tpu.matmul %110, %112, %cst_129 {dimension_numbers = #tpu.dot_dimension_numbers<[1], [0], [0], [1], [0, 0, 1, 1], [], []>} : vector<8x128xbf16>, vector<128x128xbf16>, vector<8x128xf32> -> vector<8x128xf32>
    %114 = arith.addf %106, %113 : vector<8x128xf32>
    %c4_130 = arith.constant 4 : index
    %c0_131 = arith.constant 0 : index
    %115 = tpu.strided_load %arg17[%c4_130, %c0_131] {strides = array<i32: 20, 1>} : memref<152x128xf32, #tpu.memory_space<vmem>>, vector<8x128xf32>
    %c5 = arith.constant 5 : index
    %c0_132 = arith.constant 0 : index
    %116 = tpu.strided_load %arg17[%c5, %c0_132] {strides = array<i32: 20, 1>} : memref<152x128xf32, #tpu.memory_space<vmem>>, vector<8x128xf32>
    %117 = arith.maximumf %115, %116 : vector<8x128xf32>
    %118 = arith.truncf %117 : vector<8x128xf32> to vector<8x128xbf16>
    %c2_133 = arith.constant 2 : index
    %c0_134 = arith.constant 0 : index
    %c0_135 = arith.constant 0 : index
    %119 = vector.load %arg6[%c2_133, %c0_134, %c0_135] : memref<5x128x128xbf16, #tpu.memory_space<vmem>>, vector<1x128x128xbf16>
    %120 = vector.shape_cast %119 : vector<1x128x128xbf16> to vector<128x128xbf16>
    %cst_136 = arith.constant dense<0.000000e+00> : vector<8x128xf32>
    %121 = tpu.matmul %118, %120, %cst_136 {dimension_numbers = #tpu.dot_dimension_numbers<[1], [0], [0], [1], [0, 0, 1, 1], [], []>} : vector<8x128xbf16>, vector<128x128xbf16>, vector<8x128xf32> -> vector<8x128xf32>
    %122 = arith.addf %114, %121 : vector<8x128xf32>
    %c6 = arith.constant 6 : index
    %c0_137 = arith.constant 0 : index
    %123 = tpu.strided_load %arg17[%c6, %c0_137] {strides = array<i32: 20, 1>} : memref<152x128xf32, #tpu.memory_space<vmem>>, vector<8x128xf32>
    %c7 = arith.constant 7 : index
    %c0_138 = arith.constant 0 : index
    %124 = tpu.strided_load %arg17[%c7, %c0_138] {strides = array<i32: 20, 1>} : memref<152x128xf32, #tpu.memory_space<vmem>>, vector<8x128xf32>
    %125 = arith.maximumf %123, %124 : vector<8x128xf32>
    %126 = arith.truncf %125 : vector<8x128xf32> to vector<8x128xbf16>
    %c3_139 = arith.constant 3 : index
    %c0_140 = arith.constant 0 : index
    %c0_141 = arith.constant 0 : index
    %127 = vector.load %arg6[%c3_139, %c0_140, %c0_141] : memref<5x128x128xbf16, #tpu.memory_space<vmem>>, vector<1x128x128xbf16>
    %128 = vector.shape_cast %127 : vector<1x128x128xbf16> to vector<128x128xbf16>
    %cst_142 = arith.constant dense<0.000000e+00> : vector<8x128xf32>
    %129 = tpu.matmul %126, %128, %cst_142 {dimension_numbers = #tpu.dot_dimension_numbers<[1], [0], [0], [1], [0, 0, 1, 1], [], []>} : vector<8x128xbf16>, vector<128x128xbf16>, vector<8x128xf32> -> vector<8x128xf32>
    %130 = arith.addf %122, %129 : vector<8x128xf32>
    %c8 = arith.constant 8 : index
    %c0_143 = arith.constant 0 : index
    %131 = tpu.strided_load %arg17[%c8, %c0_143] {strides = array<i32: 20, 1>} : memref<152x128xf32, #tpu.memory_space<vmem>>, vector<8x128xf32>
    %c9 = arith.constant 9 : index
    %c0_144 = arith.constant 0 : index
    %132 = tpu.strided_load %arg17[%c9, %c0_144] {strides = array<i32: 20, 1>} : memref<152x128xf32, #tpu.memory_space<vmem>>, vector<8x128xf32>
    %133 = arith.maximumf %131, %132 : vector<8x128xf32>
    %134 = arith.truncf %133 : vector<8x128xf32> to vector<8x128xbf16>
    %c4_145 = arith.constant 4 : index
    %c0_146 = arith.constant 0 : index
    %c0_147 = arith.constant 0 : index
    %135 = vector.load %arg6[%c4_145, %c0_146, %c0_147] : memref<5x128x128xbf16, #tpu.memory_space<vmem>>, vector<1x128x128xbf16>
    %136 = vector.shape_cast %135 : vector<1x128x128xbf16> to vector<128x128xbf16>
    %cst_148 = arith.constant dense<0.000000e+00> : vector<8x128xf32>
    %137 = tpu.matmul %134, %136, %cst_148 {dimension_numbers = #tpu.dot_dimension_numbers<[1], [0], [0], [1], [0, 0, 1, 1], [], []>} : vector<8x128xbf16>, vector<128x128xbf16>, vector<8x128xf32> -> vector<8x128xf32>
    %138 = arith.addf %130, %137 : vector<8x128xf32>
    %c0_149 = arith.constant 0 : index
    %c0_150 = arith.constant 0 : index
    %139 = vector.load %arg7[%c0_149, %c0_150] : memref<1x128xf32, #tpu.memory_space<vmem>>, vector<1x128xf32>
    %140 = vector.broadcast %139 : vector<1x128xf32> to vector<8x128xf32>
    %141 = arith.addf %138, %140 : vector<8x128xf32>
    %cst_151 = arith.constant 0.000000e+00 : f32
    %142 = vector.broadcast %cst_151 : f32 to vector<8x128xf32>
    %143 = arith.maximumf %141, %142 : vector<8x128xf32>
    %144 = arith.truncf %143 : vector<8x128xf32> to vector<8x128xbf16>
    %c0_152 = arith.constant 0 : index
    %c0_153 = arith.constant 0 : index
    %145 = vector.load %arg8[%c0_152, %c0_153] : memref<128x128xbf16, #tpu.memory_space<vmem>>, vector<128x128xbf16>
    %cst_154 = arith.constant dense<0.000000e+00> : vector<8x128xf32>
    %146 = tpu.matmul %144, %145, %cst_154 {dimension_numbers = #tpu.dot_dimension_numbers<[1], [0], [0], [1], [0, 0, 1, 1], [], []>} : vector<8x128xbf16>, vector<128x128xbf16>, vector<8x128xf32> -> vector<8x128xf32>
    %c0_155 = arith.constant 0 : index
    %c0_156 = arith.constant 0 : index
    %147 = vector.load %arg9[%c0_155, %c0_156] : memref<1x128xf32, #tpu.memory_space<vmem>>, vector<1x128xf32>
    %148 = vector.broadcast %147 : vector<1x128xf32> to vector<8x128xf32>
    %149 = arith.addf %146, %148 : vector<8x128xf32>
    %cst_157 = arith.constant 0.000000e+00 : f32
    %150 = vector.broadcast %cst_157 : f32 to vector<8x128xf32>
    %151 = arith.maximumf %149, %150 : vector<8x128xf32>
    %152 = arith.truncf %151 : vector<8x128xf32> to vector<8x128xbf16>
    %c0_158 = arith.constant 0 : index
    %c0_159 = arith.constant 0 : index
    %153 = vector.load %arg10[%c0_158, %c0_159] : memref<128x10xbf16, #tpu.memory_space<vmem>>, vector<128x10xbf16>
    %cst_160 = arith.constant dense<0.000000e+00> : vector<8x10xf32>
    %154 = tpu.matmul %152, %153, %cst_160 {dimension_numbers = #tpu.dot_dimension_numbers<[1], [0], [0], [1], [0, 0, 1, 1], [], []>} : vector<8x128xbf16>, vector<128x10xbf16>, vector<8x10xf32> -> vector<8x10xf32>
    %c0_161 = arith.constant 0 : index
    %c0_162 = arith.constant 0 : index
    %155 = vector.load %arg11[%c0_161, %c0_162] : memref<1x10xf32, #tpu.memory_space<vmem>>, vector<1x10xf32>
    %156 = vector.broadcast %155 : vector<1x10xf32> to vector<8x10xf32>
    %157 = arith.addf %154, %156 : vector<8x10xf32>
    %c0_163 = arith.constant 0 : index
    %c0_164 = arith.constant 0 : index
    %158 = vector.load %arg12[%c0_163, %c0_164] : memref<8x10xf32, #tpu.memory_space<vmem>>, vector<8x10xf32>
    tpu.vector_store %arg12[%c0_163, %c0_164], %157 {strides = array<i32>} : memref<8x10xf32, #tpu.memory_space<vmem>>, vector<8x10xf32>,
    return
  }
  func.func @transform_0(%arg0: i32) -> (i32, i32) {
    %c0_i32 = arith.constant 0 : i32
    %c0_i32_0 = arith.constant 0 : i32
    return %arg0, %c0_i32 : i32, i32
  }
  func.func @transform_1(%arg0: i32) -> (i32, i32, i32) {
    %c0_i32 = arith.constant 0 : i32
    %c0_i32_0 = arith.constant 0 : i32
    %c0_i32_1 = arith.constant 0 : i32
    %c0_i32_2 = arith.constant 0 : i32
    return %c0_i32, %c0_i32_0, %c0_i32_1 : i32, i32, i32
  }
  func.func @transform_2(%arg0: i32) -> (i32, i32) {
    %c0_i32 = arith.constant 0 : i32
    %c0_i32_0 = arith.constant 0 : i32
    %c0_i32_1 = arith.constant 0 : i32
    return %c0_i32, %c0_i32_0 : i32, i32
  }
  func.func @transform_3(%arg0: i32) -> (i32, i32, i32) {
    %c0_i32 = arith.constant 0 : i32
    %c0_i32_0 = arith.constant 0 : i32
    %c0_i32_1 = arith.constant 0 : i32
    %c0_i32_2 = arith.constant 0 : i32
    return %c0_i32, %c0_i32_0, %c0_i32_1 : i32, i32, i32
  }
  func.func @transform_4(%arg0: i32) -> (i32, i32) {
    %c0_i32 = arith.constant 0 : i32
    %c0_i32_0 = arith.constant 0 : i32
    %c0_i32_1 = arith.constant 0 : i32
    return %c0_i32, %c0_i32_0 : i32, i32
  }
  func.func @transform_5(%arg0: i32) -> (i32, i32, i32) {
    %c0_i32 = arith.constant 0 : i32
    %c0_i32_0 = arith.constant 0 : i32
    %c0_i32_1 = arith.constant 0 : i32
    %c0_i32_2 = arith.constant 0 : i32
    return %c0_i32, %c0_i32_0, %c0_i32_1 : i32, i32, i32
  }
  func.func @transform_6(%arg0: i32) -> (i32, i32) {
    %c0_i32 = arith.constant 0 : i32
    %c0_i32_0 = arith.constant 0 : i32
    %c0_i32_1 = arith.constant 0 : i32
    return %c0_i32, %c0_i32_0 : i32, i32
  }
  func.func @transform_7(%arg0: i32) -> (i32, i32) {
    %c0_i32 = arith.constant 0 : i32
    %c0_i32_0 = arith.constant 0 : i32
    %c0_i32_1 = arith.constant 0 : i32
    return %c0_i32, %c0_i32_0 : i32, i32
  }
  func.func @transform_8(%arg0: i32) -> (i32, i32) {
    %c0_i32 = arith.constant 0 : i32
    %c0_i32_0 = arith.constant 0 : i32
    %c0_i32_1 = arith.constant 0 : i32
    return %c0_i32, %c0_i32_0 : i32, i32
  }
  func.func @transform_9(%arg0: i32) -> (i32, i32) {
    %c0_i32 = arith.constant 0 : i32
    %c0_i32_0 = arith.constant 0 : i32
    %c0_i32_1 = arith.constant 0 : i32
    return %c0_i32, %c0_i32_0 : i32, i32
  }
  func.func @transform_10(%arg0: i32) -> (i32, i32) {
    %c0_i32 = arith.constant 0 : i32
    %c0_i32_0 = arith.constant 0 : i32
    %c0_i32_1 = arith.constant 0 : i32
    return %c0_i32, %c0_i32_0 : i32, i32
  }
  func.func @transform_11(%arg0: i32) -> (i32, i32) {
    %c0_i32 = arith.constant 0 : i32
    %c0_i32_0 = arith.constant 0 : i32
    return %arg0, %c0_i32 : i32, i32
  }
}

</mosaic_0001>

<bundles_post_ra>
// kernel: _forward_impl.1
= control target key start
LH: loop header
LB: loop body
LE: loop exit
PB: predicated region body
PF: predicated region fallthrough
CT: control target
= control target key end

     0   :  { %16 = vsyncpa [#allocation8], 0  ;;  %s9977_s0 = inlined_call_operand.vmem [shape: f32[640,96], index: 0, kind: input, shape index: {}]   ;;  %s9978_s1 = inlined_call_operand.vmem [shape: bf16[5,96,256], index: 1, kind: input, shape index: {}]   ;;  %s9979_s2 = inlined_call_operand.vmem [shape: f32[1,128], index: 2, kind: input, shape index: {}]   ;;  %s9980_s3 = inlined_call_operand.vmem [shape: bf16[5,128,256], index: 3, kind: input, shape index: {}]   ;;  %s9981_s4 = inlined_call_operand.vmem [shape: f32[1,128], index: 4, kind: input, shape index: {}]   ;;  %s9982_s5 = inlined_call_operand.vmem [shape: bf16[5,128,128], index: 5, kind: input, shape index: {}]   ;;  %s9983_s6 = inlined_call_operand.vmem [shape: f32[1,128], index: 6, kind: input, shape index: {}]   ;;  %s9984_s7 = inlined_call_operand.vmem [shape: bf16[128,128], index: 7, kind: input, shape index: {}]   ;;  %s9985_s8 = inlined_call_operand.vmem [shape: f32[1,128], index: 8, kind: input, shape index: {}]   ;;  %s9986_s9 = inlined_call_operand.vmem [shape: bf16[128,10], index: 9, kind: input, shape index: {}]   ;;  %s9987_s10 = inlined_call_operand.vmem [shape: f32[1,10], index: 10, kind: input, shape index: {}]   ;;  %s9988_s11 = inlined_call_operand.hbm [shape: f32[16,10], index: 11, kind: output, shape index: {}]  }
   0x1   :  { %18 = vsyncpa [#allocation8 + $0x1], 0  ;;  %s7766_s17 = smov 0   ;;  %s7768_s18 = smov 0  }
   0x2   :  { %s7770_s19 = smov 0   ;;  %s7772_s20 = smov 0  }
   0x3 LB: > { %9995 = sst [smem:[#allocation10_spill]] %s7696_s19  ;;  %s7787_s21 = sadd.s32 4294967295, %s7700_s20   ;;  %s7700_s20 = sphi %s7772_s20, %s10318_s20   ;;  %s7696_s19 = sphi %s7770_s19, %s10315_s19   ;;  %s7692_s18 = sphi %s7768_s18, %s10317_s18   ;;  %s7688_s17 = sphi %s7766_s17, %s10316_s17  }
   0x4   : > { %s6641_s22 = sadd.s32 4294967294, %s7700_s20   ;;  %s7791_s23 = sadd.s32 1, %s7700_s20  }
   0x5   : > { %s267_s24 = sadd.s32 1, %s7696_s19  ;;  %s264_s25 = ssub.s32 %s7700_s20, %s7791_s23 }
   0x6   : > { %p277_p0 = scmp.ne.s32.totalorder %s7696_s19, %s7692_s18  ;;  %p265_p1 = scmp.eq.s32.totalorder %s264_s25, 0 }
   0x7   : > { %p278_p2 = scmp.eq.s32.totalorder %s7787_s21, 1  ;;  %p283_p3 = scmp.ne.s32.totalorder %s7692_s18, %s7688_s17 }
   0x8   : > { %p284_p4 = scmp.eq.s32.totalorder %s6641_s22, 1  ;;  %p6644_p7 = scmp.ge.s32.totalorder %s7700_s20, 1 }
   0x9   : > { %s7802_s26 = scalar_select %p265_p1, %s7696_s19, %s267_s24  }
   0xa   : > { %p7804_p5 = por %p278_p2, %p277_p0  ;;  %p7808_p6 = por %p284_p4, %p283_p3 }
   0xb   : > { %9996 = sst [smem:[#allocation11_spill]] %s7802_s26  ;;  %p341_p8 = scmp.lt.s32.totalorder %s7700_s20, 3 }
   0xd   : > { %p342_p9 = pnand %p6644_p7, %p341_p8 }
   0xf   : > { %345 = sbr.rel (%p342_p9) target bundleno = 1807 (0x70f), region = 64 }
  0x14   : > { %v7373_v0 = vld [vmem:[%s9978_s1 + $0x54] ss:$8 sps:$4 sm:$0xff]   ;;  %v9990_v2 = vmov 0   ;;  %s381_s14 = smul.u32 40, %s7787_s21  ;;  %v7377_v3 = vld [vmem:[%s9978_s1 + $0x50] ss:$8 sps:$4 sm:$0xff]  }
  0x15   : > { %v7375_v1 = vld [vmem:[%s9978_s1 + $0xb4] ss:$8 sps:$4 sm:$0xff]   ;;  %612 = vmatprep.mubr.bf16.mxu0 %v9990_v2  ;;  %1113 = vmatprep.mubr.bf16.mxu1 %v9990_v2  ;;  %v7378_v4 = vld [vmem:[%s9978_s1 + $0xb0] ss:$8 sps:$4 sm:$0xff]   ;;  %v7379_v5 = vld [vmem:[%s9978_s1 + $0x44] ss:$8 sps:$4 sm:$0xff]  }
  0x16   : > { %584 = vmatprep.subr.bf16.mxu0 %v7373_v0  ;;  %1085 = vmatprep.subr.bf16.mxu1 %v7375_v1  ;;  %v7381_v6 = vld [vmem:[%s9978_s1 + $0xa4] ss:$8 sps:$4 sm:$0xff]   ;;  %v7383_v7 = vld [vmem:[%s9978_s1 + $0x40] ss:$8 sps:$4 sm:$0xff]   ;;  %p382_p10 = scmp.lt.s32.totalorder %s381_s14, 79  ;;  %vm519_vm0 = vcmask 785408  }
  0x17   : > { %585 = vmatpush1.bf16.msra.mxu0 %v7377_v3  ;;  %1086 = vmatpush1.bf16.msra.mxu1 %v7378_v4  ;;  %v7384_v8 = vld [vmem:[%s9978_s1 + $0xa0] ss:$8 sps:$4 sm:$0xff]   ;;  %v7385_v9 = vld [vmem:[%s9978_s1 + $0x34] ss:$8 sps:$4 sm:$0xff]   ;;  %v7389_v11 = vld [vmem:[%s9978_s1 + $0x30] ss:$8 sps:$4 sm:$0xff]  }
  0x18   : > { %586 = vmatprep.subr.bf16.mxu0 %v7379_v5  ;;  %1087 = vmatprep.subr.bf16.mxu1 %v7381_v6  ;;  %v7387_v10 = vld [vmem:[%s9978_s1 + $0x94] ss:$8 sps:$4 sm:$0xff]   ;;  %v7390_v12 = vld [vmem:[%s9978_s1 + $0x90] ss:$8 sps:$4 sm:$0xff]   ;;  %v7391_v13 = vld [vmem:[%s9978_s1 + $0x24] ss:$8 sps:$4 sm:$0xff]  }
  0x19   : > { %v7393_v14 = vld [vmem:[%s9978_s1 + $0x84] ss:$8 sps:$4 sm:$0xff]   ;;  %s10320_s14 = smov (!%p382_p10, %s381_s14), 79  ;;  %v7395_v15 = vld [vmem:[%s9978_s1 + $0x20] ss:$8 sps:$4 sm:$0xff]   ;;  %vm7704_vm1 = vmmov 0  }
  0x1a   : > { %v7396_v16 = vld [vmem:[%s9978_s1 + $0x80] ss:$8 sps:$4 sm:$0xff]   ;;  %v7397_v17 = vld [vmem:[%s9978_s1 + $0x14] ss:$8 sps:$4 sm:$0xff]   ;;  %s6646_s22 = sshll.u32 %s10320_s14, 3  ;;  %s378_s14 = sand.u32 1, %s7692_s18  }
  0x1b   : > { %587 = vmatpush1.bf16.msra.mxu0 %v7383_v7  ;;  %1088 = vmatpush1.bf16.msra.mxu1 %v7384_v8  ;;  %v7399_v18 = vld [vmem:[%s9978_s1 + $0x74] ss:$8 sps:$4 sm:$0xff]   ;;  %v7401_v19 = vld [vmem:[%s9978_s1 + $0x10] ss:$8 sps:$4 sm:$0xff]   ;;  %v7403_v21 = vld [vmem:[%s9978_s1 + $0x4] ss:$8 sps:$4 sm:$0xff]   ;;  %s7883_s15 = scalar_lea.vmem %s9977_s0, %s6646_s22 }
  0x1c   : > { %588 = vmatprep.subr.bf16.mxu0 %v7385_v9  ;;  %1089 = vmatprep.subr.bf16.mxu1 %v7387_v10  ;;  %v7402_v20 = vld [vmem:[%s9978_s1 + $0x70] ss:$8 sps:$4 sm:$0xff]   ;;  %v7405_v22 = vld [vmem:[%s9978_s1 + $0x64] ss:$8 sps:$4 sm:$0xff]   ;;  %v7407_v23 = vld [vmem:[%s9978_s1] ss:$8 sps:$4 sm:$0xff]  }
  0x1d   : > { %v7408_v24 = vld [vmem:[%s9978_s1 + $0x60] ss:$8 sps:$4 sm:$0xff]   ;;  %v7411_v29 = vld [vmem:[%s9978_s1 + $0x114] ss:$8 sps:$4 sm:$0xff]   ;;  %v7409_v32 = vld [vmem:[%s9978_s1 + $0x110] ss:$8 sps:$4 sm:$0xff]  }
  0x1e   : > { %v388_v25 = vld [vmem:[%s7883_s15] sm:$0xff]  ;;  %v389_v26 = vld [vmem:[%s7883_s15 + $0x8] sm:$0xff]  ;;  %v390_v34 = vld [vmem:[%s7883_s15 + $0x10] sm:$0xff]  ;;  %s6645_s16 = sshll.u32 %s378_s14, 3  ;;  %s7125_s29 = sshll.u32 %s7787_s21, 7  ;;  %vm6566_vm2 = vcmask 80896  }
  0x1f   : > { %589 = vmatpush1.bf16.msra.mxu0 %v7389_v11  ;;  %1090 = vmatpush1.bf16.msra.mxu1 %v7390_v12  ;;  %v889_v27 = vld [vmem:[%s7883_s15 + $0x1] sm:$0xff]  ;;  %v890_v28 = vld [vmem:[%s7883_s15 + $0x9] sm:$0xff]  ;;  %v427_v30 = vpack.c.bf16 %v389_v26, %v388_v25  ;;  %v391_v35 = vld [vmem:[%s7883_s15 + $0x18] sm:$0xff]  ;;  %s380_s30 = scalar_lea.vmem [#allocation7], %s6645_s16  ;;  %s9936_s26 = scalar_lea.hbm %s9988_s11, %s7125_s29 }
  0x20   : > { %590 = vmatprep.subr.bf16.mxu0 %v7391_v13  ;;  %1091 = vmatprep.subr.bf16.mxu1 %v7393_v14  ;;  %v928_v31 = vpack.c.bf16 %v890_v28, %v889_v27  ;;  %v7414_v33 = vld [vmem:[%s9978_s1 + $0x104] ss:$8 sps:$4 sm:$0xff]   ;;  %v891_v36 = vld [vmem:[%s7883_s15 + $0x11] sm:$0xff]  ;;  %v892_v37 = vld [vmem:[%s7883_s15 + $0x19] sm:$0xff]  ;;  %v428_v40 = vpack.c.bf16 %v391_v35, %v390_v34  ;;  %s6582_s19 = sshll.u32 %s380_s30, 4  ;;  %s7705_s13 = smov [#allocation7]   ;;  %s9938_s19 = int_to_ptr.vmem [resolvable:$true] %s6582_s19 }
  0x21   : > { %v7412_v38 = vld [vmem:[%s9978_s1 + $0x100] ss:$8 sps:$4 sm:$0xff]   ;;  %v7417_v39 = vld [vmem:[%s9978_s1 + $0xf4] ss:$8 sps:$4 sm:$0xff]   ;;  %v929_v41 = vpack.c.bf16 %v892_v37, %v891_v36  ;;  %v7415_v42 = vld [vmem:[%s9978_s1 + $0xf0] ss:$8 sps:$4 sm:$0xff]  }
  0x22   : > { %v392_v43 = vld [vmem:[%s7883_s15 + $0x20] sm:$0xff]  ;;  %v393_v45 = vld [vmem:[%s7883_s15 + $0x28] sm:$0xff]  ;;  %v7423_v51 = vld [vmem:[%s9978_s1 + $0xd4] ss:$8 sps:$4 sm:$0xff]   ;;  %s7640_s21 = scalar_lea.vmem %s9938_s19, 128  ;;  %s7644_s16 = sshll.u32 %s7705_s13, 4  ;;  %s7645_s16 = int_to_ptr.vmem [resolvable:$false] %s7644_s16 }
  0x23   : > { %591 = vmatpush1.bf16.msra.mxu0 %v7395_v15  ;;  %1092 = vmatpush1.bf16.msra.mxu1 %v7396_v16  ;;  %v7420_v44 = vld [vmem:[%s9978_s1 + $0xe4] ss:$8 sps:$4 sm:$0xff]   ;;  %v7418_v48 = vld [vmem:[%s9978_s1 + $0xe0] ss:$8 sps:$4 sm:$0xff]   ;;  %v429_v49 = vpack.c.bf16 %v393_v45, %v392_v43  ;;  %v7421_v52 = vld [vmem:[%s9978_s1 + $0xd0] ss:$8 sps:$4 sm:$0xff]   ;;  %p7641_p11 = scmp.ne.s32.totalorder %s9938_s19, %s7640_s21  ;;  %p7647_p0 = scmp.lt.s32.totalorder %s9938_s19, %s7645_s16 }
  0x24   : > { %592 = vmatprep.subr.bf16.mxu0 %v7397_v17  ;;  %1093 = vmatprep.subr.bf16.mxu1 %v7399_v18  ;;  %v893_v46 = vld [vmem:[%s7883_s15 + $0x21] sm:$0xff]  ;;  %v894_v47 = vld [vmem:[%s7883_s15 + $0x29] sm:$0xff]  ;;  %v395_v54 = vld [vmem:[%s7883_s15 + $0x38] sm:$0xff]  ;;  %s7646_s24 = scalar_lea.vmem %s7645_s16, 256 }
  0x25   : > { %v930_v50 = vpack.c.bf16 %v894_v47, %v893_v46  ;;  %v394_v53 = vld [vmem:[%s7883_s15 + $0x30] sm:$0xff]  ;;  %v896_v56 = vld [vmem:[%s7883_s15 + $0x39] sm:$0xff]  ;;  %v7426_v58 = vld [vmem:[%s9978_s1 + $0xc4] ss:$8 sps:$4 sm:$0xff]   ;;  %p7642_p12 = pnand %p7641_p11, %p7804_p5  ;;  %p7648_p1 = scmp.lt.s32.totalorder %s7646_s24, %s7640_s21 }
  0x26   : > { %v895_v55 = vld [vmem:[%s7883_s15 + $0x31] sm:$0xff]  ;;  %v7424_v57 = vld [vmem:[%s9978_s1 + $0xc0] ss:$8 sps:$4 sm:$0xff]   ;;  %v430_v59 = vpack.c.bf16 %v395_v54, %v394_v53  ;;  %v7432_v3 = vld [vmem:[%s9978_s1 + $0x164] ss:$8 sps:$4 sm:$0xff]  }
  0x27   : > { %593 = vmatpush1.bf16.msra.mxu0 %v7401_v19  ;;  %1094 = vmatpush1.bf16.msra.mxu1 %v7402_v20  ;;  %v931_v60 = vpack.c.bf16 %v896_v56, %v895_v55  ;;  %v7429_v61 = vld [vmem:[%s9978_s1 + $0x174] ss:$8 sps:$4 sm:$0xff]   ;;  %v396_v62 = vld [vmem:[%s7883_s15 + $0x40] sm:$0xff]  ;;  %v7427_v63 = vld [vmem:[%s9978_s1 + $0x170] ss:$8 sps:$4 sm:$0xff]   ;;  %p7643_p13 = pneg %p7642_p12  ;;  %p7649_p2 = por %p7648_p1, %p7647_p0 }
  0x28   : > { %594 = vmatprep.subr.bf16.mxu0 %v7403_v21  ;;  %1095 = vmatprep.subr.bf16.mxu1 %v7405_v22  ;;  %v397_v0 = vld [vmem:[%s7883_s15 + $0x48] sm:$0xff]  ;;  %v7435_v8 = vld [vmem:[%s9978_s1 + $0x154] ss:$8 sps:$4 sm:$0xff]   ;;  %v7433_v10 = vld [vmem:[%s9978_s1 + $0x150] ss:$8 sps:$4 sm:$0xff]  }
  0x29   : > { %v897_v1 = vld [vmem:[%s7883_s15 + $0x41] sm:$0xff]  ;;  %v898_v4 = vld [vmem:[%s7883_s15 + $0x49] sm:$0xff]  ;;  %v431_v6 = vpack.c.bf16 %v397_v0, %v396_v62  ;;  %v7447_v12 = vld [vmem:[%s9978_s1 + $0x1d4] ss:$8 sps:$4 sm:$0xff]   ;;  %p7650_p3 = pnand %p7649_p2, %p7643_p13 }
  0x2a   : > { %v7430_v5 = vld [vmem:[%s9978_s1 + $0x160] ss:$8 sps:$4 sm:$0xff]   ;;  %v932_v7 = vpack.c.bf16 %v898_v4, %v897_v1  ;;  %v398_v9 = vld [vmem:[%s7883_s15 + $0x50] sm:$0xff]  ;;  %v7438_v11 = vld [vmem:[%s9978_s1 + $0x144] ss:$8 sps:$4 sm:$0xff]  }
  0x2b   : > { %595 = vmatpush1.bf16.msra.mxu0 %v7407_v23  ;;  %1096 = vmatpush1.bf16.msra.mxu1 %v7408_v24  ;;  %v399_v13 = vld [vmem:[%s7883_s15 + $0x58] sm:$0xff]  ;;  %v7436_v16 = vld [vmem:[%s9978_s1 + $0x140] ss:$8 sps:$4 sm:$0xff]   ;;  %v7444_v24 = vld [vmem:[%s9978_s1 + $0x124] ss:$8 sps:$4 sm:$0xff]  }
  0x2c   : > { %1742 = vmatprep.subr.bf16.mxu0 %v7411_v29  ;;  %2399 = vmatprep.subr.bf16.mxu1 %v7429_v61  ;;  %v899_v14 = vld [vmem:[%s7883_s15 + $0x51] sm:$0xff]  ;;  %v900_v15 = vld [vmem:[%s7883_s15 + $0x59] sm:$0xff]  ;;  %v432_v17 = vpack.c.bf16 %v399_v13, %v398_v9  ;;  %v401_v21 = vld [vmem:[%s7883_s15 + $0x68] sm:$0xff] }
  0x2d   : > { %v933_v18 = vpack.c.bf16 %v900_v15, %v899_v14  ;;  %v7441_v19 = vld [vmem:[%s9978_s1 + $0x134] ss:$8 sps:$4 sm:$0xff]   ;;  %v400_v20 = vld [vmem:[%s7883_s15 + $0x60] sm:$0xff]  ;;  %v7439_v23 = vld [vmem:[%s9978_s1 + $0x130] ss:$8 sps:$4 sm:$0xff]  }
  0x2e   : > { %6659 = vmatmul.mubr.msk.bf16.vlgmr.msra.gmra.mxu0 %vm519_vm0, %v427_v30  ;;  %6703 = vmatmul.mubr.msk.bf16.vlgmr.msra.gmra.mxu1 %vm519_vm0, %v928_v31  ;;  %v901_v22 = vld [vmem:[%s7883_s15 + $0x61] sm:$0xff]  ;;  %v902_v25 = vld [vmem:[%s7883_s15 + $0x69] sm:$0xff]  ;;  %v433_v27 = vpack.c.bf16 %v401_v21, %v400_v20  ;;  %v403_v30 = vld [vmem:[%s7883_s15 + $0x78] sm:$0xff] }
  0x2f   : > { %1743 = vmatpush1.bf16.msra.mxu0 %v7409_v32  ;;  %622 = vmatprep.mubr.bf16.mxu0 %v9990_v2  ;;  %v7442_v26 = vld [vmem:[%s9978_s1 + $0x120] ss:$8 sps:$4 sm:$0xff]   ;;  %v934_v28 = vpack.c.bf16 %v902_v25, %v901_v22  ;;  %v402_v29 = vld [vmem:[%s7883_s15 + $0x70] sm:$0xff]  ;;  %v411_v54 = vld [vmem:[%s7883_s15 + $0xb8] sm:$0xff] }
  0x30   : > { %1123 = vmatprep.mubr.bf16.mxu1 %v9990_v2  ;;  %1744 = vmatprep.subr.bf16.mxu0 %v7414_v33  ;;  %v903_v31 = vld [vmem:[%s7883_s15 + $0x71] sm:$0xff]  ;;  %v904_v32 = vld [vmem:[%s7883_s15 + $0x79] sm:$0xff]  ;;  %v434_v33 = vpack.c.bf16 %v403_v30, %v402_v29  ;;  %v405_v36 = vld [vmem:[%s7883_s15 + $0x88] sm:$0xff] }
  0x31   : > { %2400 = vmatpush1.bf16.msra.mxu1 %v7427_v63  ;;  %v935_v34 = vpack.c.bf16 %v904_v32, %v903_v31  ;;  %v404_v35 = vld [vmem:[%s7883_s15 + $0x80] sm:$0xff]  ;;  %v907_v43 = vld [vmem:[%s7883_s15 + $0x91] sm:$0xff]  ;;  %v914_v62 = vld [vmem:[%s7883_s15 + $0xc9] sm:$0xff] }
  0x32   : > { %2401 = vmatprep.subr.bf16.mxu1 %v7432_v3  ;;  %v905_v37 = vld [vmem:[%s7883_s15 + $0x81] sm:$0xff]  ;;  %v410_v53 = vld [vmem:[%s7883_s15 + $0xb0] sm:$0xff]  ;;  %v912_v56 = vld [vmem:[%s7883_s15 + $0xb9] sm:$0xff] }
  0x33   : > { %1745 = vmatpush1.bf16.msra.mxu0 %v7412_v38  ;;  %v906_v38 = vld [vmem:[%s7883_s15 + $0x89] sm:$0xff]  ;;  %v408_v47 = vld [vmem:[%s7883_s15 + $0xa0] sm:$0xff]  ;;  %v911_v55 = vld [vmem:[%s7883_s15 + $0xb1] sm:$0xff] }
  0x34   : > { %1746 = vmatprep.subr.bf16.mxu0 %v7417_v39  ;;  %v435_v39 = vpack.c.bf16 %v405_v36, %v404_v35  ;;  %v913_v61 = vld [vmem:[%s7883_s15 + $0xc1] sm:$0xff]  ;;  %v414_v1 = vld [vmem:[%s7883_s15 + $0xd0] sm:$0xff]  ;;  %v415_v3 = vld [vmem:[%s7883_s15 + $0xd8] sm:$0xff] }
  0x35   : > { %2402 = vmatpush1.bf16.msra.mxu1 %v7430_v5  ;;  %v940_v0 = vpack.c.bf16 %v914_v62, %v913_v61  ;;  %v915_v4 = vld [vmem:[%s7883_s15 + $0xd1] sm:$0xff]  ;;  %v916_v5 = vld [vmem:[%s7883_s15 + $0xd9] sm:$0xff]  ;;  %v417_v9 = vld [vmem:[%s7883_s15 + $0xe8] sm:$0xff] }
  0x36   : > { %6660 = vmatmul.mubr.msk.bf16.gmra.mxu0 %vm519_vm0, %v428_v40  ;;  %6704 = vmatmul.mubr.msk.bf16.gmra.mxu1 %vm519_vm0, %v929_v41  ;;  %v936_v40 = vpack.c.bf16 %v906_v38, %v905_v37  ;;  %v406_v41 = vld [vmem:[%s7883_s15 + $0x90] sm:$0xff]  ;;  %v419_v15 = vld [vmem:[%s7883_s15 + $0xf8] sm:$0xff]  ;;  %v420_v20 = vld [vmem:[%s7883_s15 + $0x100] sm:$0xff] }
  0x37   : > { %632 = vmatprep.mubr.bf16.mxu0 %v9990_v2  ;;  %1133 = vmatprep.mubr.bf16.mxu1 %v9990_v2  ;;  %v418_v14 = vld [vmem:[%s7883_s15 + $0xf0] sm:$0xff]  ;;  %v421_v21 = vld [vmem:[%s7883_s15 + $0x108] sm:$0xff]  ;;  %v924_v29 = vld [vmem:[%s7883_s15 + $0x119] sm:$0xff] }
  0x38   : > { %1747 = vmatpush1.bf16.msra.mxu0 %v7415_v42  ;;  %2403 = vmatprep.subr.bf16.mxu1 %v7435_v8  ;;  %v407_v42 = vld [vmem:[%s7883_s15 + $0x98] sm:$0xff]  ;;  %v416_v8 = vld [vmem:[%s7883_s15 + $0xe0] sm:$0xff]  ;;  %v926_v35 = vld [vmem:[%s7883_s15 + $0x129] sm:$0xff] }
  0x39   : > { %1748 = vmatprep.subr.bf16.mxu0 %v7420_v44  ;;  %2404 = vmatpush1.bf16.msra.mxu1 %v7433_v10  ;;  %v908_v44 = vld [vmem:[%s7883_s15 + $0x99] sm:$0xff]  ;;  %v436_v45 = vpack.c.bf16 %v407_v42, %v406_v41  ;;  %v917_v10 = vld [vmem:[%s7883_s15 + $0xe1] sm:$0xff]  ;;  %v426_v38 = vld [vmem:[%s7883_s15 + $0x130] sm:$0xff] }
  0x3a   : > { %2405 = vmatprep.subr.bf16.mxu1 %v7438_v11  ;;  %v937_v46 = vpack.c.bf16 %v908_v44, %v907_v43  ;;  %v918_v11 = vld [vmem:[%s7883_s15 + $0xe9] sm:$0xff]  ;;  %v921_v22 = vld [vmem:[%s7883_s15 + $0x101] sm:$0xff] }
  0x3b   : > { %v942_v13 = vpack.c.bf16 %v918_v11, %v917_v10  ;;  %v424_v32 = vld [vmem:[%s7883_s15 + $0x120] sm:$0xff]  ;;  %v1547_v43 = vld [vmem:[%s7883_s15 + $0xa] sm:$0xff] }
  0x3c   : > { %1749 = vmatpush1.bf16.msra.mxu0 %v7418_v48  ;;  %v409_v48 = vld [vmem:[%s7883_s15 + $0xa8] sm:$0xff]  ;;  %v2210_v10 = vld [vmem:[%s7883_s15 + $0x3b] sm:$0xff] }
  0x3d   : > { %1750 = vmatprep.subr.bf16.mxu0 %v7423_v51  ;;  %2406 = vmatpush1.bf16.msra.mxu1 %v7436_v16  ;;  %v437_v51 = vpack.c.bf16 %v409_v48, %v408_v47  ;;  %v919_v16 = vld [vmem:[%s7883_s15 + $0xf1] sm:$0xff]  ;;  %v1546_v42 = vld [vmem:[%s7883_s15 + $0x2] sm:$0xff] }
  0x3e   : > { %6661 = vmatmul.mubr.msk.bf16.gmra.mxu0 %vm519_vm0, %v429_v49  ;;  %6705 = vmatmul.mubr.msk.bf16.gmra.mxu1 %vm519_vm0, %v930_v50  ;;  %v909_v49 = vld [vmem:[%s7883_s15 + $0xa1] sm:$0xff]  ;;  %v910_v50 = vld [vmem:[%s7883_s15 + $0xa9] sm:$0xff] }
  0x3f   : > { %642 = vmatprep.mubr.bf16.mxu0 %v9990_v2  ;;  %1143 = vmatprep.mubr.bf16.mxu1 %v9990_v2  ;;  %v2203_v44 = vld [vmem:[%s7883_s15 + $0x3] sm:$0xff]  ;;  %v7445_v48 = vld [vmem:[%s9978_s1 + $0x1d0] ss:$8 sps:$4 sm:$0xff]  }
  0x40   : > { %1751 = vmatpush1.bf16.msra.mxu0 %v7421_v52  ;;  %2407 = vmatprep.subr.bf16.mxu1 %v7441_v19  ;;  %v938_v52 = vpack.c.bf16 %v910_v50, %v909_v49  ;;  %v7450_v49 = vld [vmem:[%s9978_s1 + $0x1c4] ss:$8 sps:$4 sm:$0xff]   ;;  %v1548_v50 = vld [vmem:[%s7883_s15 + $0x12] sm:$0xff]  ;;  %v7460_v11 = vld [vmem:[%s9978_s1 + $0x180] ss:$8 sps:$4 sm:$0xff]  }
  0x41   : > { %1752 = vmatprep.subr.bf16.mxu0 %v7426_v58  ;;  %2408 = vmatpush1.bf16.msra.mxu1 %v7439_v23  ;;  %v939_v58 = vpack.c.bf16 %v912_v56, %v911_v55  ;;  %v922_v23 = vld [vmem:[%s7883_s15 + $0x109] sm:$0xff]  ;;  %v7453_v55 = vld [vmem:[%s9978_s1 + $0x1b4] ss:$8 sps:$4 sm:$0xff]  }
  0x42   : > { %2409 = vmatprep.subr.bf16.mxu1 %v7444_v24  ;;  %v443_v24 = vpack.c.bf16 %v421_v21, %v420_v20  ;;  %v944_v25 = vpack.c.bf16 %v922_v23, %v921_v22  ;;  %v1551_v61 = vld [vmem:[%s7883_s15 + $0x2a] sm:$0xff]  ;;  %v1556_v22 = vld [vmem:[%s7883_s15 + $0x52] sm:$0xff] }
  0x43   : > { %v2207_v62 = vld [vmem:[%s7883_s15 + $0x23] sm:$0xff] }
  0x44   : > { %1753 = vmatpush1.bf16.msra.mxu0 %v7424_v57  ;;  %v438_v57 = vpack.c.bf16 %v411_v54, %v410_v53  ;;  %v2206_v53 = vld [vmem:[%s7883_s15 + $0x1b] sm:$0xff] }
  0x45   : > { %3056 = vmatprep.subr.bf16.mxu0 %v7447_v12  ;;  %2410 = vmatpush1.bf16.msra.mxu1 %v7442_v26  ;;  %v441_v12 = vpack.c.bf16 %v417_v9, %v416_v8  ;;  %v422_v26 = vld [vmem:[%s7883_s15 + $0x110] sm:$0xff]  ;;  %v7448_v54 = vld [vmem:[%s9978_s1 + $0x1c0] ss:$8 sps:$4 sm:$0xff]  }
  0x46   : > { %6662 = vmatmul.mubr.msk.bf16.gmra.mxu0 %vm519_vm0, %v430_v59  ;;  %6706 = vmatmul.mubr.msk.bf16.gmra.mxu1 %vm519_vm0, %v931_v60  ;;  %v412_v59 = vld [vmem:[%s7883_s15 + $0xc0] sm:$0xff]  ;;  %v413_v60 = vld [vmem:[%s7883_s15 + $0xc8] sm:$0xff]  ;;  %v2209_v9 = vld [vmem:[%s7883_s15 + $0x33] sm:$0xff] }
  0x47   : > { %652 = vmatprep.mubr.bf16.mxu0 %v9990_v2  ;;  %1153 = vmatprep.mubr.bf16.mxu1 %v9990_v2  ;;  %v439_v63 = vpack.c.bf16 %v413_v60, %v412_v59  ;;  %v7456_v59 = vld [vmem:[%s9978_s1 + $0x1a4] ss:$8 sps:$4 sm:$0xff]   ;;  %v1553_v8 = vld [vmem:[%s7883_s15 + $0x3a] sm:$0xff] }
  0x48   : > { %v1550_v60 = vld [vmem:[%s7883_s15 + $0x22] sm:$0xff] }
  0x4e   : > { %6663 = vmatmul.mubr.msk.bf16.gmra.mxu0 %vm519_vm0, %v431_v6  ;;  %6707 = vmatmul.mubr.msk.bf16.gmra.mxu1 %vm519_vm0, %v932_v7  ;;  %v440_v6 = vpack.c.bf16 %v415_v3, %v414_v1  ;;  %v941_v7 = vpack.c.bf16 %v916_v5, %v915_v4  ;;  %v7459_v1 = vld [vmem:[%s9978_s1 + $0x194] ss:$8 sps:$4 sm:$0xff]   ;;  %v1587_v3 = vpack.c.bf16 %v1551_v61, %v1550_v60  ;;  %v7457_v5 = vld [vmem:[%s9978_s1 + $0x190] ss:$8 sps:$4 sm:$0xff]  }
  0x4f   : > { %662 = vmatprep.mubr.bf16.mxu0 %v9990_v2  ;;  %1163 = vmatprep.mubr.bf16.mxu1 %v9990_v2  ;;  %v1561_v60 = vld [vmem:[%s7883_s15 + $0x7a] sm:$0xff] }
  0x50   : > { %v2217_v61 = vld [vmem:[%s7883_s15 + $0x73] sm:$0xff] }
  0x56   : > { %6664 = vmatmul.mubr.msk.bf16.gmra.mxu0 %vm519_vm0, %v432_v17  ;;  %6708 = vmatmul.mubr.msk.bf16.gmra.mxu1 %vm519_vm0, %v933_v18  ;;  %v920_v17 = vld [vmem:[%s7883_s15 + $0xf9] sm:$0xff]  ;;  %v442_v18 = vpack.c.bf16 %v419_v15, %v418_v14  ;;  %v1554_v14 = vld [vmem:[%s7883_s15 + $0x42] sm:$0xff]  ;;  %v1555_v15 = vld [vmem:[%s7883_s15 + $0x4a] sm:$0xff] }
  0x57   : > { %672 = vmatprep.mubr.bf16.mxu0 %v9990_v2  ;;  %1173 = vmatprep.mubr.bf16.mxu1 %v9990_v2  ;;  %v943_v19 = vpack.c.bf16 %v920_v17, %v919_v16  ;;  %v2211_v16 = vld [vmem:[%s7883_s15 + $0x43] sm:$0xff]  ;;  %v2212_v17 = vld [vmem:[%s7883_s15 + $0x4b] sm:$0xff] }
  0x5e   : > { %6665 = vmatmul.mubr.msk.bf16.gmra.mxu0 %vm519_vm0, %v433_v27  ;;  %6709 = vmatmul.mubr.msk.bf16.gmra.mxu1 %vm519_vm0, %v934_v28  ;;  %v423_v27 = vld [vmem:[%s7883_s15 + $0x118] sm:$0xff] }
  0x5f   : > { %682 = vmatprep.mubr.bf16.mxu0 %v9990_v2  ;;  %1183 = vmatprep.mubr.bf16.mxu1 %v9990_v2  ;;  %v923_v28 = vld [vmem:[%s7883_s15 + $0x111] sm:$0xff]  ;;  %v444_v30 = vpack.c.bf16 %v423_v27, %v422_v26  ;;  %v2214_v26 = vld [vmem:[%s7883_s15 + $0x5b] sm:$0xff] }
  0x60   : > { %v945_v31 = vpack.c.bf16 %v924_v29, %v923_v28 }
  0x66   : > { %6666 = vmatmul.mubr.msk.bf16.gmra.mxu0 %vm519_vm0, %v434_v33  ;;  %6710 = vmatmul.mubr.msk.bf16.gmra.mxu1 %vm519_vm0, %v935_v34  ;;  %v425_v33 = vld [vmem:[%s7883_s15 + $0x128] sm:$0xff] }
  0x67   : > { %692 = vmatprep.mubr.bf16.mxu0 %v9990_v2  ;;  %1193 = vmatprep.mubr.bf16.mxu1 %v9990_v2  ;;  %v925_v34 = vld [vmem:[%s7883_s15 + $0x121] sm:$0xff]  ;;  %v445_v36 = vpack.c.bf16 %v425_v33, %v424_v32 }
  0x68   : > { %v946_v37 = vpack.c.bf16 %v926_v35, %v925_v34 }
  0x6e   : > { %6667 = vmatmul.mubr.msk.bf16.gmra.mxu0 %vm519_vm0, %v435_v39  ;;  %6711 = vmatmul.mubr.msk.bf16.gmra.mxu1 %vm519_vm0, %v936_v40  ;;  %v927_v39 = vld [vmem:[%s7883_s15 + $0x131] sm:$0xff]  ;;  %v446_v40 = vpack.c.bf16 %v426_v38, %v426_v38 }
  0x6f   : > { %702 = vmatprep.mubr.bf16.mxu0 %v9990_v2  ;;  %1203 = vmatprep.mubr.bf16.mxu1 %v9990_v2  ;;  %v947_v41 = vpack.c.bf16 %v927_v39, %v927_v39 }
  0x76   : > { %6668 = vmatmul.mubr.msk.bf16.gmra.mxu0 %vm519_vm0, %v436_v45  ;;  %6712 = vmatmul.mubr.msk.bf16.gmra.mxu1 %vm519_vm0, %v937_v46  ;;  %v2204_v45 = vld [vmem:[%s7883_s15 + $0xb] sm:$0xff]  ;;  %v1585_v46 = vpack.c.bf16 %v1547_v43, %v1546_v42  ;;  %v2215_v43 = vld [vmem:[%s7883_s15 + $0x63] sm:$0xff] }
  0x77   : > { %712 = vmatprep.mubr.bf16.mxu0 %v9990_v2  ;;  %1213 = vmatprep.mubr.bf16.mxu1 %v9990_v2  ;;  %v2242_v47 = vpack.c.bf16 %v2204_v45, %v2203_v44  ;;  %v1559_v42 = vld [vmem:[%s7883_s15 + $0x6a] sm:$0xff] }
  0x78   : > { %v2216_v44 = vld [vmem:[%s7883_s15 + $0x6b] sm:$0xff] }
  0x7e   : > { %6669 = vmatmul.mubr.msk.bf16.gmra.mxu0 %vm519_vm0, %v437_v51  ;;  %6713 = vmatmul.mubr.msk.bf16.gmra.mxu1 %vm519_vm0, %v938_v52  ;;  %v1549_v51 = vld [vmem:[%s7883_s15 + $0x1a] sm:$0xff] }
  0x7f   : > { %722 = vmatprep.mubr.bf16.mxu0 %v9990_v2  ;;  %1223 = vmatprep.mubr.bf16.mxu1 %v9990_v2  ;;  %v2205_v52 = vld [vmem:[%s7883_s15 + $0x13] sm:$0xff]  ;;  %v1586_v56 = vpack.c.bf16 %v1549_v51, %v1548_v50  ;;  %v2248_v51 = vpack.c.bf16 %v2216_v44, %v2215_v43 }
  0x86   : > { %6670 = vmatmul.mubr.msk.bf16.gmra.mxu0 %vm519_vm0, %v438_v57  ;;  %6714 = vmatmul.mubr.msk.bf16.gmra.mxu1 %vm519_vm0, %v939_v58  ;;  %v2243_v57 = vpack.c.bf16 %v2206_v53, %v2205_v52  ;;  %v7451_v58 = vld [vmem:[%s9978_s1 + $0x1b0] ss:$8 sps:$4 sm:$0xff]  }
  0x87   : > { %732 = vmatprep.mubr.bf16.mxu0 %v9990_v2  ;;  %1233 = vmatprep.mubr.bf16.mxu1 %v9990_v2 }
  0x8e   : > { %6671 = vmatmul.mubr.msk.bf16.gmra.mxu0 %vm519_vm0, %v439_v63  ;;  %6715 = vmatmul.mubr.msk.bf16.gmra.mxu1 %vm519_vm0, %v940_v0  ;;  %v2208_v63 = vld [vmem:[%s7883_s15 + $0x2b] sm:$0xff] }
  0x8f   : > { %742 = vmatprep.mubr.bf16.mxu0 %v9990_v2  ;;  %1243 = vmatprep.mubr.bf16.mxu1 %v9990_v2  ;;  %v7454_v0 = vld [vmem:[%s9978_s1 + $0x1a0] ss:$8 sps:$4 sm:$0xff]   ;;  %v2244_v4 = vpack.c.bf16 %v2208_v63, %v2207_v62 }
  0x90   : > { %v2218_v62 = vld [vmem:[%s7883_s15 + $0x7b] sm:$0xff] }
  0x96   : > { %6672 = vmatmul.mubr.msk.bf16.gmra.mxu0 %vm519_vm0, %v440_v6  ;;  %6716 = vmatmul.mubr.msk.bf16.gmra.mxu1 %vm519_vm0, %v941_v7  ;;  %v7462_v6 = vld [vmem:[%s9978_s1 + $0x184] ss:$8 sps:$4 sm:$0xff]   ;;  %v1552_v7 = vld [vmem:[%s7883_s15 + $0x32] sm:$0xff] }
  0x97   : > { %752 = vmatprep.mubr.bf16.mxu0 %v9990_v2  ;;  %1253 = vmatprep.mubr.bf16.mxu1 %v9990_v2 }
  0x9e   : > { %6673 = vmatmul.mubr.msk.bf16.gmra.mxu0 %vm519_vm0, %v441_v12  ;;  %6717 = vmatmul.mubr.msk.bf16.gmra.mxu1 %vm519_vm0, %v942_v13  ;;  %v1588_v12 = vpack.c.bf16 %v1553_v8, %v1552_v7  ;;  %v2245_v13 = vpack.c.bf16 %v2210_v10, %v2209_v9 }
  0x9f   : > { %762 = vmatprep.mubr.bf16.mxu0 %v9990_v2  ;;  %1263 = vmatprep.mubr.bf16.mxu1 %v9990_v2 }
  0xa6   : > { %6674 = vmatmul.mubr.msk.bf16.gmra.mxu0 %vm519_vm0, %v442_v18  ;;  %6718 = vmatmul.mubr.msk.bf16.gmra.mxu1 %vm519_vm0, %v943_v19  ;;  %v1589_v18 = vpack.c.bf16 %v1555_v15, %v1554_v14  ;;  %v2246_v19 = vpack.c.bf16 %v2212_v17, %v2211_v16  ;;  %v1563_v15 = vld [vmem:[%s7883_s15 + $0x8a] sm:$0xff] }
  0xa7   : > { %772 = vmatprep.mubr.bf16.mxu0 %v9990_v2  ;;  %1273 = vmatprep.mubr.bf16.mxu1 %v9990_v2  ;;  %v2219_v16 = vld [vmem:[%s7883_s15 + $0x83] sm:$0xff]  ;;  %v2220_v17 = vld [vmem:[%s7883_s15 + $0x8b] sm:$0xff] }
  0xae   : > { %6675 = vmatmul.mubr.msk.bf16.gmra.mxu0 %vm519_vm0, %v443_v24  ;;  %6719 = vmatmul.mubr.msk.bf16.gmra.mxu1 %vm519_vm0, %v944_v25  ;;  %v1557_v24 = vld [vmem:[%s7883_s15 + $0x5a] sm:$0xff] }
  0xaf   : > { %782 = vmatprep.mubr.bf16.mxu0 %v9990_v2  ;;  %1283 = vmatprep.mubr.bf16.mxu1 %v9990_v2  ;;  %v2213_v25 = vld [vmem:[%s7883_s15 + $0x53] sm:$0xff]  ;;  %v1590_v32 = vpack.c.bf16 %v1557_v24, %v1556_v22 }
  0xb0   : > { %v2247_v33 = vpack.c.bf16 %v2214_v26, %v2213_v25  ;;  %v2250_v25 = vpack.c.bf16 %v2220_v17, %v2219_v16  ;;  %v1568_v17 = vld [vmem:[%s7883_s15 + $0xb2] sm:$0xff] }
  0xb6   : > { %6676 = vmatmul.mubr.msk.bf16.gmra.mxu0 %vm519_vm0, %v444_v30  ;;  %6720 = vmatmul.mubr.msk.bf16.gmra.mxu1 %vm519_vm0, %v945_v31 }
  0xb7   : > { %792 = vmatprep.mubr.bf16.mxu0 %v9990_v2  ;;  %1293 = vmatprep.mubr.bf16.mxu1 %v9990_v2 }
  0xbe   : > { %6677 = vmatmul.mubr.msk.bf16.gmra.mxu0 %vm519_vm0, %v445_v36  ;;  %6721 = vmatmul.mubr.msk.bf16.gmra.mxu1 %vm519_vm0, %v946_v37 }
  0xbf   : > { %802 = vmatprep.mubr.bf16.mxu0 %v9990_v2  ;;  %1303 = vmatprep.mubr.bf16.mxu1 %v9990_v2 }
  0xc6   : > { %6678 = vmatmul.mubr.msk.bf16.gmra.mxu0 %vm519_vm0, %v446_v40  ;;  %6722 = vmatmul.mubr.msk.bf16.gmra.mxu1 %vm519_vm0, %v947_v41  ;;  %v1558_v40 = vld [vmem:[%s7883_s15 + $0x62] sm:$0xff] }
  0xc7   : > { %1770 = vmatprep.mubr.bf16.mxu0 %v9990_v2  ;;  %2427 = vmatprep.mubr.bf16.mxu1 %v9990_v2  ;;  %v1591_v50 = vpack.c.bf16 %v1559_v42, %v1558_v40 }
  0xce   : > { %6747 = vmatmul.mubr.msk.bf16.vlgmr.msra.gmra.mxu0 %vm519_vm0, %v1585_v46  ;;  %6791 = vmatmul.mubr.msk.bf16.vlgmr.msra.gmra.mxu1 %vm519_vm0, %v2242_v47 }
  0xcf   : > { %3057 = vmatpush1.bf16.msra.mxu0 %v7445_v48  ;;  %1780 = vmatprep.mubr.bf16.mxu0 %v9990_v2 }
  0xd0   : > { %2437 = vmatprep.mubr.bf16.mxu1 %v9990_v2  ;;  %3058 = vmatprep.subr.bf16.mxu0 %v7450_v49 }
  0xd3   : > { %3059 = vmatpush1.bf16.msra.mxu0 %v7448_v54 }
  0xd4   : > { %3060 = vmatprep.subr.bf16.mxu0 %v7453_v55 }
  0xd6   : > { %6748 = vmatmul.mubr.msk.bf16.gmra.mxu0 %vm519_vm0, %v1586_v56  ;;  %6792 = vmatmul.mubr.msk.bf16.gmra.mxu1 %vm519_vm0, %v2243_v57 }
  0xd7   : > { %1790 = vmatprep.mubr.bf16.mxu0 %v9990_v2  ;;  %2447 = vmatprep.mubr.bf16.mxu1 %v9990_v2 }
  0xd8   : > { %3061 = vmatpush1.bf16.msra.mxu0 %v7451_v58  ;;  %v1560_v58 = vld [vmem:[%s7883_s15 + $0x72] sm:$0xff] }
  0xd9   : > { %3062 = vmatprep.subr.bf16.mxu0 %v7456_v59 }
  0xdc   : > { %3063 = vmatpush1.bf16.msra.mxu0 %v7454_v0 }
  0xdd   : > { %3064 = vmatprep.subr.bf16.mxu0 %v7459_v1 }
  0xde   : > { %6749 = vmatmul.mubr.msk.bf16.gmra.mxu0 %vm519_vm0, %v1587_v3  ;;  %6793 = vmatmul.mubr.msk.bf16.gmra.mxu1 %vm519_vm0, %v2244_v4 }
  0xdf   : > { %1800 = vmatprep.mubr.bf16.mxu0 %v9990_v2  ;;  %2457 = vmatprep.mubr.bf16.mxu1 %v9990_v2 }
  0xe0   : > { %3065 = vmatpush1.bf16.msra.mxu0 %v7457_v5  ;;  %v1592_v5 = vpack.c.bf16 %v1561_v60, %v1560_v58  ;;  %v1567_v60 = vld [vmem:[%s7883_s15 + $0xaa] sm:$0xff] }
  0xe1   : > { %3066 = vmatprep.subr.bf16.mxu0 %v7462_v6  ;;  %v2249_v6 = vpack.c.bf16 %v2218_v62, %v2217_v61  ;;  %v2223_v61 = vld [vmem:[%s7883_s15 + $0xa3] sm:$0xff]  ;;  %v2224_v62 = vld [vmem:[%s7883_s15 + $0xab] sm:$0xff] }
  0xe4   : > { %3067 = vmatpush1.bf16.msra.mxu0 %v7460_v11 }
  0xe6   : > { %6750 = vmatmul.mubr.msk.bf16.gmra.mxu0 %vm519_vm0, %v1588_v12  ;;  %6794 = vmatmul.mubr.msk.bf16.gmra.mxu1 %vm519_vm0, %v2245_v13  ;;  %v1562_v13 = vld [vmem:[%s7883_s15 + $0x82] sm:$0xff] }
  0xe7   : > { %1810 = vmatprep.mubr.bf16.mxu0 %v9990_v2  ;;  %2467 = vmatprep.mubr.bf16.mxu1 %v9990_v2  ;;  %v1593_v24 = vpack.c.bf16 %v1563_v15, %v1562_v13 }
  0xee   : > { %v614_v20 = vpop.f32.mrf.mxu0  ;;  %v1115_v21 = vpop.f32.mrf.mxu1  ;;  %6751 = vmatmul.mubr.msk.bf16.gmra.mxu0 %vm519_vm0, %v1589_v18  ;;  %6795 = vmatmul.mubr.msk.bf16.gmra.mxu1 %vm519_vm0, %v2246_v19 }
  0xef   : > { %v8199_v23 = vadd.f32 %v1115_v21, %v614_v20  ;;  %1820 = vmatprep.mubr.bf16.mxu0 %v9990_v2  ;;  %2477 = vmatprep.mubr.bf16.mxu1 %v9990_v2 }
  0xf0   : > { %v616_v27 = vpop.f32.mrf.mxu0  ;;  %v1117_v28 = vpop.f32.mrf.mxu1 }
  0xf1   : > { %v8206_v29 = vadd.f32 %v1117_v28, %v616_v27 }
  0xf2   : > { %v618_v30 = vpop.f32.mrf.mxu0  ;;  %v1119_v31 = vpop.f32.mrf.mxu1 }
  0xf3   : > { %v8208_v34 = vadd.f32 %v1119_v31, %v618_v30 }
  0xf4   : > { %v620_v35 = vpop.f32.mrf.mxu0  ;;  %v1121_v36 = vpop.f32.mrf.mxu1 }
  0xf5   : > { %v8210_v37 = vadd.f32 %v1121_v36, %v620_v35  ;;  %v1565_v36 = vld [vmem:[%s7883_s15 + $0x9a] sm:$0xff] }
  0xf6   : > { %v624_v38 = vpop.f32.mrf.mxu0  ;;  %v1125_v39 = vpop.f32.mrf.mxu1  ;;  %6752 = vmatmul.mubr.msk.bf16.gmra.mxu0 %vm519_vm0, %v1590_v32  ;;  %6796 = vmatmul.mubr.msk.bf16.gmra.mxu1 %vm519_vm0, %v2247_v33  ;;  %v1564_v33 = vld [vmem:[%s7883_s15 + $0x92] sm:$0xff] }
  0xf7   : > { %v8215_v41 = vadd.f32 %v1125_v39, %v624_v38  ;;  %1830 = vmatprep.mubr.bf16.mxu0 %v9990_v2  ;;  %2487 = vmatprep.mubr.bf16.mxu1 %v9990_v2  ;;  %v2221_v38 = vld [vmem:[%s7883_s15 + $0x93] sm:$0xff]  ;;  %v2222_v39 = vld [vmem:[%s7883_s15 + $0x9b] sm:$0xff] }
  0xf8   : > { %v626_v45 = vpop.f32.mrf.mxu0  ;;  %v1127_v46 = vpop.f32.mrf.mxu1 }
  0xf9   : > { %v8222_v47 = vadd.f32 %v1127_v46, %v626_v45  ;;  %v1594_v46 = vpack.c.bf16 %v1565_v36, %v1564_v33 }
  0xfa   : > { %v628_v48 = vpop.f32.mrf.mxu0  ;;  %v1129_v49 = vpop.f32.mrf.mxu1 }
  0xfb   : > { %v8224_v52 = vadd.f32 %v1129_v49, %v628_v48  ;;  %v2251_v48 = vpack.c.bf16 %v2222_v39, %v2221_v38 }
  0xfc   : > { %v630_v53 = vpop.f32.mrf.mxu0  ;;  %v1131_v54 = vpop.f32.mrf.mxu1 }
  0xfd   : > { %v8226_v55 = vadd.f32 %v1131_v54, %v630_v53 }
  0xfe   : > { %v634_v56 = vpop.f32.mrf.mxu0  ;;  %v1135_v57 = vpop.f32.mrf.mxu1  ;;  %6753 = vmatmul.mubr.msk.bf16.gmra.mxu0 %vm519_vm0, %v1591_v50  ;;  %6797 = vmatmul.mubr.msk.bf16.gmra.mxu1 %vm519_vm0, %v2248_v51 }
  0xff   : > { %v8231_v59 = vadd.f32 %v1135_v57, %v634_v56  ;;  %1840 = vmatprep.mubr.bf16.mxu0 %v9990_v2  ;;  %2497 = vmatprep.mubr.bf16.mxu1 %v9990_v2  ;;  %v1566_v57 = vld [vmem:[%s7883_s15 + $0xa2] sm:$0xff] }
 0x100   : > { %v636_v63 = vpop.f32.mrf.mxu0  ;;  %v1137_v0 = vpop.f32.mrf.mxu1 }
 0x101   : > { %v8238_v1 = vadd.f32 %v1137_v0, %v636_v63 }
 0x102   : > { %v638_v3 = vpop.f32.mrf.mxu0  ;;  %v1139_v4 = vpop.f32.mrf.mxu1 }
 0x103   : > { %v8240_v7 = vadd.f32 %v1139_v4, %v638_v3 }
 0x104   : > { %v640_v8 = vpop.f32.mrf.mxu0  ;;  %v1141_v9 = vpop.f32.mrf.mxu1 }
 0x105   : > { %v8242_v10 = vadd.f32 %v1141_v9, %v640_v8  ;;  %v2252_v8 = vpack.c.bf16 %v2224_v62, %v2223_v61 }
 0x106   : > { %v644_v11 = vpop.f32.mrf.mxu0  ;;  %v1145_v12 = vpop.f32.mrf.mxu1  ;;  %6754 = vmatmul.mubr.msk.bf16.gmra.mxu0 %vm519_vm0, %v1592_v5  ;;  %6798 = vmatmul.mubr.msk.bf16.gmra.mxu1 %vm519_vm0, %v2249_v6  ;;  %v1595_v6 = vpack.c.bf16 %v1567_v60, %v1566_v57 }
 0x107   : > { %v8247_v14 = vadd.f32 %v1145_v12, %v644_v11  ;;  %1850 = vmatprep.mubr.bf16.mxu0 %v9990_v2  ;;  %2507 = vmatprep.mubr.bf16.mxu1 %v9990_v2 }
 0x108   : > { %v646_v18 = vpop.f32.mrf.mxu0  ;;  %v1147_v19 = vpop.f32.mrf.mxu1 }
 0x109   : > { %v8254_v20 = vadd.f32 %v1147_v19, %v646_v18  ;;  %v1569_v19 = vld [vmem:[%s7883_s15 + $0xba] sm:$0xff] }
 0x10a   : > { %v648_v21 = vpop.f32.mrf.mxu0  ;;  %v1149_v22 = vpop.f32.mrf.mxu1 }
 0x10b   : > { %v8256_v26 = vadd.f32 %v1149_v22, %v648_v21  ;;  %v2225_v21 = vld [vmem:[%s7883_s15 + $0xb3] sm:$0xff]  ;;  %v2226_v22 = vld [vmem:[%s7883_s15 + $0xbb] sm:$0xff] }
 0x10c   : > { %v650_v27 = vpop.f32.mrf.mxu0  ;;  %v1151_v28 = vpop.f32.mrf.mxu1  ;;  %v2253_v33 = vpack.c.bf16 %v2226_v22, %v2225_v21 }
 0x10d   : > { %v8258_v30 = vadd.f32 %v1151_v28, %v650_v27 }
 0x10e   : > { %v654_v31 = vpop.f32.mrf.mxu0  ;;  %v1155_v32 = vpop.f32.mrf.mxu1  ;;  %6755 = vmatmul.mubr.msk.bf16.gmra.mxu0 %vm519_vm0, %v1593_v24  ;;  %6799 = vmatmul.mubr.msk.bf16.gmra.mxu1 %vm519_vm0, %v2250_v25 }
 0x10f   : > { %v8263_v35 = vadd.f32 %v1155_v32, %v654_v31  ;;  %1860 = vmatprep.mubr.bf16.mxu0 %v9990_v2  ;;  %2517 = vmatprep.mubr.bf16.mxu1 %v9990_v2  ;;  %v1596_v32 = vpack.c.bf16 %v1569_v19, %v1568_v17  ;;  %v2229_v17 = vld [vmem:[%s7883_s15 + $0xd3] sm:$0xff]  ;;  %v2230_v19 = vld [vmem:[%s7883_s15 + $0xdb] sm:$0xff] }
 0x110   : > { %v656_v40 = vpop.f32.mrf.mxu0  ;;  %v1157_v42 = vpop.f32.mrf.mxu1 }
 0x111   : > { %v8270_v43 = vadd.f32 %v1157_v42, %v656_v40 }
 0x112   : > { %v658_v44 = vpop.f32.mrf.mxu0  ;;  %v1159_v45 = vpop.f32.mrf.mxu1 }
 0x113   : > { %v8272_v49 = vadd.f32 %v1159_v45, %v658_v44  ;;  %v1570_v45 = vld [vmem:[%s7883_s15 + $0xc2] sm:$0xff] }
 0x114   : > { %v660_v50 = vpop.f32.mrf.mxu0  ;;  %v1161_v51 = vpop.f32.mrf.mxu1 }
 0x115   : > { %v8274_v53 = vadd.f32 %v1161_v51, %v660_v50  ;;  %v2227_v50 = vld [vmem:[%s7883_s15 + $0xc3] sm:$0xff]  ;;  %v2228_v51 = vld [vmem:[%s7883_s15 + $0xcb] sm:$0xff] }
 0x116   : > { %v664_v54 = vpop.f32.mrf.mxu0  ;;  %v1165_v56 = vpop.f32.mrf.mxu1  ;;  %6756 = vmatmul.mubr.msk.bf16.gmra.mxu0 %vm519_vm0, %v1594_v46  ;;  %6800 = vmatmul.mubr.msk.bf16.gmra.mxu1 %vm519_vm0, %v2251_v48  ;;  %v1571_v48 = vld [vmem:[%s7883_s15 + $0xca] sm:$0xff] }
 0x117   : > { %v8279_v58 = vadd.f32 %v1165_v56, %v664_v54  ;;  %1870 = vmatprep.mubr.bf16.mxu0 %v9990_v2  ;;  %2527 = vmatprep.mubr.bf16.mxu1 %v9990_v2  ;;  %v1597_v62 = vpack.c.bf16 %v1571_v48, %v1570_v45  ;;  %v1574_v48 = vld [vmem:[%s7883_s15 + $0xe2] sm:$0xff] }
 0x118   : > { %v666_v63 = vpop.f32.mrf.mxu0  ;;  %v1167_v0 = vpop.f32.mrf.mxu1 }
 0x119   : > { %v8286_v3 = vadd.f32 %v1167_v0, %v666_v63  ;;  %v2254_v63 = vpack.c.bf16 %v2228_v51, %v2227_v50  ;;  %v1575_v51 = vld [vmem:[%s7883_s15 + $0xea] sm:$0xff] }
 0x11a   : > { %v668_v4 = vpop.f32.mrf.mxu0  ;;  %v1169_v5 = vpop.f32.mrf.mxu1 }
 0x11b   : > { %v8288_v9 = vadd.f32 %v1169_v5, %v668_v4 }
 0x11c   : > { %v670_v11 = vpop.f32.mrf.mxu0  ;;  %v1171_v12 = vpop.f32.mrf.mxu1 }
 0x11d   : > { %v8290_v13 = vadd.f32 %v1171_v12, %v670_v11  ;;  %v1572_v12 = vld [vmem:[%s7883_s15 + $0xd2] sm:$0xff] }
 0x11e   : > { %v674_v15 = vpop.f32.mrf.mxu0  ;;  %v1175_v16 = vpop.f32.mrf.mxu1  ;;  %6757 = vmatmul.mubr.msk.bf16.gmra.mxu0 %vm519_vm0, %v1595_v6  ;;  %6801 = vmatmul.mubr.msk.bf16.gmra.mxu1 %vm519_vm0, %v2252_v8 }
 0x11f   : > { %v8295_v18 = vadd.f32 %v1175_v16, %v674_v15  ;;  %1880 = vmatprep.mubr.bf16.mxu0 %v9990_v2  ;;  %2537 = vmatprep.mubr.bf16.mxu1 %v9990_v2  ;;  %v1573_v16 = vld [vmem:[%s7883_s15 + $0xda] sm:$0xff] }
 0x120   : > { %v676_v24 = vpop.f32.mrf.mxu0  ;;  %v1177_v25 = vpop.f32.mrf.mxu1 }
 0x121   : > { %v8302_v27 = vadd.f32 %v1177_v25, %v676_v24 }
 0x122   : > { %v678_v28 = vpop.f32.mrf.mxu0  ;;  %v1179_v31 = vpop.f32.mrf.mxu1 }
 0x123   : > { %v8304_v36 = vadd.f32 %v1179_v31, %v678_v28  ;;  %v1598_v31 = vpack.c.bf16 %v1573_v16, %v1572_v12 }
 0x124   : > { %v680_v38 = vpop.f32.mrf.mxu0  ;;  %v1181_v39 = vpop.f32.mrf.mxu1 }
 0x125   : > { %v8306_v40 = vadd.f32 %v1181_v39, %v680_v38 }
 0x126   : > { %v684_v42 = vpop.f32.mrf.mxu0  ;;  %v1185_v44 = vpop.f32.mrf.mxu1  ;;  %6758 = vmatmul.mubr.msk.bf16.gmra.mxu0 %vm519_vm0, %v1596_v32  ;;  %6802 = vmatmul.mubr.msk.bf16.gmra.mxu1 %vm519_vm0, %v2253_v33  ;;  %v2255_v32 = vpack.c.bf16 %v2230_v19, %v2229_v17 }
 0x127   : > { %v8311_v46 = vadd.f32 %v1185_v44, %v684_v42  ;;  %1890 = vmatprep.mubr.bf16.mxu0 %v9990_v2  ;;  %2547 = vmatprep.mubr.bf16.mxu1 %v9990_v2 }
 0x128   : > { %v686_v54 = vpop.f32.mrf.mxu0  ;;  %v1187_v56 = vpop.f32.mrf.mxu1 }
 0x129   : > { %v8318_v57 = vadd.f32 %v1187_v56, %v686_v54  ;;  %v2231_v54 = vld [vmem:[%s7883_s15 + $0xe3] sm:$0xff]  ;;  %v2232_v56 = vld [vmem:[%s7883_s15 + $0xeb] sm:$0xff] }
 0x12a   : > { %v688_v60 = vpop.f32.mrf.mxu0  ;;  %v1189_v61 = vpop.f32.mrf.mxu1 }
 0x12b   : > { %v8320_v0 = vadd.f32 %v1189_v61, %v688_v60 }
 0x12c   : > { %v690_v4 = vpop.f32.mrf.mxu0  ;;  %v1191_v5 = vpop.f32.mrf.mxu1 }
 0x12d   : > { %v8322_v6 = vadd.f32 %v1191_v5, %v690_v4  ;;  %v1599_v5 = vpack.c.bf16 %v1575_v51, %v1574_v48 }
 0x12e   : > { %v694_v8 = vpop.f32.mrf.mxu0  ;;  %v1195_v11 = vpop.f32.mrf.mxu1  ;;  %6759 = vmatmul.mubr.msk.bf16.gmra.mxu0 %vm519_vm0, %v1597_v62  ;;  %6803 = vmatmul.mubr.msk.bf16.gmra.mxu1 %vm519_vm0, %v2254_v63 }
 0x12f   : > { %v8327_v15 = vadd.f32 %v1195_v11, %v694_v8  ;;  %1900 = vmatprep.mubr.bf16.mxu0 %v9990_v2  ;;  %2557 = vmatprep.mubr.bf16.mxu1 %v9990_v2  ;;  %v2256_v8 = vpack.c.bf16 %v2232_v56, %v2231_v54 }
 0x130   : > { %v696_v21 = vpop.f32.mrf.mxu0  ;;  %v1197_v22 = vpop.f32.mrf.mxu1 }
 0x131   : > { %v8334_v24 = vadd.f32 %v1197_v22, %v696_v21  ;;  %v1576_v22 = vld [vmem:[%s7883_s15 + $0xf2] sm:$0xff] }
 0x132   : > { %v698_v25 = vpop.f32.mrf.mxu0  ;;  %v1199_v28 = vpop.f32.mrf.mxu1 }
 0x133   : > { %v8336_v33 = vadd.f32 %v1199_v28, %v698_v25  ;;  %v1577_v28 = vld [vmem:[%s7883_s15 + $0xfa] sm:$0xff] }
 0x134   : > { %v700_v38 = vpop.f32.mrf.mxu0  ;;  %v1201_v39 = vpop.f32.mrf.mxu1  ;;  %v1600_v51 = vpack.c.bf16 %v1577_v28, %v1576_v22 }
 0x135   : > { %v8338_v42 = vadd.f32 %v1201_v39, %v700_v38 }
 0x136   : > { %v704_v44 = vpop.f32.mrf.mxu0  ;;  %v1205_v45 = vpop.f32.mrf.mxu1  ;;  %6760 = vmatmul.mubr.msk.bf16.gmra.mxu0 %vm519_vm0, %v1598_v31  ;;  %6804 = vmatmul.mubr.msk.bf16.gmra.mxu1 %vm519_vm0, %v2255_v32  ;;  %v2233_v31 = vld [vmem:[%s7883_s15 + $0xf3] sm:$0xff]  ;;  %v2234_v32 = vld [vmem:[%s7883_s15 + $0xfb] sm:$0xff] }
 0x137   : > { %v8343_v50 = vadd.f32 %v1205_v45, %v704_v44  ;;  %1910 = vmatprep.mubr.bf16.mxu0 %v9990_v2  ;;  %2567 = vmatprep.mubr.bf16.mxu1 %v9990_v2  ;;  %v2257_v54 = vpack.c.bf16 %v2234_v32, %v2233_v31 }
 0x138   : > { %v706_v60 = vpop.f32.mrf.mxu0  ;;  %v1207_v61 = vpop.f32.mrf.mxu1 }
 0x139   : > { %v8350_v62 = vadd.f32 %v1207_v61, %v706_v60 }
 0x13a   : > { %v708_v63 = vpop.f32.mrf.mxu0  ;;  %v1209_v4 = vpop.f32.mrf.mxu1 }
 0x13b   : > { %v8352_v11 = vadd.f32 %v1209_v4, %v708_v63 }
 0x13c   : > { %v710_v12 = vpop.f32.mrf.mxu0  ;;  %v1211_v16 = vpop.f32.mrf.mxu1 }
 0x13d   : > { %v8354_v17 = vadd.f32 %v1211_v16, %v710_v12  ;;  %v1579_v16 = vld [vmem:[%s7883_s15 + $0x10a] sm:$0xff] }
 0x13e   : > { %v714_v19 = vpop.f32.mrf.mxu0  ;;  %v1215_v21 = vpop.f32.mrf.mxu1  ;;  %6761 = vmatmul.mubr.msk.bf16.gmra.mxu0 %vm519_vm0, %v1599_v5  ;;  %6805 = vmatmul.mubr.msk.bf16.gmra.mxu1 %vm519_vm0, %v2256_v8  ;;  %v1578_v8 = vld [vmem:[%s7883_s15 + $0x102] sm:$0xff] }
 0x13f   : > { %v8359_v25 = vadd.f32 %v1215_v21, %v714_v19  ;;  %1920 = vmatprep.mubr.bf16.mxu0 %v9990_v2  ;;  %2577 = vmatprep.mubr.bf16.mxu1 %v9990_v2  ;;  %v2235_v19 = vld [vmem:[%s7883_s15 + $0x103] sm:$0xff]  ;;  %v2236_v21 = vld [vmem:[%s7883_s15 + $0x10b] sm:$0xff] }
 0x140   : > { %v716_v38 = vpop.f32.mrf.mxu0  ;;  %v1217_v39 = vpop.f32.mrf.mxu1 }
 0x141   : > { %v8366_v44 = vadd.f32 %v1217_v39, %v716_v38  ;;  %v1601_v39 = vpack.c.bf16 %v1579_v16, %v1578_v8  ;;  %v1581_v8 = vld [vmem:[%s7883_s15 + $0x11a] sm:$0xff] }
 0x142   : > { %v718_v45 = vpop.f32.mrf.mxu0  ;;  %v1219_v48 = vpop.f32.mrf.mxu1  ;;  %v2237_v16 = vld [vmem:[%s7883_s15 + $0x113] sm:$0xff] }
 0x143   : > { %v8368_v56 = vadd.f32 %v1219_v48, %v718_v45  ;;  %v2258_v45 = vpack.c.bf16 %v2236_v21, %v2235_v19  ;;  %v2238_v19 = vld [vmem:[%s7883_s15 + $0x11b] sm:$0xff] }
 0x144   : > { %v720_v60 = vpop.f32.mrf.mxu0  ;;  %v1221_v61 = vpop.f32.mrf.mxu1 }
 0x145   : > { %v8370_v63 = vadd.f32 %v1221_v61, %v720_v60 }
 0x146   : > { %v724_v4 = vpop.f32.mrf.mxu0  ;;  %v1225_v5 = vpop.f32.mrf.mxu1  ;;  %6762 = vmatmul.mubr.msk.bf16.gmra.mxu0 %vm519_vm0, %v1600_v51  ;;  %6806 = vmatmul.mubr.msk.bf16.gmra.mxu1 %vm519_vm0, %v2257_v54 }
 0x147   : > { %v8375_v12 = vadd.f32 %v1225_v5, %v724_v4  ;;  %1930 = vmatprep.mubr.bf16.mxu0 %v9990_v2  ;;  %2587 = vmatprep.mubr.bf16.mxu1 %v9990_v2  ;;  %v1580_v5 = vld [vmem:[%s7883_s15 + $0x112] sm:$0xff] }
 0x148   : > { %v726_v22 = vpop.f32.mrf.mxu0  ;;  %v1227_v28 = vpop.f32.mrf.mxu1 }
 0x149   : > { %v8382_v31 = vadd.f32 %v1227_v28, %v726_v22 }
 0x14a   : > { %v728_v32 = vpop.f32.mrf.mxu0  ;;  %v1229_v38 = vpop.f32.mrf.mxu1 }
 0x14b   : > { %v8384_v48 = vadd.f32 %v1229_v38, %v728_v32 }
 0x14c   : > { %v730_v51 = vpop.f32.mrf.mxu0  ;;  %v1231_v54 = vpop.f32.mrf.mxu1 }
 0x14d   : > { %9999 = vst [vmem:[#allocation12_spill] sm:$0xff] %v8384_v48  ;;  %v8386_v60 = vadd.f32 %v1231_v54, %v730_v51  ;;  %v2259_v51 = vpack.c.bf16 %v2238_v19, %v2237_v16 }
 0x14e   : > { %v734_v61 = vpop.f32.mrf.mxu0  ;;  %v1235_v4 = vpop.f32.mrf.mxu1  ;;  %6763 = vmatmul.mubr.msk.bf16.gmra.mxu0 %vm519_vm0, %v1601_v39  ;;  %6807 = vmatmul.mubr.msk.bf16.gmra.mxu1 %vm519_vm0, %v2258_v45  ;;  %v1602_v45 = vpack.c.bf16 %v1581_v8, %v1580_v5  ;;  %v2239_v5 = vld [vmem:[%s7883_s15 + $0x123] sm:$0xff]  ;;  %v2240_v8 = vld [vmem:[%s7883_s15 + $0x12b] sm:$0xff] }
 0x14f   : > { %10000 = vst [vmem:[#allocation13_spill] sm:$0xff] %v8386_v60  ;;  %v8391_v22 = vadd.f32 %v1235_v4, %v734_v61  ;;  %1940 = vmatprep.mubr.bf16.mxu0 %v9990_v2  ;;  %2597 = vmatprep.mubr.bf16.mxu1 %v9990_v2  ;;  %v1583_v60 = vld [vmem:[%s7883_s15 + $0x12a] sm:$0xff] }
 0x150   : > { %v736_v21 = vpop.f32.mrf.mxu0  ;;  %v1237_v28 = vpop.f32.mrf.mxu1 }
 0x151   : > { %10001 = vst [vmem:[#allocation14_spill] sm:$0xff] %v8391_v22  ;;  %v8398_v32 = vadd.f32 %v1237_v28, %v736_v21  ;;  %v1582_v21 = vld [vmem:[%s7883_s15 + $0x122] sm:$0xff] }
 0x152   : > { %v738_v38 = vpop.f32.mrf.mxu0  ;;  %v1239_v39 = vpop.f32.mrf.mxu1 }
 0x153   : > { %10002 = vst [vmem:[#allocation15_spill] sm:$0xff] %v8398_v32  ;;  %v8400_v54 = vadd.f32 %v1239_v39, %v738_v38  ;;  %v10007_v32 = vmov 0  }
 0x154   : > { %v8402_v61 = vpop.f32.mrf.mxu0  ;;  %v8404_v4 = vpop.f32.mrf.mxu1 }
 0x155   : > { %10003 = vst [vmem:[#allocation16_spill] sm:$0xff] %v8400_v54  ;;  %10004 = vst [vmem:[#allocation17_spill] sm:$0xff] %v8402_v61 }
 0x156   : > { %10005 = vst [vmem:[#allocation18_spill] sm:$0xff] %v8404_v4  ;;  %v744_v2 = vpop.f32.mrf.mxu0  ;;  %v1245_v22 = vpop.f32.mrf.mxu1  ;;  %6764 = vmatmul.mubr.msk.bf16.gmra.mxu0 %vm519_vm0, %v1602_v45  ;;  %6808 = vmatmul.mubr.msk.bf16.gmra.mxu1 %vm519_vm0, %v2259_v51  ;;  %v1603_v4 = vpack.c.bf16 %v1583_v60, %v1582_v21  ;;  %v2260_v51 = vpack.c.bf16 %v2240_v8, %v2239_v5  ;;  %v2241_v60 = vld [vmem:[%s7883_s15 + $0x133] sm:$0xff] }
 0x157   : > { %v8409_v28 = vadd.f32 %v1245_v22, %v744_v2  ;;  %1950 = vmatprep.mubr.bf16.mxu0 %v10007_v32  ;;  %2607 = vmatprep.mubr.bf16.mxu1 %v10007_v32 }
 0x158   : > { %v746_v16 = vpop.f32.mrf.mxu0  ;;  %v1247_v19 = vpop.f32.mrf.mxu1 }
 0x159   : > { %10006 = vst [vmem:[#allocation19_spill] sm:$0xff] %v8409_v28  ;;  %v8416_v38 = vadd.f32 %v1247_v19, %v746_v16  ;;  %v1584_v16 = vld [vmem:[%s7883_s15 + $0x132] sm:$0xff] }
 0x15a   : > { %v748_v39 = vpop.f32.mrf.mxu0  ;;  %v1249_v45 = vpop.f32.mrf.mxu1 }
 0x15b   : > { %v8418_v61 = vadd.f32 %v1249_v45, %v748_v39  ;;  %v1604_v45 = vpack.c.bf16 %v1584_v16, %v1584_v16 }
 0x15c   : > { %v8420_v2 = vpop.f32.mrf.mxu0  ;;  %v8422_v22 = vpop.f32.mrf.mxu1 }
 0x15d   : > { %10008 = vst [vmem:[#allocation20_spill] sm:$0xff] %v8418_v61  ;;  %10009 = vst [vmem:[#allocation21_spill] sm:$0xff] %v8420_v2 }
 0x15e   : > { %10010 = vst [vmem:[#allocation22_spill] sm:$0xff] %v8422_v22  ;;  %v754_v28 = vpop.f32.mrf.mxu0  ;;  %v1255_v54 = vpop.f32.mrf.mxu1  ;;  %6765 = vmatmul.mubr.msk.bf16.gmra.mxu0 %vm519_vm0, %v1603_v4  ;;  %6809 = vmatmul.mubr.msk.bf16.gmra.mxu1 %vm519_vm0, %v2260_v51  ;;  %v2261_v4 = vpack.c.bf16 %v2241_v60, %v2241_v60 }
 0x15f   : > { %v8426_v48 = vadd.f32 %v1255_v54, %v754_v28  ;;  %1960 = vmatprep.mubr.bf16.mxu0 %v10007_v32  ;;  %2617 = vmatprep.mubr.bf16.mxu1 %v10007_v32 }
 0x160   : > { %v756_v21 = vpop.f32.mrf.mxu0  ;;  %v1257_v5 = vpop.f32.mrf.mxu1 }
 0x161   : > { %10011 = vst [vmem:[#allocation23_spill] sm:$0xff] %v8426_v48  ;;  %v8432_v8 = vadd.f32 %v1257_v5, %v756_v21  ;;  %v2860_v21 = vld [vmem:[%s7883_s15 + $0x4] sm:$0xff]  ;;  %v2861_v5 = vld [vmem:[%s7883_s15 + $0xc] sm:$0xff] }
 0x162   : > { %v758_v19 = vpop.f32.mrf.mxu0  ;;  %v1259_v39 = vpop.f32.mrf.mxu1 }
 0x163   : > { %10012 = vst [vmem:[#allocation24_spill] sm:$0xff] %v8432_v8  ;;  %v8434_v22 = vadd.f32 %v1259_v39, %v758_v19  ;;  %v2862_v8 = vld [vmem:[%s7883_s15 + $0x14] sm:$0xff] }
 0x164   : > { %v8436_v54 = vpop.f32.mrf.mxu0  ;;  %v8438_v28 = vpop.f32.mrf.mxu1 }
 0x165   : > { %10013 = vst [vmem:[#allocation25_spill] sm:$0xff] %v8434_v22  ;;  %10014 = vst [vmem:[#allocation26_spill] sm:$0xff] %v8436_v54  ;;  %v2899_v54 = vpack.c.bf16 %v2861_v5, %v2860_v21 }
 0x166   : > { %10015 = vst [vmem:[#allocation27_spill] sm:$0xff] %v8438_v28  ;;  %v764_v51 = vpop.f32.mrf.mxu0  ;;  %v1265_v2 = vpop.f32.mrf.mxu1  ;;  %6766 = vmatmul.mubr.msk.bf16.gmra.mxu0 %vm519_vm0, %v1604_v45  ;;  %6810 = vmatmul.mubr.msk.bf16.gmra.mxu1 %vm519_vm0, %v2261_v4 }
 0x167   : > { %v8442_v48 = vadd.f32 %v1265_v2, %v764_v51  ;;  %3084 = vmatprep.mubr.bf16.mxu0 %v10007_v32  ;;  %4034 = vmatprep.mubr.bf16.mxu1 %v10007_v32 }
 0x168   : > { %v766_v16 = vpop.f32.mrf.mxu0  ;;  %v1267_v60 = vpop.f32.mrf.mxu1 }
 0x169   : > { %10016 = vst [vmem:[#allocation28_spill] sm:$0xff] %v8442_v48  ;;  %v8448_v19 = vadd.f32 %v1267_v60, %v766_v16  ;;  %v2863_v16 = vld [vmem:[%s7883_s15 + $0x1c] sm:$0xff] }
 0x16a   : > { %v768_v39 = vpop.f32.mrf.mxu0  ;;  %v1269_v28 = vpop.f32.mrf.mxu1 }
 0x16b   : > { %10017 = vst [vmem:[#allocation29_spill] sm:$0xff] %v8448_v19  ;;  %v8450_v45 = vadd.f32 %v1269_v28, %v768_v39  ;;  %v2864_v19 = vld [vmem:[%s7883_s15 + $0x24] sm:$0xff] }
 0x16c   : > { %v8452_v4 = vpop.f32.mrf.mxu0  ;;  %v8454_v2 = vpop.f32.mrf.mxu1 }
 0x16d   : > { %10018 = vst [vmem:[#allocation30_spill] sm:$0xff] %v8450_v45  ;;  %10019 = vst [vmem:[#allocation31_spill] sm:$0xff] %v8452_v4  ;;  %v2900_v4 = vpack.c.bf16 %v2863_v16, %v2862_v8  ;;  %v7463_v8 = vld [vmem:[%s9980_s3 + $0x70] ss:$8 sps:$4 sm:$0xff]  }
 0x16e   : > { %10020 = vst [vmem:[#allocation32_spill] sm:$0xff] %v8454_v2  ;;  %v774_v51 = vpop.f32.mrf.mxu0  ;;  %v1275_v48 = vpop.f32.mrf.mxu1  ;;  %6835 = vmatmul.mubr.msk.bf16.vlgmr.msra.gmra.mxu0 %vm519_vm0, %v2899_v54 }
 0x16f   : > { %v8457_v22 = vadd.f32 %v1275_v48, %v774_v51  ;;  %3094 = vmatprep.mubr.bf16.mxu0 %v10007_v32 }
 0x170   : > { %v776_v60 = vpop.f32.mrf.mxu0  ;;  %v1277_v21 = vpop.f32.mrf.mxu1 }
 0x171   : > { %10021 = vst [vmem:[#allocation33_spill] sm:$0xff] %v8457_v22  ;;  %v8462_v28 = vadd.f32 %v1277_v21, %v776_v60  ;;  %v2865_v60 = vld [vmem:[%s7883_s15 + $0x2c] sm:$0xff] }
 0x172   : > { %v778_v5 = vpop.f32.mrf.mxu0  ;;  %v1279_v39 = vpop.f32.mrf.mxu1 }
 0x173   : > { %10022 = vst [vmem:[#allocation34_spill] sm:$0xff] %v8462_v28  ;;  %v8464_v2 = vadd.f32 %v1279_v39, %v778_v5  ;;  %v2901_v39 = vpack.c.bf16 %v2865_v60, %v2864_v19 }
 0x174   : > { %v8466_v45 = vpop.f32.mrf.mxu0  ;;  %v8468_v54 = vpop.f32.mrf.mxu1 }
 0x175   : > { %10023 = vst [vmem:[#allocation35_spill] sm:$0xff] %v8464_v2  ;;  %10024 = vst [vmem:[#allocation36_spill] sm:$0xff] %v8466_v45 }
 0x176   : > { %10025 = vst [vmem:[#allocation37_spill] sm:$0xff] %v8468_v54  ;;  %v784_v48 = vpop.f32.mrf.mxu0  ;;  %v1285_v51 = vpop.f32.mrf.mxu1  ;;  %6836 = vmatmul.mubr.msk.bf16.gmra.mxu0 %vm519_vm0, %v2900_v4  ;;  %v7465_v4 = vld [vmem:[%s9980_s3 + $0x74] ss:$8 sps:$4 sm:$0xff]  }
 0x177   : > { %v8471_v22 = vadd.f32 %v1285_v51, %v784_v48  ;;  %3104 = vmatprep.mubr.bf16.mxu0 %v10007_v32  ;;  %4002 = vmatprep.subr.bf16.mxu1 %v7465_v4 }
 0x178   : > { %v786_v21 = vpop.f32.mrf.mxu0  ;;  %v1287_v28 = vpop.f32.mrf.mxu1  ;;  %4003 = vmatpush1.bf16.msra.mxu1 %v7463_v8 }
 0x179   : > { %10026 = vst [vmem:[#allocation38_spill] sm:$0xff] %v8471_v22  ;;  %v8476_v61 = vadd.f32 %v1287_v28, %v786_v21  ;;  %v2867_v22 = vld [vmem:[%s7883_s15 + $0x3c] sm:$0xff] }
 0x17a   : > { %v788_v16 = vpop.f32.mrf.mxu0  ;;  %v1289_v5 = vpop.f32.mrf.mxu1 }
 0x17b   : > { %10027 = vst [vmem:[#allocation39_spill] sm:$0xff] %v8476_v61  ;;  %v8484_v48 = vadd.f32 %v1289_v5, %v788_v16  ;;  %v2866_v61 = vld [vmem:[%s7883_s15 + $0x34] sm:$0xff] }
 0x17c   : > { %v8486_v51 = vpop.f32.mrf.mxu0  ;;  %v8488_v28 = vpop.f32.mrf.mxu1 }
 0x17d   : > { %10028 = vst [vmem:[#allocation40_spill] sm:$0xff] %v8484_v48  ;;  %10029 = vst [vmem:[#allocation41_spill] sm:$0xff] %v8486_v51  ;;  %v2868_v48 = vld [vmem:[%s7883_s15 + $0x44] sm:$0xff] }
 0x17e   : > { %10030 = vst [vmem:[#allocation42_spill] sm:$0xff] %v8488_v28  ;;  %v794_v21 = vpop.f32.mrf.mxu0  ;;  %v1295_v54 = vpop.f32.mrf.mxu1  ;;  %6837 = vmatmul.mubr.msk.bf16.gmra.mxu0 %vm519_vm0, %v2901_v39  ;;  %v2902_v28 = vpack.c.bf16 %v2867_v22, %v2866_v61 }
 0x17f   : > { %v8491_v45 = vadd.f32 %v1295_v54, %v794_v21  ;;  %3114 = vmatprep.mubr.bf16.mxu0 %v10007_v32 }
 0x180   : > { %v796_v19 = vpop.f32.mrf.mxu0  ;;  %v1297_v60 = vpop.f32.mrf.mxu1 }
 0x181   : > { %10031 = vst [vmem:[#allocation43_spill] sm:$0xff] %v8491_v45  ;;  %v8496_v4 = vadd.f32 %v1297_v60, %v796_v19  ;;  %v2869_v19 = vld [vmem:[%s7883_s15 + $0x4c] sm:$0xff] }
 0x182   : > { %v798_v16 = vpop.f32.mrf.mxu0  ;;  %v1299_v5 = vpop.f32.mrf.mxu1 }
 0x183   : > { %10032 = vst [vmem:[#allocation44_spill] sm:$0xff] %v8496_v4  ;;  %v8498_v8 = vadd.f32 %v1299_v5, %v798_v16 }
 0x184   : > { %v8500_v51 = vpop.f32.mrf.mxu0  ;;  %v8502_v39 = vpop.f32.mrf.mxu1 }
 0x185   : > { %10033 = vst [vmem:[#allocation45_spill] sm:$0xff] %v8498_v8  ;;  %10034 = vst [vmem:[#allocation46_spill] sm:$0xff] %v8500_v51  ;;  %v2903_v51 = vpack.c.bf16 %v2869_v19, %v2868_v48  ;;  %v2871_v48 = vld [vmem:[%s7883_s15 + $0x5c] sm:$0xff] }
 0x186   : > { %10035 = vst [vmem:[#allocation47_spill] sm:$0xff] %v8502_v39  ;;  %v804_v54 = vpop.f32.mrf.mxu0  ;;  %v1305_v21 = vpop.f32.mrf.mxu1  ;;  %6838 = vmatmul.mubr.msk.bf16.gmra.mxu0 %vm519_vm0, %v2902_v28  ;;  %v7466_v28 = vld [vmem:[%s9980_s3 + $0x60] ss:$8 sps:$4 sm:$0xff]  }
 0x187   : > { %v8505_v45 = vadd.f32 %v1305_v21, %v804_v54  ;;  %3124 = vmatprep.mubr.bf16.mxu0 %v10007_v32  ;;  %v7468_v54 = vld [vmem:[%s9980_s3 + $0x64] ss:$8 sps:$4 sm:$0xff]  }
 0x188   : > { %v806_v60 = vpop.f32.mrf.mxu0  ;;  %v1307_v61 = vpop.f32.mrf.mxu1  ;;  %4004 = vmatprep.subr.bf16.mxu1 %v7468_v54 }
 0x189   : > { %10036 = vst [vmem:[#allocation48_spill] sm:$0xff] %v8505_v45  ;;  %v8510_v22 = vadd.f32 %v1307_v61, %v806_v60  ;;  %v2870_v61 = vld [vmem:[%s7883_s15 + $0x54] sm:$0xff]  ;;  %4005 = vmatpush1.bf16.msra.mxu1 %v7466_v28 }
 0x18a   : > { %v808_v16 = vpop.f32.mrf.mxu0  ;;  %v1309_v5 = vpop.f32.mrf.mxu1 }
 0x18b   : > { %10037 = vst [vmem:[#allocation49_spill] sm:$0xff] %v8510_v22 }
 0x18c   : > { %v809_v39 = vpop.f32.mrf.mxu0  ;;  %v1310_v8 = vpop.f32.mrf.mxu1 }
 0x18e   : > { %v1772_v21 = vpop.f32.mrf.mxu0  ;;  %6839 = vmatmul.mubr.msk.bf16.gmra.mxu0 %vm519_vm0, %v2903_v51  ;;  %v2429_v45 = vpop.f32.mrf.mxu1  ;;  %v2904_v51 = vpack.c.bf16 %v2871_v48, %v2870_v61  ;;  %v2872_v61 = vld [vmem:[%s7883_s15 + $0x64] sm:$0xff] }
 0x18f   : > { %v2047_v60 = vadd.f32 %v1772_v21, %v8199_v23  ;;  %3134 = vmatprep.mubr.bf16.mxu0 %v10007_v32 }
 0x190   : > { %v1774_v8 = vpop.f32.mrf.mxu0  ;;  %v2431_v39 = vpop.f32.mrf.mxu1 }
 0x191   : > { %v2048_v19 = vadd.f32 %v1774_v8, %v8206_v29  ;;  %v8524_v16 = vadd.f32 %v2429_v45, %v2047_v60 }
 0x192   : > { %v1776_v5 = vpop.f32.mrf.mxu0  ;;  %v2433_v22 = vpop.f32.mrf.mxu1 }
 0x193   : > { %v2049_v4 = vadd.f32 %v1776_v5, %v8208_v34  ;;  %v8527_v23 = vadd.f32 %v2431_v39, %v2048_v19  ;;  %v2873_v34 = vld [vmem:[%s7883_s15 + $0x6c] sm:$0xff] }
 0x194   : > { %v1778_v21 = vpop.f32.mrf.mxu0  ;;  %v8529_v2 = vpop.f32.mrf.mxu1 }
 0x195   : > { %v8532_v54 = vadd.f32 %v1778_v21, %v8210_v37  ;;  %v8534_v28 = vadd.f32 %v2433_v22, %v2049_v4  ;;  %v2905_v22 = vpack.c.bf16 %v2873_v34, %v2872_v61  ;;  %v2874_v61 = vld [vmem:[%s7883_s15 + $0x74] sm:$0xff] }
 0x196   : > { %v1782_v29 = vpop.f32.mrf.mxu0  ;;  %6840 = vmatmul.mubr.msk.bf16.gmra.mxu0 %vm519_vm0, %v2904_v51  ;;  %v2439_v45 = vpop.f32.mrf.mxu1 }
 0x197   : > { %10038 = vst [vmem:[#allocation50_spill] sm:$0xff] %v8534_v28  ;;  %v2051_v60 = vadd.f32 %v1782_v29, %v8215_v41  ;;  %3144 = vmatprep.mubr.bf16.mxu0 %v10007_v32 }
 0x198   : > { %v1784_v48 = vpop.f32.mrf.mxu0  ;;  %v2441_v8 = vpop.f32.mrf.mxu1 }
 0x199   : > { %v2052_v39 = vadd.f32 %v1784_v48, %v8222_v47  ;;  %v8542_v19 = vadd.f32 %v2439_v45, %v2051_v60 }
 0x19a   : > { %v1786_v37 = vpop.f32.mrf.mxu0  ;;  %v2443_v4 = vpop.f32.mrf.mxu1 }
 0x19b   : > { %v2053_v5 = vadd.f32 %v1786_v37, %v8224_v52  ;;  %v8545_v51 = vadd.f32 %v2441_v8, %v2052_v39  ;;  %v2875_v52 = vld [vmem:[%s7883_s15 + $0x7c] sm:$0xff] }
 0x19c   : > { %v1788_v41 = vpop.f32.mrf.mxu0  ;;  %v8547_v21 = vpop.f32.mrf.mxu1  ;;  %v7471_v37 = vld [vmem:[%s9980_s3 + $0x54] ss:$8 sps:$4 sm:$0xff]  }
 0x19d   : > { %v8550_v29 = vadd.f32 %v1788_v41, %v8226_v55  ;;  %v8552_v28 = vadd.f32 %v2443_v4, %v2053_v5  ;;  %v7469_v55 = vld [vmem:[%s9980_s3 + $0x50] ss:$8 sps:$4 sm:$0xff]   ;;  %4006 = vmatprep.subr.bf16.mxu1 %v7471_v37 }
 0x19e   : > { %v1792_v47 = vpop.f32.mrf.mxu0  ;;  %6841 = vmatmul.mubr.msk.bf16.gmra.mxu0 %vm519_vm0, %v2905_v22  ;;  %v2449_v45 = vpop.f32.mrf.mxu1  ;;  %v2906_v22 = vpack.c.bf16 %v2875_v52, %v2874_v61  ;;  %4007 = vmatpush1.bf16.msra.mxu1 %v7469_v55  ;;  %v2877_v52 = vld [vmem:[%s7883_s15 + $0x8c] sm:$0xff] }
 0x19f   : > { %v2055_v60 = vadd.f32 %v1792_v47, %v8231_v59  ;;  %3154 = vmatprep.mubr.bf16.mxu0 %v10007_v32 }
 0x1a0   : > { %v1794_v34 = vpop.f32.mrf.mxu0  ;;  %v2451_v48 = vpop.f32.mrf.mxu1 }
 0x1a1   : > { %v2056_v8 = vadd.f32 %v1794_v34, %v8238_v1  ;;  %v8560_v39 = vadd.f32 %v2449_v45, %v2055_v60 }
 0x1a2   : > { %v1796_v4 = vpop.f32.mrf.mxu0  ;;  %v2453_v59 = vpop.f32.mrf.mxu1 }
 0x1a3   : > { %10039 = vst [vmem:[#allocation51_spill] sm:$0xff] %v8560_v39  ;;  %v2057_v5 = vadd.f32 %v1796_v4, %v8240_v7  ;;  %v8569_v41 = vadd.f32 %v2451_v48, %v2056_v8  ;;  %v2876_v7 = vld [vmem:[%s7883_s15 + $0x84] sm:$0xff] }
 0x1a4   : > { %v1798_v1 = vpop.f32.mrf.mxu0  ;;  %v8571_v47 = vpop.f32.mrf.mxu1 }
 0x1a5   : > { %v8574_v45 = vadd.f32 %v1798_v1, %v8242_v10  ;;  %v8576_v60 = vadd.f32 %v2453_v59, %v2057_v5  ;;  %v2907_v59 = vpack.c.bf16 %v2877_v52, %v2876_v7  ;;  %v2878_v7 = vld [vmem:[%s7883_s15 + $0x94] sm:$0xff] }
 0x1a6   : > { %v1802_v34 = vpop.f32.mrf.mxu0  ;;  %6842 = vmatmul.mubr.msk.bf16.gmra.mxu0 %vm519_vm0, %v2906_v22  ;;  %v2459_v39 = vpop.f32.mrf.mxu1 }
 0x1a7   : > { %10040 = vst [vmem:[#allocation52_spill] sm:$0xff] %v8576_v60  ;;  %v2059_v61 = vadd.f32 %v1802_v34, %v8247_v14  ;;  %3164 = vmatprep.mubr.bf16.mxu0 %v10007_v32 }
 0x1a8   : > { %v1804_v48 = vpop.f32.mrf.mxu0  ;;  %v2461_v8 = vpop.f32.mrf.mxu1 }
 0x1a9   : > { %v2060_v37 = vadd.f32 %v1804_v48, %v8254_v20  ;;  %v8584_v55 = vadd.f32 %v2459_v39, %v2059_v61 }
 0x1aa   : > { %v1806_v10 = vpop.f32.mrf.mxu0  ;;  %v2463_v4 = vpop.f32.mrf.mxu1 }
 0x1ab   : > { %v2061_v22 = vadd.f32 %v1806_v10, %v8256_v26  ;;  %v8587_v5 = vadd.f32 %v2461_v8, %v2060_v37  ;;  %v2879_v26 = vld [vmem:[%s7883_s15 + $0x9c] sm:$0xff] }
 0x1ac   : > { %v1808_v14 = vpop.f32.mrf.mxu0  ;;  %v8589_v1 = vpop.f32.mrf.mxu1 }
 0x1ad   : > { %v8592_v34 = vadd.f32 %v1808_v14, %v8258_v30  ;;  %v8594_v60 = vadd.f32 %v2463_v4, %v2061_v22  ;;  %v2908_v4 = vpack.c.bf16 %v2879_v26, %v2878_v7  ;;  %v2880_v7 = vld [vmem:[%s7883_s15 + $0xa4] sm:$0xff] }
 0x1ae   : > { %v1812_v20 = vpop.f32.mrf.mxu0  ;;  %6843 = vmatmul.mubr.msk.bf16.gmra.mxu0 %vm519_vm0, %v2907_v59  ;;  %v2469_v39 = vpop.f32.mrf.mxu1 }
 0x1af   : > { %10041 = vst [vmem:[#allocation53_spill] sm:$0xff] %v8594_v60  ;;  %v2063_v61 = vadd.f32 %v1812_v20, %v8263_v35  ;;  %3174 = vmatprep.mubr.bf16.mxu0 %v10007_v32 }
 0x1b0   : > { %v1814_v52 = vpop.f32.mrf.mxu0  ;;  %v2471_v48 = vpop.f32.mrf.mxu1 }
 0x1b1   : > { %v2064_v8 = vadd.f32 %v1814_v52, %v8270_v43  ;;  %v8602_v37 = vadd.f32 %v2469_v39, %v2063_v61 }
 0x1b2   : > { %v1816_v30 = vpop.f32.mrf.mxu0  ;;  %v2473_v10 = vpop.f32.mrf.mxu1 }
 0x1b3   : > { %v2065_v59 = vadd.f32 %v1816_v30, %v8272_v49  ;;  %v8605_v22 = vadd.f32 %v2471_v48, %v2064_v8  ;;  %v2881_v49 = vld [vmem:[%s7883_s15 + $0xac] sm:$0xff] }
 0x1b4   : > { %v1818_v35 = vpop.f32.mrf.mxu0  ;;  %v8607_v14 = vpop.f32.mrf.mxu1 }
 0x1b5   : > { %v8610_v20 = vadd.f32 %v1818_v35, %v8274_v53  ;;  %v8612_v60 = vadd.f32 %v2473_v10, %v2065_v59  ;;  %v2909_v10 = vpack.c.bf16 %v2881_v49, %v2880_v7  ;;  %v2882_v49 = vld [vmem:[%s7883_s15 + $0xb4] sm:$0xff] }
 0x1b6   : > { %v1822_v43 = vpop.f32.mrf.mxu0  ;;  %6844 = vmatmul.mubr.msk.bf16.gmra.mxu0 %vm519_vm0, %v2908_v4  ;;  %v2479_v39 = vpop.f32.mrf.mxu1 }
 0x1b7   : > { %v2067_v61 = vadd.f32 %v1822_v43, %v8279_v58  ;;  %3184 = vmatprep.mubr.bf16.mxu0 %v10007_v32  ;;  %v7474_v58 = vld [vmem:[%s9980_s3 + $0x44] ss:$8 sps:$4 sm:$0xff]  }
 0x1b8   : > { %v1824_v26 = vpop.f32.mrf.mxu0  ;;  %v2481_v52 = vpop.f32.mrf.mxu1  ;;  %4008 = vmatprep.subr.bf16.mxu1 %v7474_v58 }
 0x1b9   : > { %v2068_v48 = vadd.f32 %v1824_v26, %v8286_v3  ;;  %v8620_v8 = vadd.f32 %v2479_v39, %v2067_v61  ;;  %v7472_v3 = vld [vmem:[%s9980_s3 + $0x40] ss:$8 sps:$4 sm:$0xff]  }
 0x1ba   : > { %v1826_v53 = vpop.f32.mrf.mxu0  ;;  %v2483_v30 = vpop.f32.mrf.mxu1  ;;  %4009 = vmatpush1.bf16.msra.mxu1 %v7472_v3 }
 0x1bb   : > { %v2069_v59 = vadd.f32 %v1826_v53, %v8288_v9  ;;  %v8623_v4 = vadd.f32 %v2481_v52, %v2068_v48  ;;  %v2883_v52 = vld [vmem:[%s7883_s15 + $0xbc] sm:$0xff] }
 0x1bc   : > { %v1828_v35 = vpop.f32.mrf.mxu0  ;;  %v8628_v43 = vpop.f32.mrf.mxu1  ;;  %v7477_v48 = vld [vmem:[%s9980_s3 + $0x174] ss:$8 sps:$4 sm:$0xff]  }
 0x1bd   : > { %10042 = vst [vmem:[#allocation54_spill] sm:$0xff] %v8628_v43  ;;  %v8634_v39 = vadd.f32 %v1828_v35, %v8290_v13  ;;  %v8636_v61 = vadd.f32 %v2483_v30, %v2069_v59  ;;  %v7483_v13 = vld [vmem:[%s9980_s3 + $0x34] ss:$8 sps:$4 sm:$0xff]   ;;  %4668 = vmatprep.subr.bf16.mxu0 %v7477_v48 }
 0x1be   : > { %v1832_v9 = vpop.f32.mrf.mxu0  ;;  %6845 = vmatmul.mubr.msk.bf16.gmra.mxu0 %vm519_vm0, %v2909_v10  ;;  %v2489_v7 = vpop.f32.mrf.mxu1  ;;  %v7475_v10 = vld [vmem:[%s9980_s3 + $0x170] ss:$8 sps:$4 sm:$0xff]   ;;  %4010 = vmatprep.subr.bf16.mxu1 %v7483_v13 }
 0x1bf   : > { %10043 = vst [vmem:[#allocation55_spill] sm:$0xff] %v8634_v39  ;;  %10044 = vst [vmem:[#allocation56_spill] sm:$0xff] %v8636_v61  ;;  %v2071_v26 = vadd.f32 %v1832_v9, %v8295_v18  ;;  %3194 = vmatprep.mubr.bf16.mxu0 %v10007_v32  ;;  %v7481_v18 = vld [vmem:[%s9980_s3 + $0x30] ss:$8 sps:$4 sm:$0xff]   ;;  %v2910_v9 = vpack.c.bf16 %v2883_v52, %v2882_v49  ;;  %4669 = vmatpush1.bf16.msra.mxu0 %v7475_v10  ;;  %v7480_v39 = vld [vmem:[%s9980_s3 + $0x164] ss:$8 sps:$4 sm:$0xff]  }
 0x1c0   : > { %v1834_v53 = vpop.f32.mrf.mxu0  ;;  %v2491_v30 = vpop.f32.mrf.mxu1  ;;  %4011 = vmatpush1.bf16.msra.mxu1 %v7481_v18  ;;  %v7478_v49 = vld [vmem:[%s9980_s3 + $0x160] ss:$8 sps:$4 sm:$0xff]   ;;  %4670 = vmatprep.subr.bf16.mxu0 %v7480_v39  ;;  %v2885_v18 = vld [vmem:[%s7883_s15 + $0xcc] sm:$0xff]  ;;  %v7495_v39 = vld [vmem:[%s9980_s3 + $0x14] ss:$8 sps:$4 sm:$0xff]  }
 0x1c1   : > { %v2072_v59 = vadd.f32 %v1834_v53, %v8302_v27  ;;  %v8656_v58 = vadd.f32 %v2489_v7, %v2071_v26  ;;  %v7489_v27 = vld [vmem:[%s9980_s3 + $0x24] ss:$8 sps:$4 sm:$0xff]  }
 0x1c2   : > { %v1836_v35 = vpop.f32.mrf.mxu0  ;;  %v2493_v3 = vpop.f32.mrf.mxu1  ;;  %4012 = vmatprep.subr.bf16.mxu1 %v7489_v27 }
 0x1c3   : > { %v2073_v61 = vadd.f32 %v1836_v35, %v8304_v36  ;;  %v8659_v43 = vadd.f32 %v2491_v30, %v2072_v59  ;;  %v7487_v36 = vld [vmem:[%s9980_s3 + $0x20] ss:$8 sps:$4 sm:$0xff]   ;;  %4671 = vmatpush1.bf16.msra.mxu0 %v7478_v49  ;;  %v7484_v35 = vld [vmem:[%s9980_s3 + $0x150] ss:$8 sps:$4 sm:$0xff]  }
 0x1c4   : > { %v1838_v7 = vpop.f32.mrf.mxu0  ;;  %v8667_v26 = vpop.f32.mrf.mxu1  ;;  %v2884_v30 = vld [vmem:[%s7883_s15 + $0xc4] sm:$0xff]  ;;  %4013 = vmatpush1.bf16.msra.mxu1 %v7487_v36 }
 0x1c5   : > { %v8676_v52 = vadd.f32 %v1838_v7, %v8306_v40  ;;  %v8678_v48 = vadd.f32 %v2493_v3, %v2073_v61  ;;  %v7486_v40 = vld [vmem:[%s9980_s3 + $0x154] ss:$8 sps:$4 sm:$0xff]   ;;  %4014 = vmatprep.subr.bf16.mxu1 %v7495_v39  ;;  %v2911_v49 = vpack.c.bf16 %v2885_v18, %v2884_v30  ;;  %v7499_v30 = vld [vmem:[%s9980_s3] ss:$8 sps:$4 sm:$0xff]  }
 0x1c6   : > { %v1842_v13 = vpop.f32.mrf.mxu0  ;;  %6846 = vmatmul.mubr.msk.bf16.gmra.mxu0 %vm519_vm0, %v2910_v9  ;;  %v2499_v53 = vpop.f32.mrf.mxu1  ;;  %4672 = vmatprep.subr.bf16.mxu0 %v7486_v40 }
 0x1c7   : > { %10045 = vst [vmem:[#allocation57_spill] sm:$0xff] %v8678_v48  ;;  %v2075_v10 = vadd.f32 %v1842_v13, %v8311_v46  ;;  %3204 = vmatprep.mubr.bf16.mxu0 %v10007_v32  ;;  %v7493_v46 = vld [vmem:[%s9980_s3 + $0x10] ss:$8 sps:$4 sm:$0xff]   ;;  %4673 = vmatpush1.bf16.msra.mxu0 %v7484_v35  ;;  %v7492_v48 = vld [vmem:[%s9980_s3 + $0x144] ss:$8 sps:$4 sm:$0xff]  }
 0x1c8   : > { %v1844_v61 = vpop.f32.mrf.mxu0  ;;  %v2501_v59 = vpop.f32.mrf.mxu1  ;;  %4015 = vmatpush1.bf16.msra.mxu1 %v7493_v46  ;;  %4674 = vmatprep.subr.bf16.mxu0 %v7492_v48  ;;  %v2886_v35 = vld [vmem:[%s7883_s15 + $0xd4] sm:$0xff]  ;;  %v2887_v46 = vld [vmem:[%s7883_s15 + $0xdc] sm:$0xff] }
 0x1c9   : > { %v2076_v3 = vadd.f32 %v1844_v61, %v8318_v57  ;;  %v8698_v9 = vadd.f32 %v2499_v53, %v2075_v10  ;;  %v7501_v57 = vld [vmem:[%s9980_s3 + $0x4] ss:$8 sps:$4 sm:$0xff]   ;;  %v7496_v48 = vld [vmem:[%s9980_s3 + $0x130] ss:$8 sps:$4 sm:$0xff]  }
 0x1ca   : > { %v1846_v27 = vpop.f32.mrf.mxu0  ;;  %v2503_v7 = vpop.f32.mrf.mxu1  ;;  %4016 = vmatprep.subr.bf16.mxu1 %v7501_v57  ;;  %v2912_v57 = vpack.c.bf16 %v2887_v46, %v2886_v35 }
 0x1cb   : > { %v2077_v36 = vadd.f32 %v1846_v27, %v8320_v0  ;;  %v8701_v13 = vadd.f32 %v2501_v59, %v2076_v3  ;;  %v7490_v0 = vld [vmem:[%s9980_s3 + $0x140] ss:$8 sps:$4 sm:$0xff]  }
 0x1cc   : > { %v1848_v53 = vpop.f32.mrf.mxu0  ;;  %v8709_v10 = vpop.f32.mrf.mxu1  ;;  %4017 = vmatpush1.bf16.msra.mxu1 %v7499_v30  ;;  %4675 = vmatpush1.bf16.msra.mxu0 %v7490_v0  ;;  %v7504_v30 = vld [vmem:[%s9980_s3 + $0x124] ss:$8 sps:$4 sm:$0xff]  }
 0x1cd   : > { %v8718_v18 = vadd.f32 %v1848_v53, %v8322_v6  ;;  %v8720_v40 = vadd.f32 %v2503_v7, %v2077_v36  ;;  %v7498_v6 = vld [vmem:[%s9980_s3 + $0x134] ss:$8 sps:$4 sm:$0xff]  }
 0x1ce   : > { %v1852_v39 = vpop.f32.mrf.mxu0  ;;  %6847 = vmatmul.mubr.msk.bf16.gmra.mxu0 %vm519_vm0, %v2911_v49  ;;  %v2509_v61 = vpop.f32.mrf.mxu1  ;;  %4676 = vmatprep.subr.bf16.mxu0 %v7498_v6  ;;  %v2888_v6 = vld [vmem:[%s7883_s15 + $0xe4] sm:$0xff] }
 0x1cf   : > { %10046 = vst [vmem:[#allocation58_spill] sm:$0xff] %v8720_v40  ;;  %v2079_v59 = vadd.f32 %v1852_v39, %v8327_v15  ;;  %3214 = vmatprep.mubr.bf16.mxu0 %v10007_v32 }
 0x1d0   : > { %v1854_v3 = vpop.f32.mrf.mxu0  ;;  %v2511_v27 = vpop.f32.mrf.mxu1  ;;  %4677 = vmatpush1.bf16.msra.mxu0 %v7496_v48 }
 0x1d1   : > { %v2080_v7 = vadd.f32 %v1854_v3, %v8334_v24  ;;  %v8734_v49 = vadd.f32 %v2509_v61, %v2079_v59  ;;  %v7502_v24 = vld [vmem:[%s9980_s3 + $0x120] ss:$8 sps:$4 sm:$0xff]   ;;  %4678 = vmatprep.subr.bf16.mxu0 %v7504_v30  ;;  %v2889_v3 = vld [vmem:[%s7883_s15 + $0xec] sm:$0xff] }
 0x1d2   : > { %v1856_v15 = vpop.f32.mrf.mxu0  ;;  %v2513_v36 = vpop.f32.mrf.mxu1 }
 0x1d3   : > { %v2081_v53 = vadd.f32 %v1856_v15, %v8336_v33  ;;  %v8737_v0 = vadd.f32 %v2511_v27, %v2080_v7  ;;  %v7507_v27 = vld [vmem:[%s9980_s3 + $0x114] ss:$8 sps:$4 sm:$0xff]   ;;  %v7505_v7 = vld [vmem:[%s9980_s3 + $0x110] ss:$8 sps:$4 sm:$0xff]  }
 0x1d4   : > { %v1858_v39 = vpop.f32.mrf.mxu0  ;;  %v8742_v40 = vpop.f32.mrf.mxu1  ;;  %4679 = vmatpush1.bf16.msra.mxu0 %v7502_v24  ;;  %v7510_v24 = vld [vmem:[%s9980_s3 + $0x104] ss:$8 sps:$4 sm:$0xff]  }
 0x1d5   : > { %v8748_v61 = vadd.f32 %v1858_v39, %v8338_v42  ;;  %v8750_v59 = vadd.f32 %v2513_v36, %v2081_v53  ;;  %4680 = vmatprep.subr.bf16.mxu0 %v7507_v27  ;;  %v2913_v53 = vpack.c.bf16 %v2889_v3, %v2888_v6  ;;  %v2890_v27 = vld [vmem:[%s7883_s15 + $0xf4] sm:$0xff] }
 0x1d6   : > { %v1862_v33 = vpop.f32.mrf.mxu0  ;;  %6848 = vmatmul.mubr.msk.bf16.gmra.mxu0 %vm519_vm0, %v2912_v57  ;;  %v2519_v35 = vpop.f32.mrf.mxu1 }
 0x1d7   : > { %10047 = vst [vmem:[#allocation59_spill] sm:$0xff] %v8750_v59  ;;  %v2083_v46 = vadd.f32 %v1862_v33, %v8343_v50  ;;  %3224 = vmatprep.mubr.bf16.mxu0 %v10007_v32 }
 0x1d8   : > { %v1864_v42 = vpop.f32.mrf.mxu0  ;;  %v2521_v48 = vpop.f32.mrf.mxu1  ;;  %4681 = vmatpush1.bf16.msra.mxu0 %v7505_v7 }
 0x1d9   : > { %v2084_v15 = vadd.f32 %v1864_v42, %v8350_v62  ;;  %v8764_v36 = vadd.f32 %v2519_v35, %v2083_v46  ;;  %v7508_v62 = vld [vmem:[%s9980_s3 + $0x100] ss:$8 sps:$4 sm:$0xff]   ;;  %4682 = vmatprep.subr.bf16.mxu0 %v7510_v24 }
 0x1da   : > { %v1866_v50 = vpop.f32.mrf.mxu0  ;;  %v2523_v57 = vpop.f32.mrf.mxu1  ;;  %v2891_v42 = vld [vmem:[%s7883_s15 + $0xfc] sm:$0xff] }
 0x1db   : > { %v2085_v30 = vadd.f32 %v1866_v50, %v8352_v11  ;;  %v8767_v39 = vadd.f32 %v2521_v48, %v2084_v15 }
 0x1dc   : > { %v1868_v33 = vpop.f32.mrf.mxu0  ;;  %v8772_v59 = vpop.f32.mrf.mxu1  ;;  %4683 = vmatpush1.bf16.msra.mxu0 %v7508_v62 }
 0x1dd   : > { %v8778_v35 = vadd.f32 %v1868_v33, %v8354_v17  ;;  %v8780_v46 = vadd.f32 %v2523_v57, %v2085_v30  ;;  %v2914_v30 = vpack.c.bf16 %v2891_v42, %v2890_v27  ;;  %v2892_v27 = vld [vmem:[%s7883_s15 + $0x104] sm:$0xff] }
 0x1de   : > { %v1872_v11 = vpop.f32.mrf.mxu0  ;;  %6849 = vmatmul.mubr.msk.bf16.gmra.mxu0 %vm519_vm0, %v2913_v53  ;;  %v2529_v6 = vpop.f32.mrf.mxu1 }
 0x1df   : > { %v2087_v3 = vadd.f32 %v1872_v11, %v8359_v25  ;;  %3234 = vmatprep.mubr.bf16.mxu0 %v10007_v32 }
 0x1e0   : > { %v1874_v48 = vpop.f32.mrf.mxu0  ;;  %v2531_v7 = vpop.f32.mrf.mxu1 }
 0x1e1   : > { %v2088_v15 = vadd.f32 %v1874_v48, %v8366_v44  ;;  %v8788_v17 = vadd.f32 %v2529_v6, %v2087_v3 }
 0x1e2   : > { %v1876_v50 = vpop.f32.mrf.mxu0  ;;  %v2533_v57 = vpop.f32.mrf.mxu1 }
 0x1e3   : > { %v2089_v53 = vadd.f32 %v1876_v50, %v8368_v56  ;;  %v8791_v24 = vadd.f32 %v2531_v7, %v2088_v15  ;;  %v2893_v56 = vld [vmem:[%s7883_s15 + $0x10c] sm:$0xff] }
 0x1e4   : > { %v1878_v25 = vpop.f32.mrf.mxu0  ;;  %v8793_v33 = vpop.f32.mrf.mxu1 }
 0x1e5   : > { %10048 = vst [vmem:[#allocation60_spill] sm:$0xff] %v8793_v33  ;;  %v8796_v62 = vadd.f32 %v1878_v25, %v8370_v63  ;;  %v8798_v11 = vadd.f32 %v2533_v57, %v2089_v53  ;;  %v2915_v57 = vpack.c.bf16 %v2893_v56, %v2892_v27  ;;  %v10051_v53 = vld [vmem:[#allocation12_spill] sm:$0xff]  ;;  %v2894_v27 = vld [vmem:[%s7883_s15 + $0x114] sm:$0xff] }
 0x1e6   : > { %v1882_v44 = vpop.f32.mrf.mxu0  ;;  %6850 = vmatmul.mubr.msk.bf16.gmra.mxu0 %vm519_vm0, %v2914_v30  ;;  %v2539_v6 = vpop.f32.mrf.mxu1  ;;  %v2895_v56 = vld [vmem:[%s7883_s15 + $0x11c] sm:$0xff] }
 0x1e7   : > { %10049 = vst [vmem:[#allocation61_spill] sm:$0xff] %v8796_v62  ;;  %10050 = vst [vmem:[#allocation62_spill] sm:$0xff] %v8798_v11  ;;  %v2091_v3 = vadd.f32 %v1882_v44, %v8375_v12  ;;  %3244 = vmatprep.mubr.bf16.mxu0 %v10007_v32  ;;  %v10054_v11 = vld [vmem:[#allocation13_spill] sm:$0xff] }
 0x1e8   : > { %v1884_v42 = vpop.f32.mrf.mxu0  ;;  %v2541_v48 = vpop.f32.mrf.mxu1 }
 0x1e9   : > { %v2092_v7 = vadd.f32 %v1884_v42, %v8382_v31  ;;  %v8806_v15 = vadd.f32 %v2539_v6, %v2091_v3  ;;  %v10057_v3 = vld [vmem:[#allocation14_spill] sm:$0xff] }
 0x1ea   : > { %v1886_v63 = vpop.f32.mrf.mxu0  ;;  %v2543_v50 = vpop.f32.mrf.mxu1 }
 0x1eb   : > { %v2093_v30 = vadd.f32 %v1886_v63, %v10051_v53  ;;  %v8809_v25 = vadd.f32 %v2541_v48, %v2092_v7  ;;  %v10058_v63 = vld [vmem:[#allocation15_spill] sm:$0xff] }
 0x1ec   : > { %v1888_v12 = vpop.f32.mrf.mxu0  ;;  %v8811_v44 = vpop.f32.mrf.mxu1 }
 0x1ed   : > { %10052 = vst [vmem:[#allocation12_spill] sm:$0xff] %v8809_v25  ;;  %10053 = vst [vmem:[#allocation63_spill] sm:$0xff] %v8811_v44  ;;  %v8814_v33 = vadd.f32 %v1888_v12, %v10054_v11  ;;  %v8816_v62 = vadd.f32 %v2543_v50, %v2093_v30  ;;  %v2916_v12 = vpack.c.bf16 %v2895_v56, %v2894_v27  ;;  %v2897_v27 = vld [vmem:[%s7883_s15 + $0x12c] sm:$0xff] }
 0x1ee   : > { %v1892_v31 = vpop.f32.mrf.mxu0  ;;  %6851 = vmatmul.mubr.msk.bf16.gmra.mxu0 %vm519_vm0, %v2915_v57  ;;  %v2549_v6 = vpop.f32.mrf.mxu1 }
 0x1ef   : > { %10055 = vst [vmem:[#allocation13_spill] sm:$0xff] %v8814_v33  ;;  %10056 = vst [vmem:[#allocation64_spill] sm:$0xff] %v8816_v62  ;;  %v2095_v42 = vadd.f32 %v1892_v31, %v10057_v3  ;;  %3254 = vmatprep.mubr.bf16.mxu0 %v10007_v32  ;;  %v10060_v62 = vld [vmem:[#allocation16_spill] sm:$0xff] }
 0x1f0   : > { %v1894_v48 = vpop.f32.mrf.mxu0  ;;  %v2551_v7 = vpop.f32.mrf.mxu1 }
 0x1f1   : > { %v2096_v53 = vadd.f32 %v1894_v48, %v10058_v63  ;;  %v8824_v11 = vadd.f32 %v2549_v6, %v2095_v42  ;;  %v10065_v63 = vld [vmem:[#allocation19_spill] sm:$0xff]  ;;  %v2896_v42 = vld [vmem:[%s7883_s15 + $0x124] sm:$0xff] }
 0x1f2   : > { %v1896_v50 = vpop.f32.mrf.mxu0  ;;  %v2553_v30 = vpop.f32.mrf.mxu1 }
 0x1f3   : > { %10059 = vst [vmem:[#allocation14_spill] sm:$0xff] %v8824_v11  ;;  %v2097_v57 = vadd.f32 %v1896_v50, %v10060_v62  ;;  %v8827_v44 = vadd.f32 %v2551_v7, %v2096_v53 }
 0x1f4   : > { %v8829_v31 = vpop.f32.mrf.mxu0  ;;  %v8831_v3 = vpop.f32.mrf.mxu1 }
 0x1f5   : > { %10061 = vst [vmem:[#allocation15_spill] sm:$0xff] %v8827_v44  ;;  %10062 = vst [vmem:[#allocation16_spill] sm:$0xff] %v8829_v31  ;;  %v8833_v33 = vadd.f32 %v2553_v30, %v2097_v57  ;;  %v2917_v57 = vpack.c.bf16 %v2897_v27, %v2896_v42 }
 0x1f6   : > { %10063 = vst [vmem:[#allocation65_spill] sm:$0xff] %v8831_v3  ;;  %v1902_v25 = vpop.f32.mrf.mxu0  ;;  %6852 = vmatmul.mubr.msk.bf16.gmra.mxu0 %vm519_vm0, %v2916_v12  ;;  %v2559_v48 = vpop.f32.mrf.mxu1 }
 0x1f7   : > { %10064 = vst [vmem:[#allocation66_spill] sm:$0xff] %v8833_v33  ;;  %v2099_v6 = vadd.f32 %v1902_v25, %v10065_v63  ;;  %3264 = vmatprep.mubr.bf16.mxu0 %v10007_v32  ;;  %v10067_v33 = vld [vmem:[#allocation20_spill] sm:$0xff] }
 0x1f8   : > { %v1904_v56 = vpop.f32.mrf.mxu0  ;;  %v2561_v62 = vpop.f32.mrf.mxu1 }
 0x1f9   : > { %v2100_v7 = vadd.f32 %v1904_v56, %v8416_v38  ;;  %v8841_v53 = vadd.f32 %v2559_v48, %v2099_v6  ;;  %v10072_v38 = vld [vmem:[#allocation23_spill] sm:$0xff] }
 0x1fa   : > { %v1906_v50 = vpop.f32.mrf.mxu0  ;;  %v2563_v30 = vpop.f32.mrf.mxu1  ;;  %v2898_v6 = vld [vmem:[%s7883_s15 + $0x134] sm:$0xff]  ;;  %s6569_s15 = scalar_lea.sflag [#allocation8], %s378_s14 }
 0x1fb   : > { %10066 = vst [vmem:[#allocation19_spill] sm:$0xff] %v8841_v53  ;;  %v2101_v3 = vadd.f32 %v1906_v50, %v10067_v33  ;;  %v8844_v12 = vadd.f32 %v2561_v62, %v2100_v7  ;;  %v10073_v33 = vld [vmem:[#allocation24_spill] sm:$0xff] }
 0x1fc   : > { %v8846_v44 = vpop.f32.mrf.mxu0  ;;  %v8848_v25 = vpop.f32.mrf.mxu1 }
 0x1fd   : > { %10068 = vst [vmem:[#allocation20_spill] sm:$0xff] %v8844_v12  ;;  %10069 = vst [vmem:[#allocation67_spill] sm:$0xff] %v8846_v44  ;;  %v8850_v63 = vadd.f32 %v2563_v30, %v2101_v3  ;;  %v10075_v3 = vld [vmem:[#allocation25_spill] sm:$0xff] }
 0x1fe   : > { %10070 = vst [vmem:[#allocation68_spill] sm:$0xff] %v8848_v25  ;;  %v1912_v11 = vpop.f32.mrf.mxu0  ;;  %6853 = vmatmul.mubr.msk.bf16.gmra.mxu0 %vm519_vm0, %v2917_v57  ;;  %v2569_v31 = vpop.f32.mrf.mxu1  ;;  %v2918_v25 = vpack.c.bf16 %v2898_v6, %v2898_v6 }
 0x1ff   : > { %10071 = vst [vmem:[#allocation69_spill] sm:$0xff] %v8850_v63  ;;  %v2103_v48 = vadd.f32 %v1912_v11, %v10072_v38  ;;  %3274 = vmatprep.mubr.bf16.mxu0 %v10007_v32 }
 0x200   : > { %v1914_v42 = vpop.f32.mrf.mxu0  ;;  %v2571_v27 = vpop.f32.mrf.mxu1 }
 0x201   : > { %v2104_v56 = vadd.f32 %v1914_v42, %v10073_v33  ;;  %v8857_v62 = vadd.f32 %v2569_v31, %v2103_v48  ;;  %v10080_v42 = vld [vmem:[#allocation28_spill] sm:$0xff]  ;;  %v10081_v33 = vld [vmem:[#allocation29_spill] sm:$0xff] }
 0x202   : > { %v1916_v7 = vpop.f32.mrf.mxu0  ;;  %v2573_v50 = vpop.f32.mrf.mxu1 }
 0x203   : > { %10074 = vst [vmem:[#allocation23_spill] sm:$0xff] %v8857_v62  ;;  %v2105_v30 = vadd.f32 %v1916_v7, %v10075_v3  ;;  %v8860_v63 = vadd.f32 %v2571_v27, %v2104_v56  ;;  %v10088_v62 = vld [vmem:[#allocation33_spill] sm:$0xff] }
 0x204   : > { %v8862_v57 = vpop.f32.mrf.mxu0  ;;  %v8864_v12 = vpop.f32.mrf.mxu1 }
 0x205   : > { %10076 = vst [vmem:[#allocation24_spill] sm:$0xff] %v8860_v63  ;;  %10077 = vst [vmem:[#allocation25_spill] sm:$0xff] %v8862_v57  ;;  %v8866_v11 = vadd.f32 %v2573_v50, %v2105_v30  ;;  %v10083_v63 = vld [vmem:[#allocation30_spill] sm:$0xff] }
 0x206   : > { %10078 = vst [vmem:[#allocation70_spill] sm:$0xff] %v8864_v12  ;;  %v1922_v38 = vpop.f32.mrf.mxu0  ;;  %6854 = vmatmul.mubr.msk.bf16.gmra.mxu0 %vm519_vm0, %v2918_v25  ;;  %v2579_v53 = vpop.f32.mrf.mxu1 }
 0x207   : > { %10079 = vst [vmem:[#allocation71_spill] sm:$0xff] %v8866_v11  ;;  %v2107_v31 = vadd.f32 %v1922_v38, %v10080_v42  ;;  %4700 = vmatprep.mubr.bf16.mxu0 %v10007_v32 }
 0x208   : > { %v1924_v48 = vpop.f32.mrf.mxu0  ;;  %v2581_v6 = vpop.f32.mrf.mxu1 }
 0x209   : > { %v2108_v7 = vadd.f32 %v1924_v48, %v10081_v33  ;;  %v8872_v27 = vadd.f32 %v2579_v53, %v2107_v31  ;;  %v10089_v53 = vld [vmem:[#allocation34_spill] sm:$0xff] }
 0x20a   : > { %v1926_v56 = vpop.f32.mrf.mxu0  ;;  %v2583_v3 = vpop.f32.mrf.mxu1 }
 0x20b   : > { %10082 = vst [vmem:[#allocation28_spill] sm:$0xff] %v8872_v27  ;;  %v2109_v12 = vadd.f32 %v1926_v56, %v10083_v63  ;;  %v8875_v50 = vadd.f32 %v2581_v6, %v2108_v7  ;;  %v10091_v6 = vld [vmem:[#allocation35_spill] sm:$0xff] }
 0x20c   : > { %v8877_v30 = vpop.f32.mrf.mxu0  ;;  %v8879_v25 = vpop.f32.mrf.mxu1 }
 0x20d   : > { %10084 = vst [vmem:[#allocation29_spill] sm:$0xff] %v8875_v50  ;;  %10085 = vst [vmem:[#allocation30_spill] sm:$0xff] %v8877_v30  ;;  %v8881_v11 = vadd.f32 %v2583_v3, %v2109_v12 }
 0x20e   : > { %10086 = vst [vmem:[#allocation72_spill] sm:$0xff] %v8879_v25  ;;  %v1932_v38 = vpop.f32.mrf.mxu0  ;;  %v2589_v42 = vpop.f32.mrf.mxu1 }
 0x20f   : > { %10087 = vst [vmem:[#allocation73_spill] sm:$0xff] %v8881_v11  ;;  %v2111_v57 = vadd.f32 %v1932_v38, %v10088_v62  ;;  %v10096_v38 = vld [vmem:[#allocation38_spill] sm:$0xff] }
 0x210   : > { %v1934_v44 = vpop.f32.mrf.mxu0  ;;  %v2591_v48 = vpop.f32.mrf.mxu1 }
 0x211   : > { %v2112_v31 = vadd.f32 %v1934_v44, %v10089_v53  ;;  %v8885_v33 = vadd.f32 %v2589_v42, %v2111_v57  ;;  %v10097_v57 = vld [vmem:[#allocation39_spill] sm:$0xff] }
 0x212   : > { %v1936_v27 = vpop.f32.mrf.mxu0  ;;  %v2593_v63 = vpop.f32.mrf.mxu1 }
 0x213   : > { %10090 = vst [vmem:[#allocation33_spill] sm:$0xff] %v8885_v33  ;;  %v2113_v7 = vadd.f32 %v1936_v27, %v10091_v6  ;;  %v8888_v56 = vadd.f32 %v2591_v48, %v2112_v31  ;;  %v10099_v48 = vld [vmem:[#allocation40_spill] sm:$0xff] }
 0x214   : > { %v8890_v50 = vpop.f32.mrf.mxu0  ;;  %v8892_v12 = vpop.f32.mrf.mxu1 }
 0x215   : > { %10092 = vst [vmem:[#allocation34_spill] sm:$0xff] %v8888_v56  ;;  %10093 = vst [vmem:[#allocation35_spill] sm:$0xff] %v8890_v50  ;;  %v8894_v3 = vadd.f32 %v2593_v63, %v2113_v7 }
 0x216   : > { %10094 = vst [vmem:[#allocation74_spill] sm:$0xff] %v8892_v12  ;;  %v1942_v11 = vpop.f32.mrf.mxu0  ;;  %v2599_v62 = vpop.f32.mrf.mxu1 }
 0x217   : > { %10095 = vst [vmem:[#allocation75_spill] sm:$0xff] %v8894_v3  ;;  %v2115_v25 = vadd.f32 %v1942_v11, %v10096_v38  ;;  %v10103_v38 = vld [vmem:[#allocation43_spill] sm:$0xff] }
 0x218   : > { %v1944_v30 = vpop.f32.mrf.mxu0  ;;  %v2601_v44 = vpop.f32.mrf.mxu1 }
 0x219   : > { %v2116_v42 = vadd.f32 %v1944_v30, %v10097_v57  ;;  %v8898_v53 = vadd.f32 %v2599_v62, %v2115_v25  ;;  %v10104_v25 = vld [vmem:[#allocation44_spill] sm:$0xff] }
 0x21a   : > { %v1946_v33 = vpop.f32.mrf.mxu0  ;;  %v2603_v27 = vpop.f32.mrf.mxu1 }
 0x21b   : > { %10098 = vst [vmem:[#allocation38_spill] sm:$0xff] %v8898_v53  ;;  %v2117_v31 = vadd.f32 %v1946_v33, %v10099_v48  ;;  %v8901_v6 = vadd.f32 %v2601_v44, %v2116_v42  ;;  %v10106_v44 = vld [vmem:[#allocation45_spill] sm:$0xff] }
 0x21c   : > { %v8903_v56 = vpop.f32.mrf.mxu0  ;;  %v8905_v63 = vpop.f32.mrf.mxu1 }
 0x21d   : > { %10100 = vst [vmem:[#allocation39_spill] sm:$0xff] %v8901_v6  ;;  %10101 = vst [vmem:[#allocation40_spill] sm:$0xff] %v8905_v63  ;;  %v8907_v7 = vadd.f32 %v2603_v27, %v2117_v31 }
 0x21e   : > { %v1952_v3 = vpop.f32.mrf.mxu0  ;;  %v2609_v11 = vpop.f32.mrf.mxu1 }
 0x21f   : > { %10102 = vst [vmem:[#allocation76_spill] sm:$0xff] %v8907_v7  ;;  %v2119_v12 = vadd.f32 %v1952_v3, %v10103_v38  ;;  %v10110_v38 = vld [vmem:[#allocation48_spill] sm:$0xff] }
 0x220   : > { %v1954_v50 = vpop.f32.mrf.mxu0  ;;  %v2611_v30 = vpop.f32.mrf.mxu1 }
 0x221   : > { %v2120_v62 = vadd.f32 %v1954_v50, %v10104_v25  ;;  %v8911_v57 = vadd.f32 %v2609_v11, %v2119_v12  ;;  %v7513_v50 = vld [vmem:[%s9980_s3 + $0xf4] ss:$8 sps:$4 sm:$0xff]   ;;  %v10111_v25 = vld [vmem:[#allocation49_spill] sm:$0xff] }
 0x222   : > { %v1956_v53 = vpop.f32.mrf.mxu0  ;;  %v2613_v33 = vpop.f32.mrf.mxu1  ;;  %4297 = vmatprep.subr.bf16.mxu1 %v7513_v50 }
 0x223   : > { %10105 = vst [vmem:[#allocation43_spill] sm:$0xff] %v8911_v57  ;;  %v2121_v42 = vadd.f32 %v1956_v53, %v10106_v44  ;;  %v8914_v48 = vadd.f32 %v2611_v30, %v2120_v62  ;;  %v8936_v57 = vld [vmem:[%s9979_s2] ss:$0 sm:$0xff] }
 0x224   : > { %v8916_v6 = vpop.f32.mrf.mxu0  ;;  %v8918_v27 = vpop.f32.mrf.mxu1 }
 0x225   : > { %10107 = vst [vmem:[#allocation44_spill] sm:$0xff] %v8914_v48  ;;  %10108 = vst [vmem:[#allocation45_spill] sm:$0xff] %v8918_v27  ;;  %v8920_v31 = vadd.f32 %v2613_v33, %v2121_v42 }
 0x226   : > { %v1962_v7 = vpop.f32.mrf.mxu0  ;;  %v2619_v3 = vpop.f32.mrf.mxu1 }
 0x227   : > { %10109 = vst [vmem:[#allocation77_spill] sm:$0xff] %v8920_v31  ;;  %v2123_v63 = vadd.f32 %v1962_v7, %v10110_v38 }
 0x228   : > { %v1964_v12 = vpop.f32.mrf.mxu0  ;;  %v2621_v11 = vpop.f32.mrf.mxu1 }
 0x229   : > { %v2124_v53 = vadd.f32 %v1964_v12, %v10111_v25  ;;  %v8927_v30 = vadd.f32 %v2619_v3, %v2123_v63  ;;  %v2707_v3 = vadd.f32 %v8529_v2, %v8532_v54  ;;  %v10113_v25 = vld [vmem:[#allocation50_spill] sm:$0xff]  ;;  %v2711_v2 = vadd.f32 %v8547_v21, %v8550_v29 }
 0x22a   : > { %v1966_v62 = vpop.f32.mrf.mxu0  ;;  %v2623_v44 = vpop.f32.mrf.mxu1 }
 0x22b   : > { %v8929_v27 = vadd.f32 %v2621_v11, %v2124_v53 }
 0x22c   : > { %v1967_v33 = vpop.f32.mrf.mxu0  ;;  %v2624_v42 = vpop.f32.mrf.mxu1 }
 0x22d   : > { %10112 = vst [vmem:[#allocation48_spill] sm:$0xff] %v8929_v27 }
 0x22e   : > { %v3086_v31 = vpop.f32.mrf.mxu0 }
 0x22f   : > { %v3361_v7 = vadd.f32 %v3086_v31, %v8524_v16 }
 0x230   : > { %v3088_v48 = vpop.f32.mrf.mxu0 }
 0x231   : > { %v3362_v38 = vadd.f32 %v3088_v48, %v8527_v23 }
 0x232   : > { %v3090_v63 = vpop.f32.mrf.mxu0 }
 0x233   : > { %v3595_v50 = vmax.f32 %v3361_v7, %v3362_v38  ;;  %v3363_v53 = vadd.f32 %v3090_v63, %v10113_v25 }
 0x234   : > { %v3092_v12 = vpop.f32.mrf.mxu0 }
 0x235   : > { %v3641_v11 = vadd.f32 %v8936_v57, %v3595_v50  ;;  %v3364_v62 = vadd.f32 %v3092_v12, %v2707_v3 }
 0x236   : > { %v3096_v44 = vpop.f32.mrf.mxu0 }
 0x237   : > { %v3680_v16 = vmax.f32 %v3641_v11, 0.0  ;;  %v3596_v31 = vmax.f32 %v3363_v53, %v3364_v62  ;;  %v3365_v33 = vadd.f32 %v3096_v44, %v8542_v19  ;;  %v2715_v44 = vadd.f32 %v8571_v47, %v8574_v45 }
 0x238   : > { %v3098_v23 = vpop.f32.mrf.mxu0 }
 0x239   : > { %3719 = vst [vmem:[#allocation3] sm:$0xff] %v3680_v16  ;;  %v3642_v48 = vadd.f32 %v8936_v57, %v3596_v31  ;;  %v3366_v42 = vadd.f32 %v3098_v23, %v8545_v51  ;;  %v10114_v51 = vld [vmem:[#allocation51_spill] sm:$0xff] }
 0x23a   : > { %v3100_v27 = vpop.f32.mrf.mxu0 }
 0x23b   : > { %v3681_v54 = vmax.f32 %v3642_v48, 0.0  ;;  %v3597_v7 = vmax.f32 %v3365_v33, %v3366_v42  ;;  %v3367_v3 = vadd.f32 %v3100_v27, %v8552_v28  ;;  %v10115_v42 = vld [vmem:[#allocation52_spill] sm:$0xff] }
 0x23c   : > { %v3102_v38 = vpop.f32.mrf.mxu0 }
 0x23d   : > { %3720 = vst [vmem:[#allocation3 + $0x8] sm:$0xff] %v3681_v54  ;;  %v3643_v63 = vadd.f32 %v8936_v57, %v3597_v7  ;;  %v3368_v50 = vadd.f32 %v3102_v38, %v2711_v2 }
 0x23e   : > { %v3106_v12 = vpop.f32.mrf.mxu0 }
 0x23f   : > { %v3682_v11 = vmax.f32 %v3643_v63, 0.0  ;;  %v3598_v25 = vmax.f32 %v3367_v3, %v3368_v50  ;;  %v3369_v62 = vadd.f32 %v3106_v12, %v10114_v51  ;;  %v2719_v12 = vadd.f32 %v8589_v1, %v8592_v34 }
 0x240   : > { %v3108_v53 = vpop.f32.mrf.mxu0 }
 0x241   : > { %3721 = vst [vmem:[#allocation3 + $0x10] sm:$0xff] %v3682_v11  ;;  %v3644_v19 = vadd.f32 %v8936_v57, %v3598_v25  ;;  %v3370_v21 = vadd.f32 %v3108_v53, %v8569_v41 }
 0x242   : > { %v3110_v29 = vpop.f32.mrf.mxu0 }
 0x243   : > { %v3683_v16 = vmax.f32 %v3644_v19, 0.0  ;;  %v3599_v31 = vmax.f32 %v3369_v62, %v3370_v21  ;;  %v3371_v2 = vadd.f32 %v3110_v29, %v10115_v42  ;;  %v10116_v29 = vld [vmem:[#allocation53_spill] sm:$0xff] }
 0x244   : > { %v3758_v23 = vld [vmem:[#allocation3] ss:$2 sm:$0xff]  ;;  %v3798_v28 = vld [vmem:[#allocation3 + $0x1] ss:$2 sm:$0xff]  ;;  %v3112_v27 = vpop.f32.mrf.mxu0 }
 0x245   : > { %v3837_v48 = vmax.f32 %v3758_v23, %v3798_v28  ;;  %3722 = vst [vmem:[#allocation3 + $0x18] sm:$0xff] %v3683_v16  ;;  %v3645_v33 = vadd.f32 %v8936_v57, %v3599_v31  ;;  %v3372_v54 = vadd.f32 %v3112_v27, %v2715_v44  ;;  %v7516_v23 = vld [vmem:[%s9980_s3 + $0xe4] ss:$8 sps:$4 sm:$0xff]   ;;  %v7531_v27 = vld [vmem:[%s9980_s3 + $0x274] ss:$8 sps:$4 sm:$0xff]  }
 0x246   : > { %v3116_v7 = vpop.f32.mrf.mxu0  ;;  %5410 = vmatprep.subr.bf16.mxu0 %v7531_v27  ;;  %v10119_v27 = vld [vmem:[#allocation56_spill] sm:$0xff] }
 0x247   : > { %3857 = vst [vmem:[#allocation4] sm:$0xff] %v3837_v48  ;;  %v3684_v38 = vmax.f32 %v3645_v33, 0.0  ;;  %v3600_v41 = vmax.f32 %v3371_v2, %v3372_v54  ;;  %v3373_v45 = vadd.f32 %v3116_v7, %v8584_v55  ;;  %v7511_v55 = vld [vmem:[%s9980_s3 + $0xf0] ss:$8 sps:$4 sm:$0xff]   ;;  %v2723_v7 = vadd.f32 %v8607_v14, %v8610_v20 }
 0x248   : > { %v3118_v63 = vpop.f32.mrf.mxu0  ;;  %v7517_v14 = vld [vmem:[%s9980_s3 + $0xd0] ss:$8 sps:$4 sm:$0xff]  }
 0x249   : > { %3723 = vst [vmem:[#allocation3 + $0x20] sm:$0xff] %v3684_v38  ;;  %v3646_v47 = vadd.f32 %v8936_v57, %v3600_v41  ;;  %v3374_v3 = vadd.f32 %v3118_v63, %v8587_v5 }
 0x24a   : > { %v3120_v50 = vpop.f32.mrf.mxu0 }
 0x24b   : > { %v3685_v11 = vmax.f32 %v3646_v47, 0.0  ;;  %v3601_v25 = vmax.f32 %v3373_v45, %v3374_v3  ;;  %v3375_v44 = vadd.f32 %v3120_v50, %v10116_v29  ;;  %v7520_v29 = vld [vmem:[%s9980_s3 + $0xc0] ss:$8 sps:$4 sm:$0xff]  }
 0x24c   : > { %v3760_v53 = vld [vmem:[#allocation3 + $0x10] ss:$2 sm:$0xff]  ;;  %v3800_v19 = vld [vmem:[#allocation3 + $0x11] ss:$2 sm:$0xff]  ;;  %v3122_v51 = vpop.f32.mrf.mxu0 }
 0x24d   : > { %v3838_v62 = vmax.f32 %v3760_v53, %v3800_v19  ;;  %3724 = vst [vmem:[#allocation3 + $0x28] sm:$0xff] %v3685_v11  ;;  %v3647_v21 = vadd.f32 %v8936_v57, %v3601_v25  ;;  %v3376_v16 = vadd.f32 %v3122_v51, %v2719_v12  ;;  %v7522_v53 = vld [vmem:[%s9980_s3 + $0xc4] ss:$8 sps:$4 sm:$0xff]  }
 0x24e   : > { %v3126_v31 = vpop.f32.mrf.mxu0 }
 0x24f   : > { %3858 = vst [vmem:[#allocation4 + $0x8] sm:$0xff] %v3838_v62  ;;  %v3686_v5 = vmax.f32 %v3647_v21, 0.0  ;;  %v3602_v1 = vmax.f32 %v3375_v44, %v3376_v16  ;;  %v3896_v34 = vpack.c.bf16 %v3838_v62, %v3837_v48  ;;  %v3377_v42 = vadd.f32 %v3126_v31, %v8602_v37  ;;  %v7514_v48 = vld [vmem:[%s9980_s3 + $0xe0] ss:$8 sps:$4 sm:$0xff]   ;;  %v7519_v37 = vld [vmem:[%s9980_s3 + $0xd4] ss:$8 sps:$4 sm:$0xff]  }
 0x250   : > { %v3128_v28 = vpop.f32.mrf.mxu0  ;;  %v10117_v44 = vld [vmem:[#allocation55_spill] sm:$0xff]  ;;  %v10118_v16 = vld [vmem:[#allocation54_spill] sm:$0xff] }
 0x251   : > { %3725 = vst [vmem:[#allocation3 + $0x30] sm:$0xff] %v3686_v5  ;;  %v3648_v33 = vadd.f32 %v8936_v57, %v3602_v1  ;;  %v3378_v2 = vadd.f32 %v3128_v28, %v8605_v22  ;;  %4035 = vmatmul.mubr.bf16.vlgmr.msra.gmra.mxu1 %v3896_v34  ;;  %v2727_v31 = vadd.f32 %v10118_v16, %v10117_v44  ;;  %v7525_v1 = vld [vmem:[%s9980_s3 + $0xb4] ss:$8 sps:$4 sm:$0xff]  }
 0x252   : > { %v3130_v54 = vpop.f32.mrf.mxu0  ;;  %4044 = vmatprep.mubr.bf16.mxu1 %v10007_v32  ;;  %4298 = vmatpush1.bf16.msra.mxu1 %v7511_v55  ;;  %v7540_v16 = vld [vmem:[%s9980_s3 + $0x254] ss:$8 sps:$4 sm:$0xff]  }
 0x253   : > { %v3687_v38 = vmax.f32 %v3648_v33, 0.0  ;;  %v3603_v41 = vmax.f32 %v3377_v42, %v3378_v2  ;;  %4299 = vmatprep.subr.bf16.mxu1 %v7516_v23  ;;  %v3379_v50 = vadd.f32 %v3130_v54, %v8612_v60 }
 0x254   : > { %v3762_v22 = vld [vmem:[#allocation3 + $0x20] ss:$2 sm:$0xff]  ;;  %v3802_v63 = vld [vmem:[#allocation3 + $0x21] ss:$2 sm:$0xff]  ;;  %v3132_v47 = vpop.f32.mrf.mxu0 }
 0x255   : > { %v3839_v45 = vmax.f32 %v3762_v22, %v3802_v63  ;;  %3726 = vst [vmem:[#allocation3 + $0x38] sm:$0xff] %v3687_v38  ;;  %v3649_v3 = vadd.f32 %v8936_v57, %v3603_v41  ;;  %v3380_v12 = vadd.f32 %v3132_v47, %v2723_v7  ;;  %v7528_v47 = vld [vmem:[%s9980_s3 + $0xa4] ss:$8 sps:$4 sm:$0xff]  }
 0x256   : > { %v3136_v11 = vpop.f32.mrf.mxu0  ;;  %4300 = vmatpush1.bf16.msra.mxu1 %v7514_v48  ;;  %v4542_v54 = vld [vmem:[#allocation4 + $0x2] sm:$0xff] }
 0x257   : > { %3859 = vst [vmem:[#allocation4 + $0x10] sm:$0xff] %v3839_v45  ;;  %v3688_v20 = vmax.f32 %v3649_v3, 0.0  ;;  %v3604_v25 = vmax.f32 %v3379_v50, %v3380_v12  ;;  %4301 = vmatprep.subr.bf16.mxu1 %v7519_v37  ;;  %v3381_v60 = vadd.f32 %v3136_v11, %v8620_v8  ;;  %v7523_v37 = vld [vmem:[%s9980_s3 + $0xb0] ss:$8 sps:$4 sm:$0xff]  }
 0x258   : > { %v3138_v19 = vpop.f32.mrf.mxu0  ;;  %v7529_v3 = vld [vmem:[%s9980_s3 + $0x270] ss:$8 sps:$4 sm:$0xff]  }
 0x259   : > { %3727 = vst [vmem:[#allocation3 + $0x40] sm:$0xff] %v3688_v20  ;;  %v3650_v51 = vadd.f32 %v8936_v57, %v3604_v25  ;;  %v3382_v62 = vadd.f32 %v3138_v19, %v8623_v4  ;;  %v2731_v20 = vadd.f32 %v8667_v26, %v8676_v52  ;;  %v7534_v26 = vld [vmem:[%s9980_s3 + $0x94] ss:$8 sps:$4 sm:$0xff]  }
 0x25a   : > { %v3140_v21 = vpop.f32.mrf.mxu0  ;;  %4302 = vmatpush1.bf16.msra.mxu1 %v7517_v14 }
 0x25b   : > { %v3689_v55 = vmax.f32 %v3650_v51, 0.0  ;;  %v3605_v5 = vmax.f32 %v3381_v60, %v3382_v62  ;;  %4303 = vmatprep.subr.bf16.mxu1 %v7522_v53  ;;  %v3383_v33 = vadd.f32 %v3140_v21, %v10119_v27  ;;  %v10120_v21 = vld [vmem:[#allocation57_spill] sm:$0xff] }
 0x25c   : > { %v3764_v34 = vld [vmem:[#allocation3 + $0x30] ss:$2 sm:$0xff]  ;;  %v3804_v8 = vld [vmem:[#allocation3 + $0x31] ss:$2 sm:$0xff]  ;;  %v3142_v23 = vpop.f32.mrf.mxu0 }
 0x25d   : > { %v3840_v4 = vmax.f32 %v3764_v34, %v3804_v8  ;;  %3728 = vst [vmem:[#allocation3 + $0x48] sm:$0xff] %v3689_v55  ;;  %v3651_v28 = vadd.f32 %v8936_v57, %v3605_v5  ;;  %v3384_v42 = vadd.f32 %v3142_v23, %v2727_v31  ;;  %v7538_v8 = vld [vmem:[%s9980_s3 + $0x250] ss:$8 sps:$4 sm:$0xff]   ;;  %v7546_v23 = vld [vmem:[%s9980_s3 + $0x84] ss:$8 sps:$4 sm:$0xff]  }
 0x25e   : > { %v3146_v2 = vpop.f32.mrf.mxu0  ;;  %v4543_v48 = vld [vmem:[#allocation4 + $0xa] sm:$0xff]  ;;  %4304 = vmatpush1.bf16.msra.mxu1 %v7520_v29 }
 0x25f   : > { %3860 = vst [vmem:[#allocation4 + $0x18] sm:$0xff] %v3840_v4  ;;  %v3690_v7 = vmax.f32 %v3651_v28, 0.0  ;;  %v3606_v38 = vmax.f32 %v3383_v33, %v3384_v42  ;;  %v4561_v41 = vpack.c.bf16 %v4543_v48, %v4542_v54  ;;  %4305 = vmatprep.subr.bf16.mxu1 %v7525_v1  ;;  %v3897_v63 = vpack.c.bf16 %v3840_v4, %v3839_v45  ;;  %v7537_v45 = vld [vmem:[%s9980_s3 + $0x264] ss:$8 sps:$4 sm:$0xff]   ;;  %v7532_v1 = vld [vmem:[%s9980_s3 + $0x90] ss:$8 sps:$4 sm:$0xff]  }
 0x260   : > { %v3148_v22 = vpop.f32.mrf.mxu0  ;;  %v3385_v12 = vadd.f32 %v3146_v2, %v8656_v58  ;;  %v7535_v58 = vld [vmem:[%s9980_s3 + $0x260] ss:$8 sps:$4 sm:$0xff]   ;;  %v7543_v33 = vld [vmem:[%s9980_s3 + $0x244] ss:$8 sps:$4 sm:$0xff]   ;;  %v2735_v2 = vadd.f32 %v8709_v10, %v8718_v18  ;;  %v7555_v10 = vld [vmem:[%s9980_s3 + $0x1f4] ss:$8 sps:$4 sm:$0xff]  }
 0x261   : > { %3729 = vst [vmem:[#allocation3 + $0x50] sm:$0xff] %v3690_v7  ;;  %v3652_v50 = vadd.f32 %v8936_v57, %v3606_v38  ;;  %v3386_v11 = vadd.f32 %v3148_v22, %v8659_v43  ;;  %4701 = vmatmul.mubr.bf16.vlgmr.msra.gmra.mxu0 %v4561_v41  ;;  %4045 = vmatmul.mubr.bf16.gmra.mxu1 %v3897_v63  ;;  %v7526_v43 = vld [vmem:[%s9980_s3 + $0xa0] ss:$8 sps:$4 sm:$0xff]   ;;  %v10121_v22 = vld [vmem:[#allocation58_spill] sm:$0xff] }
 0x262   : > { %v3150_v14 = vpop.f32.mrf.mxu0  ;;  %4710 = vmatprep.mubr.bf16.mxu0 %v10007_v32  ;;  %4054 = vmatprep.mubr.bf16.mxu1 %v10007_v32  ;;  %v7541_v7 = vld [vmem:[%s9980_s3 + $0x240] ss:$8 sps:$4 sm:$0xff]  }
 0x263   : > { %v3691_v25 = vmax.f32 %v3652_v50, 0.0  ;;  %v3607_v53 = vmax.f32 %v3385_v12, %v3386_v11  ;;  %4306 = vmatpush1.bf16.msra.mxu1 %v7523_v37  ;;  %5411 = vmatpush1.bf16.msra.mxu0 %v7529_v3  ;;  %v3387_v29 = vadd.f32 %v3150_v14, %v10120_v21  ;;  %v7549_v3 = vld [vmem:[%s9980_s3 + $0x234] ss:$8 sps:$4 sm:$0xff]  }
 0x264   : > { %v3766_v19 = vld [vmem:[#allocation3 + $0x40] ss:$2 sm:$0xff]  ;;  %v3806_v51 = vld [vmem:[#allocation3 + $0x41] ss:$2 sm:$0xff]  ;;  %v3152_v60 = vpop.f32.mrf.mxu0  ;;  %4307 = vmatprep.subr.bf16.mxu1 %v7528_v47  ;;  %5412 = vmatprep.subr.bf16.mxu0 %v7537_v45 }
 0x265   : > { %v9033_v52 = vmax.f32 %v3766_v19, %v3806_v51  ;;  %3730 = vst [vmem:[#allocation3 + $0x58] sm:$0xff] %v3691_v25  ;;  %v3653_v62 = vadd.f32 %v8936_v57, %v3607_v53  ;;  %v3388_v44 = vadd.f32 %v3152_v60, %v2731_v20  ;;  %v7552_v60 = vld [vmem:[%s9980_s3 + $0x224] ss:$8 sps:$4 sm:$0xff]  }
 0x266   : > { %v3156_v31 = vpop.f32.mrf.mxu0  ;;  %v4544_v12 = vld [vmem:[#allocation4 + $0x12] sm:$0xff] }
 0x267   : > { %3861 = vst [vmem:[#allocation4 + $0x20] sm:$0xff] %v9033_v52  ;;  %v3692_v55 = vmax.f32 %v3653_v62, 0.0  ;;  %v3608_v5 = vmax.f32 %v3387_v29, %v3388_v44  ;;  %4308 = vmatpush1.bf16.msra.mxu1 %v7526_v43  ;;  %5413 = vmatpush1.bf16.msra.mxu0 %v7535_v58  ;;  %v3389_v28 = vadd.f32 %v3156_v31, %v8698_v9  ;;  %v7544_v9 = vld [vmem:[%s9980_s3 + $0x80] ss:$8 sps:$4 sm:$0xff]   ;;  %v7547_v43 = vld [vmem:[%s9980_s3 + $0x230] ss:$8 sps:$4 sm:$0xff]  }
 0x268   : > { %v3158_v34 = vpop.f32.mrf.mxu0  ;;  %4309 = vmatprep.subr.bf16.mxu1 %v7534_v26  ;;  %5414 = vmatprep.subr.bf16.mxu0 %v7540_v16  ;;  %v7550_v44 = vld [vmem:[%s9980_s3 + $0x220] ss:$8 sps:$4 sm:$0xff]  }
 0x269   : > { %3731 = vst [vmem:[#allocation3 + $0x60] sm:$0xff] %v3692_v55  ;;  %v3654_v4 = vadd.f32 %v8936_v57, %v3608_v5  ;;  %v3390_v27 = vadd.f32 %v3158_v34, %v8701_v13  ;;  %v10122_v55 = vld [vmem:[#allocation59_spill] sm:$0xff] }
 0x26a   : > { %v3160_v42 = vpop.f32.mrf.mxu0 }
 0x26b   : > { %v3693_v54 = vmax.f32 %v3654_v4, 0.0  ;;  %v3609_v48 = vmax.f32 %v3389_v28, %v3390_v27  ;;  %4310 = vmatpush1.bf16.msra.mxu1 %v7532_v1  ;;  %5415 = vmatpush1.bf16.msra.mxu0 %v7538_v8  ;;  %v3391_v63 = vadd.f32 %v3160_v42, %v10121_v22  ;;  %v7556_v4 = vld [vmem:[%s9980_s3 + $0x210] ss:$8 sps:$4 sm:$0xff]   ;;  %v7561_v42 = vld [vmem:[%s9980_s3 + $0x204] ss:$8 sps:$4 sm:$0xff]  }
 0x26c   : > { %v3768_v13 = vld [vmem:[#allocation3 + $0x50] ss:$2 sm:$0xff]  ;;  %v3808_v38 = vld [vmem:[#allocation3 + $0x51] ss:$2 sm:$0xff]  ;;  %v3162_v41 = vpop.f32.mrf.mxu0  ;;  %4311 = vmatprep.subr.bf16.mxu1 %v7546_v23  ;;  %5416 = vmatprep.subr.bf16.mxu0 %v7543_v33 }
 0x26d   : > { %v3842_v18 = vmax.f32 %v3768_v13, %v3808_v38  ;;  %3732 = vst [vmem:[#allocation3 + $0x68] sm:$0xff] %v3693_v54  ;;  %v3655_v37 = vadd.f32 %v8936_v57, %v3609_v48  ;;  %v3392_v47 = vadd.f32 %v3162_v41, %v2735_v2  ;;  %v2743_v54 = vadd.f32 %v8772_v59, %v8778_v35 }
 0x26e   : > { %v3166_v50 = vpop.f32.mrf.mxu0  ;;  %v4545_v11 = vld [vmem:[#allocation4 + $0x1a] sm:$0xff] }
 0x26f   : > { %3862 = vst [vmem:[#allocation4 + $0x28] sm:$0xff] %v3842_v18  ;;  %v3694_v45 = vmax.f32 %v3655_v37, 0.0  ;;  %v3610_v14 = vmax.f32 %v3391_v63, %v3392_v47  ;;  %v4562_v20 = vpack.c.bf16 %v4545_v11, %v4544_v12  ;;  %4312 = vmatpush1.bf16.msra.mxu1 %v7544_v9  ;;  %v3898_v53 = vpack.c.bf16 %v3842_v18, %v9033_v52 }
 0x270   : > { %v3168_v25 = vpop.f32.mrf.mxu0  ;;  %5417 = vmatpush1.bf16.msra.mxu0 %v7541_v7  ;;  %5039 = vmatprep.subr.bf16.mxu1 %v7555_v10  ;;  %v3393_v19 = vadd.f32 %v3166_v50, %v8734_v49  ;;  %v2739_v52 = vadd.f32 %v8742_v40, %v8748_v61  ;;  %v7558_v40 = vld [vmem:[%s9980_s3 + $0x214] ss:$8 sps:$4 sm:$0xff]  }
 0x271   : > { %3733 = vst [vmem:[#allocation3 + $0x70] sm:$0xff] %v3694_v45  ;;  %v3656_v58 = vadd.f32 %v8936_v57, %v3610_v14  ;;  %v3394_v51 = vadd.f32 %v3168_v25, %v8737_v0  ;;  %4711 = vmatmul.mubr.bf16.gmra.mxu0 %v4562_v20  ;;  %5418 = vmatprep.subr.bf16.mxu0 %v7549_v3  ;;  %v10123_v14 = vld [vmem:[#allocation61_spill] sm:$0xff]  ;;  %v10124_v20 = vld [vmem:[#allocation60_spill] sm:$0xff] }
 0x272   : > { %v3170_v26 = vpop.f32.mrf.mxu0  ;;  %4055 = vmatmul.mubr.bf16.gmra.mxu1 %v3898_v53  ;;  %4720 = vmatprep.mubr.bf16.mxu0 %v10007_v32  ;;  %v2747_v25 = vadd.f32 %v10124_v20, %v10123_v14  ;;  %v10137_v14 = vld [vmem:[#allocation22_spill] sm:$0xff] }
 0x273   : > { %v3695_v62 = vmax.f32 %v3656_v58, 0.0  ;;  %v3611_v21 = vmax.f32 %v3393_v19, %v3394_v51  ;;  %4064 = vmatprep.mubr.bf16.mxu1 %v10007_v32  ;;  %v3395_v5 = vadd.f32 %v3170_v26, %v10122_v55 }
 0x274   : > { %v3770_v49 = vld [vmem:[#allocation3 + $0x60] ss:$2 sm:$0xff]  ;;  %v3810_v29 = vld [vmem:[#allocation3 + $0x61] ss:$2 sm:$0xff]  ;;  %v3172_v0 = vpop.f32.mrf.mxu0  ;;  %5419 = vmatpush1.bf16.msra.mxu0 %v7547_v43 }
 0x275   : > { %v3843_v16 = vmax.f32 %v3770_v49, %v3810_v29  ;;  %3734 = vst [vmem:[#allocation3 + $0x78] sm:$0xff] %v3695_v62  ;;  %v3657_v31 = vadd.f32 %v8936_v57, %v3611_v21  ;;  %v3396_v1 = vadd.f32 %v3172_v0, %v2739_v52  ;;  %5420 = vmatprep.subr.bf16.mxu0 %v7552_v60 }
 0x276   : > { %v3176_v61 = vpop.f32.mrf.mxu0  ;;  %v4546_v59 = vld [vmem:[#allocation4 + $0x22] sm:$0xff] }
 0x277   : > { %3863 = vst [vmem:[#allocation4 + $0x30] sm:$0xff] %v3843_v16  ;;  %v3696_v34 = vmax.f32 %v3657_v31, 0.0  ;;  %v3612_v8 = vmax.f32 %v3395_v5, %v3396_v1  ;;  %v3397_v27 = vadd.f32 %v3176_v61, %v8764_v36  ;;  %v7559_v36 = vld [vmem:[%s9980_s3 + $0x200] ss:$8 sps:$4 sm:$0xff]   ;;  %v10128_v1 = vld [vmem:[#allocation63_spill] sm:$0xff] }
 0x278   : > { %v3178_v23 = vpop.f32.mrf.mxu0  ;;  %5421 = vmatpush1.bf16.msra.mxu0 %v7550_v44  ;;  %v10127_v5 = vld [vmem:[#allocation13_spill] sm:$0xff] }
 0x279   : > { %3735 = vst [vmem:[#allocation3 + $0x80] sm:$0xff] %v3696_v34  ;;  %v3658_v28 = vadd.f32 %v8936_v57, %v3612_v8  ;;  %v3398_v33 = vadd.f32 %v3178_v23, %v8767_v39  ;;  %5422 = vmatprep.subr.bf16.mxu0 %v7558_v40  ;;  %v2751_v40 = vadd.f32 %v10128_v1, %v10127_v5  ;;  %v10129_v8 = vld [vmem:[#allocation17_spill] sm:$0xff]  ;;  %v10130_v23 = vld [vmem:[#allocation18_spill] sm:$0xff]  ;;  %v10142_v5 = vld [vmem:[#allocation68_spill] sm:$0xff] }
 0x27a   : > { %v3180_v2 = vpop.f32.mrf.mxu0 }
 0x27b   : > { %v3697_v48 = vmax.f32 %v3658_v28, 0.0  ;;  %v3613_v7 = vmax.f32 %v3397_v27, %v3398_v33  ;;  %v3399_v10 = vadd.f32 %v3180_v2, %v8780_v46 }
 0x27c   : > { %v3772_v9 = vld [vmem:[#allocation3 + $0x70] ss:$2 sm:$0xff]  ;;  %v3812_v13 = vld [vmem:[#allocation3 + $0x71] ss:$2 sm:$0xff]  ;;  %v3182_v38 = vpop.f32.mrf.mxu0  ;;  %5423 = vmatpush1.bf16.msra.mxu0 %v7556_v4  ;;  %v1441_v4 = vadd.f32 %v10130_v23, %v10129_v8 }
 0x27d   : > { %v3844_v39 = vmax.f32 %v3772_v9, %v3812_v13  ;;  %3736 = vst [vmem:[#allocation3 + $0x88] sm:$0xff] %v3697_v48  ;;  %v3659_v41 = vadd.f32 %v8936_v57, %v3613_v7  ;;  %v3400_v18 = vadd.f32 %v3182_v38, %v2743_v54  ;;  %5424 = vmatprep.subr.bf16.mxu0 %v7561_v42  ;;  %v10131_v54 = vld [vmem:[#allocation64_spill] sm:$0xff]  ;;  %v10144_v8 = vld [vmem:[#allocation27_spill] sm:$0xff] }
 0x27e   : > { %v3186_v37 = vpop.f32.mrf.mxu0  ;;  %v4547_v35 = vld [vmem:[#allocation4 + $0x2a] sm:$0xff] }
 0x27f   : > { %3864 = vst [vmem:[#allocation4 + $0x38] sm:$0xff] %v3844_v39  ;;  %v3698_v22 = vmax.f32 %v3659_v41, 0.0  ;;  %v3614_v63 = vmax.f32 %v3399_v10, %v3400_v18  ;;  %v4563_v47 = vpack.c.bf16 %v4547_v35, %v4546_v59  ;;  %v3899_v50 = vpack.c.bf16 %v3844_v39, %v3843_v16  ;;  %v10126_v16 = vld [vmem:[#allocation12_spill] sm:$0xff]  ;;  %v10133_v35 = vld [vmem:[#allocation14_spill] sm:$0xff] }
 0x280   : > { %v3188_v3 = vpop.f32.mrf.mxu0  ;;  %5425 = vmatpush1.bf16.msra.mxu0 %v7559_v36  ;;  %v3401_v11 = vadd.f32 %v3186_v37, %v8788_v17  ;;  %v10132_v38 = vld [vmem:[#allocation16_spill] sm:$0xff] }
 0x281   : > { %3737 = vst [vmem:[#allocation3 + $0x90] sm:$0xff] %v3698_v22  ;;  %v3660_v12 = vadd.f32 %v8936_v57, %v3614_v63  ;;  %v3402_v45 = vadd.f32 %v3188_v3, %v8791_v24  ;;  %4721 = vmatmul.mubr.bf16.gmra.mxu0 %v4563_v47  ;;  %4065 = vmatmul.mubr.bf16.gmra.mxu1 %v3899_v50  ;;  %v10125_v24 = vld [vmem:[#allocation62_spill] sm:$0xff]  ;;  %v10134_v63 = vld [vmem:[#allocation15_spill] sm:$0xff]  ;;  %v10135_v50 = vld [vmem:[#allocation65_spill] sm:$0xff] }
 0x282   : > { %v3190_v46 = vpop.f32.mrf.mxu0  ;;  %4730 = vmatprep.mubr.bf16.mxu0 %v10007_v32  ;;  %4074 = vmatprep.mubr.bf16.mxu1 %v10007_v32  ;;  %v2098_v36 = vadd.f32 %v10132_v38, %v1441_v4 }
 0x283   : > { %v3699_v53 = vmax.f32 %v3660_v12, 0.0  ;;  %v3615_v43 = vmax.f32 %v3401_v11, %v3402_v45  ;;  %v3403_v26 = vadd.f32 %v3190_v46, %v10125_v24  ;;  %v10136_v46 = vld [vmem:[#allocation21_spill] sm:$0xff] }
 0x284   : > { %v3774_v58 = vld [vmem:[#allocation3 + $0x80] ss:$2 sm:$0xff]  ;;  %v3814_v19 = vld [vmem:[#allocation3 + $0x81] ss:$2 sm:$0xff]  ;;  %v3192_v51 = vpop.f32.mrf.mxu0  ;;  %v2755_v12 = vadd.f32 %v10135_v50, %v2098_v36  ;;  %v1445_v20 = vadd.f32 %v10137_v14, %v10136_v46 }
 0x285   : > { %v3845_v60 = vmax.f32 %v3774_v58, %v3814_v19  ;;  %3738 = vst [vmem:[#allocation3 + $0x98] sm:$0xff] %v3699_v53  ;;  %v3661_v17 = vadd.f32 %v8936_v57, %v3615_v43  ;;  %v3404_v52 = vadd.f32 %v3192_v51, %v2747_v25  ;;  %v10138_v51 = vld [vmem:[#allocation66_spill] sm:$0xff]  ;;  %v10151_v46 = vld [vmem:[#allocation32_spill] sm:$0xff] }
 0x286   : > { %v3196_v62 = vpop.f32.mrf.mxu0  ;;  %v4548_v9 = vld [vmem:[#allocation4 + $0x32] sm:$0xff] }
 0x287   : > { %3865 = vst [vmem:[#allocation4 + $0x40] sm:$0xff] %v3845_v60  ;;  %v3700_v21 = vmax.f32 %v3661_v17, 0.0  ;;  %v3616_v49 = vmax.f32 %v3403_v26, %v3404_v52  ;;  %v3405_v44 = vadd.f32 %v3196_v62, %v8806_v15  ;;  %v10139_v26 = vld [vmem:[#allocation67_spill] sm:$0xff] }
 0x288   : > { %v3198_v29 = vpop.f32.mrf.mxu0  ;;  %v2102_v52 = vadd.f32 %v10139_v26, %v1445_v20 }
 0x289   : > { %3739 = vst [vmem:[#allocation3 + $0xa0] sm:$0xff] %v3700_v21  ;;  %v3662_v0 = vadd.f32 %v8936_v57, %v3616_v49  ;;  %v3406_v31 = vadd.f32 %v3198_v29, %v10126_v16  ;;  %v10141_v16 = vld [vmem:[#allocation20_spill] sm:$0xff] }
 0x28a   : > { %v3200_v55 = vpop.f32.mrf.mxu0  ;;  %v2759_v1 = vadd.f32 %v10142_v5, %v2102_v52 }
 0x28b   : > { %v3701_v61 = vmax.f32 %v3662_v0, 0.0  ;;  %v3617_v34 = vmax.f32 %v3405_v44, %v3406_v31  ;;  %v3407_v15 = vadd.f32 %v3200_v55, %v10131_v54  ;;  %v10140_v0 = vld [vmem:[#allocation19_spill] sm:$0xff] }
 0x28c   : > { %v3776_v28 = vld [vmem:[#allocation3 + $0x90] ss:$2 sm:$0xff]  ;;  %v3816_v27 = vld [vmem:[#allocation3 + $0x91] ss:$2 sm:$0xff]  ;;  %v3202_v33 = vpop.f32.mrf.mxu0 }
 0x28d   : > { %v3846_v42 = vmax.f32 %v3776_v28, %v3816_v27  ;;  %3740 = vst [vmem:[#allocation3 + $0xa8] sm:$0xff] %v3701_v61  ;;  %v3663_v2 = vadd.f32 %v8936_v57, %v3617_v34  ;;  %v3408_v48 = vadd.f32 %v3202_v33, %v2751_v40  ;;  %v10143_v34 = vld [vmem:[#allocation26_spill] sm:$0xff] }
 0x28e   : > { %v3206_v7 = vpop.f32.mrf.mxu0  ;;  %v4549_v13 = vld [vmem:[#allocation4 + $0x3a] sm:$0xff]  ;;  %v1449_v23 = vadd.f32 %v10144_v8, %v10143_v34  ;;  %v10158_v34 = vld [vmem:[#allocation37_spill] sm:$0xff] }
 0x28f   : > { %3866 = vst [vmem:[#allocation4 + $0x48] sm:$0xff] %v3846_v42  ;;  %v3702_v39 = vmax.f32 %v3663_v2, 0.0  ;;  %v3618_v41 = vmax.f32 %v3407_v15, %v3408_v48  ;;  %v4564_v10 = vpack.c.bf16 %v4549_v13, %v4548_v9  ;;  %v3900_v37 = vpack.c.bf16 %v3846_v42, %v3845_v60  ;;  %v10145_v2 = vld [vmem:[#allocation69_spill] sm:$0xff] }
 0x290   : > { %v3208_v18 = vpop.f32.mrf.mxu0  ;;  %v3409_v22 = vadd.f32 %v3206_v7, %v10133_v35  ;;  %v10146_v13 = vld [vmem:[#allocation25_spill] sm:$0xff] }
 0x291   : > { %3741 = vst [vmem:[#allocation3 + $0xb0] sm:$0xff] %v3702_v39  ;;  %v3664_v59 = vadd.f32 %v8936_v57, %v3618_v41  ;;  %v3410_v47 = vadd.f32 %v3208_v18, %v10134_v63  ;;  %4731 = vmatmul.mubr.bf16.gmra.mxu0 %v4564_v10  ;;  %4075 = vmatmul.mubr.bf16.gmra.mxu1 %v3900_v37 }
 0x292   : > { %v3210_v3 = vpop.f32.mrf.mxu0  ;;  %4740 = vmatprep.mubr.bf16.mxu0 %v10007_v32  ;;  %4084 = vmatprep.mubr.bf16.mxu1 %v10007_v32  ;;  %v2106_v38 = vadd.f32 %v10146_v13, %v1449_v23 }
 0x293   : > { %v3703_v11 = vmax.f32 %v3664_v59, 0.0  ;;  %v3619_v45 = vmax.f32 %v3409_v22, %v3410_v47  ;;  %v3411_v60 = vadd.f32 %v3210_v3, %v10138_v51  ;;  %v10147_v59 = vld [vmem:[#allocation23_spill] sm:$0xff]  ;;  %v10148_v22 = vld [vmem:[#allocation24_spill] sm:$0xff]  ;;  %v10149_v3 = vld [vmem:[#allocation70_spill] sm:$0xff] }
 0x294   : > { %v3778_v25 = vld [vmem:[#allocation3 + $0xa0] ss:$2 sm:$0xff]  ;;  %v3818_v53 = vld [vmem:[#allocation3 + $0xa1] ss:$2 sm:$0xff]  ;;  %v3212_v43 = vpop.f32.mrf.mxu0  ;;  %v2763_v50 = vadd.f32 %v10149_v3, %v2106_v38 }
 0x295   : > { %v3847_v58 = vmax.f32 %v3778_v25, %v3818_v53  ;;  %3742 = vst [vmem:[#allocation3 + $0xb8] sm:$0xff] %v3703_v11  ;;  %v3665_v19 = vadd.f32 %v8936_v57, %v3619_v45  ;;  %v3412_v17 = vadd.f32 %v3212_v43, %v2755_v12  ;;  %v10150_v45 = vld [vmem:[#allocation31_spill] sm:$0xff] }
 0x296   : > { %v3216_v24 = vpop.f32.mrf.mxu0  ;;  %v4550_v7 = vld [vmem:[#allocation4 + $0x42] sm:$0xff]  ;;  %v1453_v14 = vadd.f32 %v10151_v46, %v10150_v45  ;;  %v10165_v45 = vld [vmem:[#allocation42_spill] sm:$0xff] }
 0x297   : > { %3867 = vst [vmem:[#allocation4 + $0x50] sm:$0xff] %v3847_v58  ;;  %v3704_v62 = vmax.f32 %v3665_v19, 0.0  ;;  %v3620_v21 = vmax.f32 %v3411_v60, %v3412_v17  ;;  %v3413_v44 = vadd.f32 %v3216_v24, %v10140_v0  ;;  %v10152_v19 = vld [vmem:[#allocation71_spill] sm:$0xff]  ;;  %v10153_v24 = vld [vmem:[#allocation30_spill] sm:$0xff] }
 0x298   : > { %v3218_v49 = vpop.f32.mrf.mxu0  ;;  %v2110_v26 = vadd.f32 %v10153_v24, %v1453_v14 }
 0x299   : > { %3743 = vst [vmem:[#allocation3 + $0xc0] sm:$0xff] %v3704_v62  ;;  %v3666_v29 = vadd.f32 %v8936_v57, %v3620_v21  ;;  %v3414_v31 = vadd.f32 %v3218_v49, %v10141_v16 }
 0x29a   : > { %v3220_v55 = vpop.f32.mrf.mxu0 }
 0x29b   : > { %v3705_v40 = vmax.f32 %v3666_v29, 0.0  ;;  %v3621_v61 = vmax.f32 %v3413_v44, %v3414_v31  ;;  %v3415_v54 = vadd.f32 %v3220_v55, %v10145_v2  ;;  %v10154_v29 = vld [vmem:[#allocation28_spill] sm:$0xff]  ;;  %v10155_v44 = vld [vmem:[#allocation29_spill] sm:$0xff] }
 0x29c   : > { %v3780_v4 = vld [vmem:[#allocation3 + $0xb0] ss:$2 sm:$0xff]  ;;  %v3820_v28 = vld [vmem:[#allocation3 + $0xb1] ss:$2 sm:$0xff]  ;;  %v3222_v27 = vpop.f32.mrf.mxu0  ;;  %v10156_v55 = vld [vmem:[#allocation72_spill] sm:$0xff] }
 0x29d   : > { %v3848_v33 = vmax.f32 %v3780_v4, %v3820_v28  ;;  %3744 = vst [vmem:[#allocation3 + $0xc8] sm:$0xff] %v3705_v40  ;;  %v3667_v42 = vadd.f32 %v8936_v57, %v3621_v61  ;;  %v3416_v15 = vadd.f32 %v3222_v27, %v2759_v1  ;;  %v2767_v5 = vadd.f32 %v10156_v55, %v2110_v26  ;;  %v10157_v61 = vld [vmem:[#allocation36_spill] sm:$0xff] }
 0x29e   : > { %v3226_v48 = vpop.f32.mrf.mxu0  ;;  %v4551_v9 = vld [vmem:[#allocation4 + $0x4a] sm:$0xff]  ;;  %v1457_v8 = vadd.f32 %v10158_v34, %v10157_v61 }
 0x29f   : > { %3868 = vst [vmem:[#allocation4 + $0x58] sm:$0xff] %v3848_v33  ;;  %v3706_v36 = vmax.f32 %v3667_v42, 0.0  ;;  %v3622_v39 = vmax.f32 %v3415_v54, %v3416_v15  ;;  %v4565_v41 = vpack.c.bf16 %v4551_v9, %v4550_v7  ;;  %v3901_v18 = vpack.c.bf16 %v3848_v33, %v3847_v58  ;;  %v10159_v42 = vld [vmem:[#allocation73_spill] sm:$0xff]  ;;  %v10160_v9 = vld [vmem:[#allocation35_spill] sm:$0xff] }
 0x2a0   : > { %v3228_v10 = vpop.f32.mrf.mxu0  ;;  %v3417_v35 = vadd.f32 %v3226_v48, %v10147_v59  ;;  %v2114_v13 = vadd.f32 %v10160_v9, %v1457_v8 }
 0x2a1   : > { %3745 = vst [vmem:[#allocation3 + $0xd0] sm:$0xff] %v3706_v36  ;;  %v3668_v37 = vadd.f32 %v8936_v57, %v3622_v39  ;;  %v3418_v63 = vadd.f32 %v3228_v10, %v10148_v22  ;;  %4741 = vmatmul.mubr.bf16.gmra.mxu0 %v4565_v41  ;;  %4085 = vmatmul.mubr.bf16.gmra.mxu1 %v3901_v18 }
 0x2a2   : > { %v3230_v47 = vpop.f32.mrf.mxu0  ;;  %4750 = vmatprep.mubr.bf16.mxu0 %v10007_v32  ;;  %4094 = vmatprep.mubr.bf16.mxu1 %v10007_v32 }
 0x2a3   : > { %v3707_v12 = vmax.f32 %v3668_v37, 0.0  ;;  %v3623_v11 = vmax.f32 %v3417_v35, %v3418_v63  ;;  %v3419_v51 = vadd.f32 %v3230_v47, %v10152_v19  ;;  %v10161_v37 = vld [vmem:[#allocation33_spill] sm:$0xff]  ;;  %v10162_v35 = vld [vmem:[#allocation34_spill] sm:$0xff] }
 0x2a4   : > { %v3782_v20 = vld [vmem:[#allocation3 + $0xc0] ss:$2 sm:$0xff]  ;;  %v3822_v25 = vld [vmem:[#allocation3 + $0xc1] ss:$2 sm:$0xff]  ;;  %v3232_v53 = vpop.f32.mrf.mxu0  ;;  %v10163_v47 = vld [vmem:[#allocation74_spill] sm:$0xff] }
 0x2a5   : > { %v3849_v43 = vmax.f32 %v3782_v20, %v3822_v25  ;;  %3746 = vst [vmem:[#allocation3 + $0xd8] sm:$0xff] %v3707_v12  ;;  %v3669_v58 = vadd.f32 %v8936_v57, %v3623_v11  ;;  %v3420_v60 = vadd.f32 %v3232_v53, %v2763_v50  ;;  %v2771_v3 = vadd.f32 %v10163_v47, %v2114_v13  ;;  %v10164_v11 = vld [vmem:[#allocation41_spill] sm:$0xff] }
 0x2a6   : > { %v3236_v17 = vpop.f32.mrf.mxu0  ;;  %v4552_v48 = vld [vmem:[#allocation4 + $0x52] sm:$0xff]  ;;  %v1461_v46 = vadd.f32 %v10165_v45, %v10164_v11 }
 0x2a7   : > { %3869 = vst [vmem:[#allocation4 + $0x60] sm:$0xff] %v3849_v43  ;;  %v3708_v52 = vmax.f32 %v3669_v58, 0.0  ;;  %v3624_v62 = vmax.f32 %v3419_v51, %v3420_v60  ;;  %v3421_v0 = vadd.f32 %v3236_v17, %v10154_v29  ;;  %v10166_v58 = vld [vmem:[#allocation75_spill] sm:$0xff]  ;;  %v10176_v11 = vld [vmem:[#allocation77_spill] sm:$0xff] }
 0x2a8   : > { %v3238_v21 = vpop.f32.mrf.mxu0  ;;  %v2118_v17 = vadd.f32 %v8903_v56, %v1461_v46  ;;  %v10168_v29 = vld [vmem:[#allocation39_spill] sm:$0xff] }
 0x2a9   : > { %3747 = vst [vmem:[#allocation3 + $0xe0] sm:$0xff] %v3708_v52  ;;  %v3670_v49 = vadd.f32 %v8936_v57, %v3624_v62  ;;  %v3422_v16 = vadd.f32 %v3238_v21, %v10155_v44  ;;  %v10167_v21 = vld [vmem:[#allocation38_spill] sm:$0xff] }
 0x2aa   : > { %v3240_v31 = vpop.f32.mrf.mxu0 }
 0x2ab   : > { %v3709_v1 = vmax.f32 %v3670_v49, 0.0  ;;  %v3625_v40 = vmax.f32 %v3421_v0, %v3422_v16  ;;  %v3423_v2 = vadd.f32 %v3240_v31, %v10159_v42  ;;  %v10169_v16 = vld [vmem:[#allocation40_spill] sm:$0xff] }
 0x2ac   : > { %v3784_v23 = vld [vmem:[#allocation3 + $0xd0] ss:$2 sm:$0xff]  ;;  %v3824_v4 = vld [vmem:[#allocation3 + $0xd1] ss:$2 sm:$0xff]  ;;  %v3242_v28 = vpop.f32.mrf.mxu0  ;;  %v2775_v31 = vadd.f32 %v10169_v16, %v2118_v17 }
 0x2ad   : > { %v3850_v27 = vmax.f32 %v3784_v23, %v3824_v4  ;;  %3748 = vst [vmem:[#allocation3 + $0xe8] sm:$0xff] %v3709_v1  ;;  %v3671_v33 = vadd.f32 %v8936_v57, %v3625_v40  ;;  %v3424_v54 = vadd.f32 %v3242_v28, %v2767_v5  ;;  %v10170_v1 = vld [vmem:[#allocation46_spill] sm:$0xff]  ;;  %v10171_v40 = vld [vmem:[#allocation47_spill] sm:$0xff]  ;;  %v10172_v28 = vld [vmem:[#allocation76_spill] sm:$0xff] }
 0x2ae   : > { %v3246_v15 = vpop.f32.mrf.mxu0  ;;  %v4553_v7 = vld [vmem:[#allocation4 + $0x5a] sm:$0xff]  ;;  %v1465_v61 = vadd.f32 %v10171_v40, %v10170_v1 }
 0x2af   : > { %3870 = vst [vmem:[#allocation4 + $0x68] sm:$0xff] %v3850_v27  ;;  %v3710_v38 = vmax.f32 %v3671_v33, 0.0  ;;  %v3626_v36 = vmax.f32 %v3423_v2, %v3424_v54  ;;  %v4566_v39 = vpack.c.bf16 %v4553_v7, %v4552_v48  ;;  %v3902_v10 = vpack.c.bf16 %v3850_v27, %v3849_v43 }
 0x2b0   : > { %v3248_v41 = vpop.f32.mrf.mxu0  ;;  %v3425_v59 = vadd.f32 %v3246_v15, %v10161_v37  ;;  %v2122_v15 = vadd.f32 %v8916_v6, %v1465_v61 }
 0x2b1   : > { %3749 = vst [vmem:[#allocation3 + $0xf0] sm:$0xff] %v3710_v38  ;;  %v3672_v18 = vadd.f32 %v8936_v57, %v3626_v36  ;;  %v3426_v22 = vadd.f32 %v3248_v41, %v10162_v35  ;;  %4751 = vmatmul.mubr.bf16.gmra.mxu0 %v4566_v39  ;;  %4095 = vmatmul.mubr.bf16.gmra.mxu1 %v3902_v10  ;;  %v10173_v39 = vld [vmem:[#allocation43_spill] sm:$0xff]  ;;  %v10174_v10 = vld [vmem:[#allocation44_spill] sm:$0xff] }
 0x2b2   : > { %v3250_v63 = vpop.f32.mrf.mxu0  ;;  %4760 = vmatprep.mubr.bf16.mxu0 %v10007_v32  ;;  %4104 = vmatprep.mubr.bf16.mxu1 %v10007_v32 }
 0x2b3   : > { %v3711_v50 = vmax.f32 %v3672_v18, 0.0  ;;  %v3627_v12 = vmax.f32 %v3425_v59, %v3426_v22  ;;  %v3427_v19 = vadd.f32 %v3250_v63, %v10166_v58  ;;  %v10175_v59 = vld [vmem:[#allocation45_spill] sm:$0xff] }
 0x2b4   : > { %v3786_v14 = vld [vmem:[#allocation3 + $0xe0] ss:$2 sm:$0xff]  ;;  %v3826_v20 = vld [vmem:[#allocation3 + $0xe1] ss:$2 sm:$0xff]  ;;  %v3252_v25 = vpop.f32.mrf.mxu0  ;;  %v2779_v6 = vadd.f32 %v10175_v59, %v2122_v15 }
 0x2b5   : > { %v3851_v53 = vmax.f32 %v3786_v14, %v3826_v20  ;;  %3750 = vst [vmem:[#allocation3 + $0xf8] sm:$0xff] %v3711_v50  ;;  %v3673_v43 = vadd.f32 %v8936_v57, %v3627_v12  ;;  %v3428_v51 = vadd.f32 %v3252_v25, %v2771_v3  ;;  %v4175_v59 = vld [vmem:[#allocation4 + $0x21] sm:$0xff] }
 0x2b6   : > { %v3256_v60 = vpop.f32.mrf.mxu0  ;;  %v4554_v2 = vld [vmem:[#allocation4 + $0x62] sm:$0xff] }
 0x2b7   : > { %3871 = vst [vmem:[#allocation4 + $0x70] sm:$0xff] %v3851_v53  ;;  %v3712_v24 = vmax.f32 %v3673_v43, 0.0  ;;  %v3628_v26 = vmax.f32 %v3427_v19, %v3428_v51  ;;  %v3429_v49 = vadd.f32 %v3256_v60, %v10167_v21  ;;  %v10177_v19 = vld [vmem:[#allocation48_spill] sm:$0xff] }
 0x2b8   : > { %v3258_v52 = vpop.f32.mrf.mxu0 }
 0x2b9   : > { %3751 = vst [vmem:[#allocation3 + $0x100] sm:$0xff] %v3712_v24  ;;  %v3674_v62 = vadd.f32 %v8936_v57, %v3628_v26  ;;  %v3430_v0 = vadd.f32 %v3258_v52, %v10168_v29 }
 0x2ba   : > { %v3260_v44 = vpop.f32.mrf.mxu0 }
 0x2bb   : > { %v3713_v55 = vmax.f32 %v3674_v62, 0.0  ;;  %v3629_v5 = vmax.f32 %v3429_v49, %v3430_v0  ;;  %v3431_v27 = vadd.f32 %v3260_v44, %v10172_v28  ;;  %v7553_v28 = vld [vmem:[%s9980_s3 + $0x1f0] ss:$8 sps:$4 sm:$0xff]  }
 0x2bc   : > { %v3788_v56 = vld [vmem:[#allocation3 + $0xf0] ss:$2 sm:$0xff]  ;;  %v3828_v34 = vld [vmem:[#allocation3 + $0xf1] ss:$2 sm:$0xff]  ;;  %v3262_v8 = vpop.f32.mrf.mxu0 }
 0x2bd   : > { %v3852_v23 = vmax.f32 %v3788_v56, %v3828_v34  ;;  %3752 = vst [vmem:[#allocation3 + $0x108] sm:$0xff] %v3713_v55  ;;  %v3675_v4 = vadd.f32 %v8936_v57, %v3629_v5  ;;  %v3432_v33 = vadd.f32 %v3262_v8, %v2775_v31  ;;  %v4172_v34 = vld [vmem:[#allocation4 + $0x9] sm:$0xff]  ;;  %v4171_v8 = vld [vmem:[#allocation4 + $0x1] sm:$0xff] }
 0x2be   : > { %v3266_v42 = vpop.f32.mrf.mxu0  ;;  %v4555_v54 = vld [vmem:[#allocation4 + $0x6a] sm:$0xff] }
 0x2bf   : > { %3872 = vst [vmem:[#allocation4 + $0x78] sm:$0xff] %v3852_v23  ;;  %v3714_v48 = vmax.f32 %v3675_v4, 0.0  ;;  %v3630_v7 = vmax.f32 %v3431_v27, %v3432_v33  ;;  %v4567_v9 = vpack.c.bf16 %v4555_v54, %v4554_v2  ;;  %v3903_v38 = vpack.c.bf16 %v3852_v23, %v3851_v53  ;;  %v7562_v2 = vld [vmem:[%s9980_s3 + $0x1e0] ss:$8 sps:$4 sm:$0xff]   ;;  %v7567_v54 = vld [vmem:[%s9980_s3 + $0x1d4] ss:$8 sps:$4 sm:$0xff]  }
 0x2c0   : > { %v3268_v13 = vpop.f32.mrf.mxu0  ;;  %v3433_v41 = vadd.f32 %v3266_v42, %v10173_v39  ;;  %v4190_v33 = vpack.c.bf16 %v4172_v34, %v4171_v8  ;;  %v7564_v42 = vld [vmem:[%s9980_s3 + $0x1e4] ss:$8 sps:$4 sm:$0xff]   ;;  %v7568_v39 = vld [vmem:[%s9980_s3 + $0x1c0] ss:$8 sps:$4 sm:$0xff]  }
 0x2c1   : > { %3753 = vst [vmem:[#allocation3 + $0x110] sm:$0xff] %v3714_v48  ;;  %v3676_v36 = vadd.f32 %v8936_v57, %v3630_v7  ;;  %v3434_v18 = vadd.f32 %v3268_v13, %v10174_v10  ;;  %4761 = vmatmul.mubr.bf16.gmra.mxu0 %v4567_v9  ;;  %4105 = vmatmul.mubr.bf16.gmra.mxu1 %v3903_v38  ;;  %v7639_v57 = vld [vmem:[%s9979_s2] ss:$0 sm:$0xff]  ;;  %v4174_v48 = vld [vmem:[#allocation4 + $0x19] sm:$0xff]  ;;  %v4173_v7 = vld [vmem:[#allocation4 + $0x11] sm:$0xff] }
 0x2c2   : > { %v3270_v37 = vpop.f32.mrf.mxu0  ;;  %4770 = vmatprep.mubr.bf16.mxu0 %v10007_v32  ;;  %4114 = vmatprep.mubr.bf16.mxu1 %v10007_v32  ;;  %v4191_v13 = vpack.c.bf16 %v4174_v48, %v4173_v7  ;;  %v7565_v38 = vld [vmem:[%s9980_s3 + $0x1d0] ss:$8 sps:$4 sm:$0xff]   ;;  %v4176_v10 = vld [vmem:[#allocation4 + $0x29] sm:$0xff] }
 0x2c3   : > { %v3715_v35 = vmax.f32 %v3676_v36, 0.0  ;;  %v3631_v22 = vmax.f32 %v3433_v41, %v3434_v18  ;;  %v3435_v45 = vadd.f32 %v3270_v37, %v10176_v11  ;;  %v7570_v36 = vld [vmem:[%s9980_s3 + $0x1c4] ss:$8 sps:$4 sm:$0xff]   ;;  %v7573_v18 = vld [vmem:[%s9980_s3 + $0x1b4] ss:$8 sps:$4 sm:$0xff]  }
 0x2c4   : > { %v3790_v63 = vld [vmem:[#allocation3 + $0x100] ss:$2 sm:$0xff]  ;;  %v3830_v47 = vld [vmem:[#allocation3 + $0x101] ss:$2 sm:$0xff]  ;;  %v3272_v3 = vpop.f32.mrf.mxu0 }
 0x2c5   : > { %v3853_v50 = vmax.f32 %v3790_v63, %v3830_v47  ;;  %3754 = vst [vmem:[#allocation3 + $0x118] sm:$0xff] %v3715_v35  ;;  %v3677_v12 = vadd.f32 %v7639_v57, %v3631_v22  ;;  %v3436_v46 = vadd.f32 %v3272_v3, %v2779_v6  ;;  %v5285_v41 = vld [vmem:[#allocation4 + $0xc] sm:$0xff]  ;;  %v5284_v37 = vld [vmem:[#allocation4 + $0x4] sm:$0xff]  ;;  %v4192_v35 = vpack.c.bf16 %v4176_v10, %v4175_v59  ;;  %v7571_v22 = vld [vmem:[%s9980_s3 + $0x1b0] ss:$8 sps:$4 sm:$0xff]  }
 0x2c6   : > { %v3276_v14 = vpop.f32.mrf.mxu0  ;;  %v4556_v29 = vld [vmem:[#allocation4 + $0x72] sm:$0xff]  ;;  %v5303_v6 = vpack.c.bf16 %v5285_v41, %v5284_v37  ;;  %v5287_v3 = vld [vmem:[#allocation4 + $0x1c] sm:$0xff]  ;;  %v5296_v8 = vld [vmem:[#allocation4 + $0x64] sm:$0xff] }
 0x2c7   : > { %3873 = vst [vmem:[#allocation4 + $0x80] sm:$0xff] %v3853_v50  ;;  %v3716_v20 = vmax.f32 %v3677_v12, 0.0  ;;  %v3632_v25 = vmax.f32 %v3435_v45, %v3436_v46  ;;  %v3437_v58 = vadd.f32 %v3276_v14, %v8927_v30  ;;  %v7576_v63 = vld [vmem:[%s9980_s3 + $0x1a4] ss:$8 sps:$4 sm:$0xff]   ;;  %v7574_v47 = vld [vmem:[%s9980_s3 + $0x1a0] ss:$8 sps:$4 sm:$0xff]  }
 0x2c8   : > { %v3278_v53 = vpop.f32.mrf.mxu0  ;;  %v5286_v12 = vld [vmem:[#allocation4 + $0x14] sm:$0xff] }
 0x2c9   : > { %3755 = vst [vmem:[#allocation3 + $0x120] sm:$0xff] %v3716_v20  ;;  %v3678_v43 = vadd.f32 %v7639_v57, %v3632_v25  ;;  %v3438_v51 = vadd.f32 %v3278_v53, %v10177_v19  ;;  %v4177_v11 = vld [vmem:[#allocation4 + $0x31] sm:$0xff]  ;;  %v5304_v45 = vpack.c.bf16 %v5287_v3, %v5286_v12  ;;  %v4179_v19 = vld [vmem:[#allocation4 + $0x41] sm:$0xff] }
 0x2ca   : > { %v3280_v60 = vpop.f32.mrf.mxu0  ;;  %v7577_v14 = vld [vmem:[%s9980_s3 + $0x190] ss:$8 sps:$4 sm:$0xff]   ;;  %v7582_v20 = vld [vmem:[%s9980_s3 + $0x184] ss:$8 sps:$4 sm:$0xff]   ;;  %v7580_v25 = vld [vmem:[%s9980_s3 + $0x180] ss:$8 sps:$4 sm:$0xff]  }
 0x2cb   : > { %v3717_v17 = vmax.f32 %v3678_v43, 0.0  ;;  %v3633_v24 = vmax.f32 %v3437_v58, %v3438_v51  ;;  %v5289_v53 = vld [vmem:[#allocation4 + $0x2c] sm:$0xff]  ;;  %v5288_v58 = vld [vmem:[#allocation4 + $0x24] sm:$0xff] }
 0x2cc   : > { %v3792_v26 = vld [vmem:[#allocation3 + $0x110] ss:$2 sm:$0xff]  ;;  %v3832_v52 = vld [vmem:[#allocation3 + $0x111] ss:$2 sm:$0xff]  ;;  %v3281_v62 = vpop.f32.mrf.mxu0  ;;  %v4180_v43 = vld [vmem:[#allocation4 + $0x49] sm:$0xff]  ;;  %v5305_v51 = vpack.c.bf16 %v5289_v53, %v5288_v58 }
 0x2cd   : > { %v3854_v21 = vmax.f32 %v3792_v26, %v3832_v52  ;;  %3756 = vst [vmem:[#allocation3 + $0x128] sm:$0xff] %v3717_v17  ;;  %v3679_v49 = vadd.f32 %v7639_v57, %v3633_v24  ;;  %v7579_v57 = vld [vmem:[%s9980_s3 + $0x194] ss:$8 sps:$4 sm:$0xff]   ;;  %v4194_v60 = vpack.c.bf16 %v4180_v43, %v4179_v19  ;;  %v5290_v26 = vld [vmem:[#allocation4 + $0x34] sm:$0xff] }
 0x2ce   : > { %v4557_v0 = vld [vmem:[#allocation4 + $0x7a] sm:$0xff]  ;;  %v4181_v52 = vld [vmem:[#allocation4 + $0x51] sm:$0xff] }
 0x2cf   : > { %3874 = vst [vmem:[#allocation4 + $0x88] sm:$0xff] %v3854_v21  ;;  %v3718_v44 = vmax.f32 %v3679_v49, 0.0  ;;  %v4568_v16 = vpack.c.bf16 %v4557_v0, %v4556_v29  ;;  %v3904_v31 = vpack.c.bf16 %v3854_v21, %v3853_v50  ;;  %v4178_v50 = vld [vmem:[#allocation4 + $0x39] sm:$0xff]  ;;  %v5293_v49 = vld [vmem:[#allocation4 + $0x4c] sm:$0xff]  ;;  %v5292_v0 = vld [vmem:[#allocation4 + $0x44] sm:$0xff] }
 0x2d0   : > { %v4193_v46 = vpack.c.bf16 %v4178_v50, %v4177_v11  ;;  %v5291_v17 = vld [vmem:[#allocation4 + $0x3c] sm:$0xff]  ;;  %v4184_v29 = vld [vmem:[#allocation4 + $0x69] sm:$0xff] }
 0x2d1   : > { %3757 = vst [vmem:[#allocation3 + $0x130] sm:$0xff] %v3718_v44  ;;  %4771 = vmatmul.mubr.bf16.gmra.mxu0 %v4568_v16  ;;  %4115 = vmatmul.mubr.bf16.gmra.mxu1 %v3904_v31  ;;  %v4182_v24 = vld [vmem:[#allocation4 + $0x59] sm:$0xff]  ;;  %v5306_v62 = vpack.c.bf16 %v5291_v17, %v5290_v26  ;;  %v4183_v44 = vld [vmem:[#allocation4 + $0x61] sm:$0xff]  ;;  %v5307_v16 = vpack.c.bf16 %v5293_v49, %v5292_v0  ;;  %v4918_v11 = vld [vmem:[#allocation4 + $0x2b] sm:$0xff] }
 0x2d2   : > { %4124 = vmatprep.mubr.bf16.mxu1 %v10007_v32  ;;  %4780 = vmatprep.mubr.bf16.mxu0 %v10007_v32  ;;  %v4195_v21 = vpack.c.bf16 %v4182_v24, %v4181_v52  ;;  %v4196_v31 = vpack.c.bf16 %v4184_v29, %v4183_v44  ;;  %v4920_v58 = vld [vmem:[#allocation4 + $0x3b] sm:$0xff]  ;;  %v4921_v49 = vld [vmem:[#allocation4 + $0x43] sm:$0xff] }
 0x2d4   : > { %v3794_v30 = vld [vmem:[#allocation3 + $0x120] ss:$2 sm:$0xff]  ;;  %v3834_v55 = vld [vmem:[#allocation3 + $0x121] ss:$2 sm:$0xff] }
 0x2d5   : > { %v3855_v5 = vmax.f32 %v3794_v30, %v3834_v55  ;;  %v5295_v30 = vld [vmem:[#allocation4 + $0x5c] sm:$0xff] }
 0x2d6   : > { %v4558_v23 = vld [vmem:[#allocation4 + $0x82] sm:$0xff]  ;;  %v4186_v55 = vld [vmem:[#allocation4 + $0x79] sm:$0xff] }
 0x2d7   : > { %3875 = vst [vmem:[#allocation4 + $0x90] sm:$0xff] %v3855_v5  ;;  %v3905_v1 = vpack.c.bf16 %v3855_v5, %v3855_v5  ;;  %v5294_v5 = vld [vmem:[#allocation4 + $0x54] sm:$0xff] }
 0x2d8   : > { %v3796_v40 = vld [vmem:[#allocation3 + $0x130] ss:$2 sm:$0xf]  ;;  %v3836_v61 = vld [vmem:[#allocation3 + $0x131] ss:$2 sm:$0xf] }
 0x2d9   : > { %v3856_v56 = vmax.f32 %v3796_v40, %v3836_v61  ;;  %4125 = vmatmul.mubr.bf16.gmra.mxu1 %v3905_v1  ;;  %v4185_v1 = vld [vmem:[#allocation4 + $0x71] sm:$0xff]  ;;  %v5308_v40 = vpack.c.bf16 %v5295_v30, %v5294_v5 }
 0x2da   : > { %4329 = vmatprep.mubr.bf16.mxu1 %v10007_v32  ;;  %v4197_v61 = vpack.c.bf16 %v4186_v55, %v4185_v1  ;;  %v4923_v55 = vld [vmem:[#allocation4 + $0x53] sm:$0xff] }
 0x2db   : > { %3876 = vst [vmem:[#allocation4 + $0x98] sm:$0xf] %v3856_v56  ;;  %v5297_v56 = vld [vmem:[#allocation4 + $0x6c] sm:$0xff] }
 0x2de   : > { %v4559_v4 = vld [vmem:[#allocation4 + $0x8a] sm:$0xff] }
 0x2df   : > { %v4569_v27 = vpack.c.bf16 %v4559_v4, %v4558_v23  ;;  %v4188_v34 = vld [vmem:[#allocation4 + $0x89] sm:$0xff]  ;;  %v4187_v23 = vld [vmem:[#allocation4 + $0x81] sm:$0xff]  ;;  %v5309_v4 = vpack.c.bf16 %v5297_v56, %v5296_v8 }
 0x2e1   : > { %4781 = vmatmul.mubr.bf16.gmra.mxu0 %v4569_v27  ;;  %4330 = vmatmul.mubr.bf16.vlgmr.msra.gmra.mxu1 %v4190_v33  ;;  %v5299_v33 = vld [vmem:[#allocation4 + $0x7c] sm:$0xff] }
 0x2e2   : > { %4790 = vmatprep.mubr.bf16.mxu0 %v10007_v32  ;;  %5040 = vmatpush1.bf16.msra.mxu1 %v7553_v28  ;;  %v4560_v15 = vld [vmem:[#allocation4 + $0x92] sm:$0xff]  ;;  %v4198_v28 = vpack.c.bf16 %v4188_v34, %v4187_v23  ;;  %v4925_v23 = vld [vmem:[#allocation4 + $0x63] sm:$0xff] }
 0x2e3   : > { %4339 = vmatprep.mubr.bf16.mxu1 %v10007_v32  ;;  %5041 = vmatprep.subr.bf16.mxu1 %v7564_v42  ;;  %v4570_v9 = vpack.c.bf16 %v4560_v15, %v4560_v15  ;;  %v4189_v42 = vld [vmem:[#allocation4 + $0x91] sm:$0xff] }
 0x2e4   : > { %v4199_v48 = vpack.c.bf16 %v4189_v42, %v4189_v42  ;;  %v4926_v34 = vld [vmem:[#allocation4 + $0x6b] sm:$0xff] }
 0x2e6   : > { %5042 = vmatpush1.bf16.msra.mxu1 %v7562_v2 }
 0x2e7   : > { %5043 = vmatprep.subr.bf16.mxu1 %v7567_v54  ;;  %v5298_v54 = vld [vmem:[#allocation4 + $0x74] sm:$0xff] }
 0x2e8   : > { %v5310_v15 = vpack.c.bf16 %v5299_v33, %v5298_v54  ;;  %v4928_v54 = vld [vmem:[#allocation4 + $0x7b] sm:$0xff] }
 0x2e9   : > { %4791 = vmatmul.mubr.bf16.gmra.mxu0 %v4570_v9  ;;  %4340 = vmatmul.mubr.bf16.gmra.mxu1 %v4191_v13  ;;  %v5301_v9 = vld [vmem:[#allocation4 + $0x8c] sm:$0xff] }
 0x2ea   : > { %5442 = vmatprep.mubr.bf16.mxu0 %v10007_v32  ;;  %4349 = vmatprep.mubr.bf16.mxu1 %v10007_v32  ;;  %v4914_v13 = vld [vmem:[#allocation4 + $0xb] sm:$0xff] }
 0x2eb   : > { %5044 = vmatpush1.bf16.msra.mxu1 %v7565_v38 }
 0x2ec   : > { %5045 = vmatprep.subr.bf16.mxu1 %v7570_v36  ;;  %v5300_v36 = vld [vmem:[#allocation4 + $0x84] sm:$0xff] }
 0x2ed   : > { %v5311_v10 = vpack.c.bf16 %v5301_v9, %v5300_v36 }
 0x2ef   : > { %5046 = vmatpush1.bf16.msra.mxu1 %v7568_v39  ;;  %v4913_v39 = vld [vmem:[#allocation4 + $0x3] sm:$0xff] }
 0x2f0   : > { %5047 = vmatprep.subr.bf16.mxu1 %v7573_v18  ;;  %v4932_v18 = vpack.c.bf16 %v4914_v13, %v4913_v39 }
 0x2f1   : > { %5443 = vmatmul.mubr.bf16.vlgmr.msra.gmra.mxu0 %v5303_v6  ;;  %4350 = vmatmul.mubr.bf16.gmra.mxu1 %v4192_v35  ;;  %v5302_v6 = vld [vmem:[#allocation4 + $0x94] sm:$0xff] }
 0x2f2   : > { %5452 = vmatprep.mubr.bf16.mxu0 %v10007_v32  ;;  %4359 = vmatprep.mubr.bf16.mxu1 %v10007_v32  ;;  %v4916_v35 = vld [vmem:[#allocation4 + $0x1b] sm:$0xff]  ;;  %v5312_v3 = vpack.c.bf16 %v5302_v6, %v5302_v6 }
 0x2f3   : > { %5048 = vmatpush1.bf16.msra.mxu1 %v7571_v22 }
 0x2f4   : > { %5049 = vmatprep.subr.bf16.mxu1 %v7576_v63  ;;  %v4915_v63 = vld [vmem:[#allocation4 + $0x13] sm:$0xff] }
 0x2f5   : > { %v4933_v50 = vpack.c.bf16 %v4916_v35, %v4915_v63  ;;  %v4929_v35 = vld [vmem:[#allocation4 + $0x83] sm:$0xff] }
 0x2f7   : > { %5050 = vmatpush1.bf16.msra.mxu1 %v7574_v47 }
 0x2f8   : > { %5051 = vmatprep.subr.bf16.mxu1 %v7579_v57 }
 0x2f9   : > { %5453 = vmatmul.mubr.bf16.gmra.mxu0 %v5304_v45  ;;  %4360 = vmatmul.mubr.bf16.gmra.mxu1 %v4193_v46 }
 0x2fa   : > { %5462 = vmatprep.mubr.bf16.mxu0 %v10007_v32  ;;  %4369 = vmatprep.mubr.bf16.mxu1 %v10007_v32 }
 0x2fb   : > { %5052 = vmatpush1.bf16.msra.mxu1 %v7577_v14  ;;  %v4917_v14 = vld [vmem:[#allocation4 + $0x23] sm:$0xff] }
 0x2fc   : > { %5053 = vmatprep.subr.bf16.mxu1 %v7582_v20 }
 0x2ff   : > { %5054 = vmatpush1.bf16.msra.mxu1 %v7580_v25  ;;  %v4934_v25 = vpack.c.bf16 %v4918_v11, %v4917_v14 }
 0x301   : > { %5463 = vmatmul.mubr.bf16.gmra.mxu0 %v5305_v51  ;;  %4370 = vmatmul.mubr.bf16.gmra.mxu1 %v4194_v60  ;;  %v4919_v51 = vld [vmem:[#allocation4 + $0x33] sm:$0xff] }
 0x302   : > { %5472 = vmatprep.mubr.bf16.mxu0 %v10007_v32  ;;  %4379 = vmatprep.mubr.bf16.mxu1 %v10007_v32  ;;  %v4935_v17 = vpack.c.bf16 %v4920_v58, %v4919_v51 }
 0x309   : > { %5473 = vmatmul.mubr.bf16.gmra.mxu0 %v5306_v62  ;;  %4380 = vmatmul.mubr.bf16.gmra.mxu1 %v4195_v21  ;;  %v4922_v62 = vld [vmem:[#allocation4 + $0x4b] sm:$0xff] }
 0x30a   : > { %5482 = vmatprep.mubr.bf16.mxu0 %v10007_v32  ;;  %4389 = vmatprep.mubr.bf16.mxu1 %v10007_v32  ;;  %v4936_v0 = vpack.c.bf16 %v4922_v62, %v4921_v49 }
 0x311   : > { %5483 = vmatmul.mubr.bf16.gmra.mxu0 %v5307_v16  ;;  %4390 = vmatmul.mubr.bf16.gmra.mxu1 %v4196_v31  ;;  %v9265_v27 = vpop.f32.mrf.mxu1  ;;  %v4924_v31 = vld [vmem:[#allocation4 + $0x5b] sm:$0xff] }
 0x312   : > { %5492 = vmatprep.mubr.bf16.mxu0 %v10007_v32  ;;  %4399 = vmatprep.mubr.bf16.mxu1 %v10007_v32  ;;  %v4937_v1 = vpack.c.bf16 %v4924_v31, %v4923_v55  ;;  %v9992_v55 = vmov 0.0  }
 0x313   : > { %v9269_v2 = vpop.f32.mrf.mxu1  ;;  %7191 = vmatprep.subr.bf16.mxu1 %v9992_v55  ;;  %7251 = vmatprep.subr.bf16.mxu0 %v9992_v55 }
 0x315   : > { %v9271_v7 = vpop.f32.mrf.mxu1 }
 0x317   : > { %v9275_v38 = vpop.f32.mrf.mxu1 }
 0x319   : > { %5493 = vmatmul.mubr.bf16.gmra.mxu0 %v5308_v40  ;;  %4400 = vmatmul.mubr.bf16.gmra.mxu1 %v4197_v61 }
 0x31a   : > { %5502 = vmatprep.mubr.bf16.mxu0 %v10007_v32  ;;  %4409 = vmatprep.mubr.bf16.mxu1 %v10007_v32 }
 0x321   : > { %5503 = vmatmul.mubr.bf16.gmra.mxu0 %v5309_v4  ;;  %4410 = vmatmul.mubr.bf16.gmra.mxu1 %v4198_v28  ;;  %v9277_v41 = vpop.f32.mrf.mxu1  ;;  %v9279_v37 = vpop.f32.mrf.mxu0  ;;  %v4938_v28 = vpack.c.bf16 %v4926_v34, %v4925_v23  ;;  %v7583_v34 = vld [vmem:[%s9982_s5 + $0x78] sm:$0xff]  }
 0x322   : > { %5512 = vmatprep.mubr.bf16.mxu0 %v10007_v32  ;;  %4419 = vmatprep.mubr.bf16.mxu1 %v10007_v32 }
 0x323   : > { %v9283_v59 = vpop.f32.mrf.mxu1  ;;  %v9285_v22 = vpop.f32.mrf.mxu0 }
 0x325   : > { %v9287_v47 = vpop.f32.mrf.mxu1  ;;  %v9289_v57 = vpop.f32.mrf.mxu0 }
 0x327   : > { %v9292_v12 = vpop.f32.mrf.mxu1  ;;  %v9294_v45 = vpop.f32.mrf.mxu0 }
 0x329   : > { %5513 = vmatmul.mubr.bf16.gmra.mxu0 %v5310_v15  ;;  %4420 = vmatmul.mubr.bf16.gmra.mxu1 %v4199_v48  ;;  %v4927_v48 = vld [vmem:[#allocation4 + $0x73] sm:$0xff] }
 0x32a   : > { %5522 = vmatprep.mubr.bf16.mxu0 %v10007_v32  ;;  %5071 = vmatprep.mubr.bf16.mxu1 %v10007_v32  ;;  %v4939_v36 = vpack.c.bf16 %v4928_v54, %v4927_v48  ;;  %v7584_v48 = vld [vmem:[%s9982_s5 + $0x70] sm:$0xff]  }
 0x331   : > { %5523 = vmatmul.mubr.bf16.gmra.mxu0 %v5311_v10  ;;  %5072 = vmatmul.mubr.bf16.vlgmr.msra.gmra.mxu1 %v4932_v18  ;;  %v9296_v20 = vpop.f32.mrf.mxu0  ;;  %v4930_v18 = vld [vmem:[#allocation4 + $0x8b] sm:$0xff] }
 0x332   : > { %5532 = vmatprep.mubr.bf16.mxu0 %v10007_v32  ;;  %5081 = vmatprep.mubr.bf16.mxu1 %v10007_v32  ;;  %v4056_v46 = vpop.f32.mrf.mxu1 }
 0x333   : > { %v9299_v43 = vpop.f32.mrf.mxu0  ;;  %v4931_v46 = vld [vmem:[#allocation4 + $0x93] sm:$0xff]  ;;  %7192 = vmatpush3.bf16.msra.mxu1 %v7583_v34 }
 0x334   : > { %v4058_v53 = vpop.f32.mrf.mxu1  ;;  %v4941_v58 = vpack.c.bf16 %v4931_v46, %v4931_v46  ;;  %7193 = vmatprep.subr.bf16.mxu1 %v9992_v55 }
 0x335   : > { %v9303_v60 = vpop.f32.mrf.mxu0 }
 0x336   : > { %v9301_v19 = vpop.f32.mrf.mxu1 }
 0x337   : > { %v9308_v26 = vpop.f32.mrf.mxu0  ;;  %7194 = vmatpush3.bf16.msra.mxu1 %v7584_v48 }
 0x338   : > { %v9305_v24 = vpop.f32.mrf.mxu1  ;;  %7195 = vmatprep.subr.bf16.mxu1 %v9992_v55 }
 0x339   : > { %5533 = vmatmul.mubr.bf16.gmra.mxu0 %v5312_v3  ;;  %5082 = vmatmul.mubr.bf16.gmra.mxu1 %v4933_v50  ;;  %v4940_v3 = vpack.c.bf16 %v4930_v18, %v4929_v35 }
 0x33a   : > { %5091 = vmatprep.mubr.bf16.mxu1 %v10007_v32 }
 0x341   : > { %5092 = vmatmul.mubr.bf16.gmra.mxu1 %v4934_v25  ;;  %v9310_v52 = vpop.f32.mrf.mxu1  ;;  %v4722_v21 = vpop.f32.mrf.mxu0 }
 0x342   : > { %5101 = vmatprep.mubr.bf16.mxu1 %v10007_v32 }
 0x343   : > { %v9312_v29 = vpop.f32.mrf.mxu1  ;;  %v4724_v44 = vpop.f32.mrf.mxu0 }
 0x345   : > { %v9315_v16 = vpop.f32.mrf.mxu1  ;;  %v9317_v30 = vpop.f32.mrf.mxu0 }
 0x347   : > { %v9319_v5 = vpop.f32.mrf.mxu1  ;;  %v9321_v40 = vpop.f32.mrf.mxu0 }
 0x349   : > { %5102 = vmatmul.mubr.bf16.gmra.mxu1 %v4935_v17 }
 0x34a   : > { %5111 = vmatprep.mubr.bf16.mxu1 %v10007_v32 }
 0x351   : > { %5112 = vmatmul.mubr.bf16.gmra.mxu1 %v4936_v0  ;;  %v9323_v61 = vpop.f32.mrf.mxu1  ;;  %v9326_v56 = vpop.f32.mrf.mxu0 }
 0x352   : > { %5121 = vmatprep.mubr.bf16.mxu1 %v10007_v32  ;;  %10178 = vst [vmem:[#allocation49_spill] sm:$0xff] %v9323_v61 }
 0x353   : > { %v9328_v8 = vpop.f32.mrf.mxu1  ;;  %v9330_v4 = vpop.f32.mrf.mxu0 }
 0x354   : > { %10179 = vst [vmem:[#allocation50_spill] sm:$0xff] %v9328_v8 }
 0x355   : > { %v4080_v33 = vpop.f32.mrf.mxu1  ;;  %v9333_v42 = vpop.f32.mrf.mxu0 }
 0x357   : > { %v4082_v15 = vpop.f32.mrf.mxu1  ;;  %v9335_v9 = vpop.f32.mrf.mxu0 }
 0x358   : > { %10180 = vst [vmem:[#allocation51_spill] sm:$0xff] %v9335_v9 }
 0x359   : > { %5122 = vmatmul.mubr.bf16.gmra.mxu1 %v4937_v1 }
 0x35a   : > { %5131 = vmatprep.mubr.bf16.mxu1 %v10007_v32 }
 0x361   : > { %5132 = vmatmul.mubr.bf16.gmra.mxu1 %v4938_v28  ;;  %v9337_v13 = vpop.f32.mrf.mxu1  ;;  %v9339_v39 = vpop.f32.mrf.mxu0 }
 0x362   : > { %5141 = vmatprep.mubr.bf16.mxu1 %v10007_v32  ;;  %10181 = vst [vmem:[#allocation52_spill] sm:$0xff] %v9337_v13  ;;  %10182 = vst [vmem:[#allocation53_spill] sm:$0xff] %v9339_v39 }
 0x363   : > { %v9342_v10 = vpop.f32.mrf.mxu1  ;;  %v9344_v6 = vpop.f32.mrf.mxu0 }
 0x364   : > { %10183 = vst [vmem:[#allocation55_spill] sm:$0xff] %v9342_v10  ;;  %10184 = vst [vmem:[#allocation54_spill] sm:$0xff] %v9344_v6 }
 0x365   : > { %v9346_v63 = vpop.f32.mrf.mxu1  ;;  %v4746_v50 = vpop.f32.mrf.mxu0 }
 0x366   : > { %10185 = vst [vmem:[#allocation56_spill] sm:$0xff] %v9346_v63 }
 0x367   : > { %v9349_v11 = vpop.f32.mrf.mxu1  ;;  %v4748_v14 = vpop.f32.mrf.mxu0 }
 0x368   : > { %10186 = vst [vmem:[#allocation57_spill] sm:$0xff] %v9349_v11 }
 0x369   : > { %5142 = vmatmul.mubr.bf16.gmra.mxu1 %v4939_v36 }
 0x36a   : > { %5151 = vmatprep.mubr.bf16.mxu1 %v10007_v32 }
 0x371   : > { %5152 = vmatmul.mubr.bf16.gmra.mxu1 %v4940_v3  ;;  %v9351_v25 = vpop.f32.mrf.mxu1  ;;  %v9353_v53 = vpop.f32.mrf.mxu0 }
 0x372   : > { %5161 = vmatprep.mubr.bf16.mxu1 %v10007_v32  ;;  %10187 = vst [vmem:[#allocation58_spill] sm:$0xff] %v9351_v25  ;;  %10188 = vst [vmem:[#allocation59_spill] sm:$0xff] %v9353_v53 }
 0x373   : > { %v9355_v51 = vpop.f32.mrf.mxu1  ;;  %v9357_v17 = vpop.f32.mrf.mxu0 }
 0x374   : > { %10189 = vst [vmem:[#allocation61_spill] sm:$0xff] %v9355_v51  ;;  %10190 = vst [vmem:[#allocation60_spill] sm:$0xff] %v9357_v17 }
 0x375   : > { %v9359_v62 = vpop.f32.mrf.mxu1  ;;  %v9361_v21 = vpop.f32.mrf.mxu0 }
 0x376   : > { %10191 = vst [vmem:[#allocation62_spill] sm:$0xff] %v9359_v62  ;;  %10192 = vst [vmem:[#allocation12_spill] sm:$0xff] %v9361_v21  ;;  %v7592_v62 = vld [vmem:[%s9982_s5 + $0xe8] sm:$0xff]   ;;  %v7593_v21 = vld [vmem:[%s9982_s5 + $0xe0] sm:$0xff]  }
 0x377   : > { %v9363_v49 = vpop.f32.mrf.mxu1  ;;  %v9365_v32 = vpop.f32.mrf.mxu0 }
 0x378   : > { %10193 = vst [vmem:[#allocation13_spill] sm:$0xff] %v9363_v49  ;;  %10194 = vst [vmem:[#allocation63_spill] sm:$0xff] %v9365_v32  ;;  %v7588_v49 = vld [vmem:[%s9982_s5 + $0x50] sm:$0xff]  }
 0x379   : > { %5162 = vmatmul.mubr.bf16.gmra.mxu1 %v4941_v58 }
 0x381   : > { %v4106_v0 = vpop.f32.mrf.mxu1  ;;  %v9367_v44 = vpop.f32.mrf.mxu0 }
 0x382   : > { %10195 = vst [vmem:[#allocation17_spill] sm:$0xff] %v9367_v44 }
 0x383   : > { %v4108_v31 = vpop.f32.mrf.mxu1  ;;  %v9371_v1 = vpop.f32.mrf.mxu0 }
 0x384   : > { %10196 = vst [vmem:[#allocation18_spill] sm:$0xff] %v9371_v1  ;;  %v7585_v31 = vld [vmem:[%s9982_s5 + $0x68] sm:$0xff]  }
 0x385   : > { %v9376_v23 = vpop.f32.mrf.mxu1  ;;  %v9378_v28 = vpop.f32.mrf.mxu0  ;;  %7196 = vmatpush3.bf16.msra.mxu1 %v7585_v31 }
 0x386   : > { %10197 = vst [vmem:[#allocation64_spill] sm:$0xff] %v9376_v23  ;;  %10198 = vst [vmem:[#allocation16_spill] sm:$0xff] %v9378_v28  ;;  %7197 = vmatprep.subr.bf16.mxu1 %v9992_v55 }
 0x387   : > { %v9381_v33 = vpop.f32.mrf.mxu1  ;;  %v9383_v54 = vpop.f32.mrf.mxu0 }
 0x388   : > { %10199 = vst [vmem:[#allocation14_spill] sm:$0xff] %v9381_v33  ;;  %10200 = vst [vmem:[#allocation15_spill] sm:$0xff] %v9383_v54 }
 0x391   : > { %v9385_v15 = vpop.f32.mrf.mxu1  ;;  %v4772_v36 = vpop.f32.mrf.mxu0 }
 0x392   : > { %10201 = vst [vmem:[#allocation65_spill] sm:$0xff] %v9385_v15 }
 0x393   : > { %v9390_v18 = vpop.f32.mrf.mxu1  ;;  %v4774_v3 = vpop.f32.mrf.mxu0 }
 0x394   : > { %10202 = vst [vmem:[#allocation21_spill] sm:$0xff] %v9390_v18 }
 0x395   : > { %v9392_v35 = vpop.f32.mrf.mxu1  ;;  %v9399_v14 = vpop.f32.mrf.mxu0 }
 0x396   : > { %10203 = vst [vmem:[#allocation22_spill] sm:$0xff] %v9392_v35  ;;  %10206 = vst [vmem:[#allocation19_spill] sm:$0xff] %v9399_v14  ;;  %v7586_v35 = vld [vmem:[%s9982_s5 + $0x60] sm:$0xff]  }
 0x397   : > { %v9395_v50 = vpop.f32.mrf.mxu1  ;;  %v9406_v34 = vpop.f32.mrf.mxu0  ;;  %7198 = vmatpush3.bf16.msra.mxu1 %v7586_v35  ;;  %v7587_v35 = vld [vmem:[%s9982_s5 + $0x58] sm:$0xff]  }
 0x398   : > { %10204 = vst [vmem:[#allocation66_spill] sm:$0xff] %v9395_v50  ;;  %10208 = vst [vmem:[#allocation68_spill] sm:$0xff] %v9406_v34 }
 0x399   : > { %v9397_v46 = vpop.f32.mrf.mxu1 }
 0x39a   : > { %10205 = vst [vmem:[#allocation67_spill] sm:$0xff] %v9397_v46 }
 0x39b   : > { %v9401_v58 = vpop.f32.mrf.mxu1 }
 0x39c   : > { %10207 = vst [vmem:[#allocation20_spill] sm:$0xff] %v9401_v58 }
 0x39d   : > { %v4130_v0 = vpop.f32.mrf.mxu1 }
 0x39f   : > { %v4131_v48 = vpop.f32.mrf.mxu1 }
 0x3a1   : > { %v9408_v36 = vpop.f32.mrf.mxu0  ;;  %v9410_v3 = vpop.f32.mrf.mxu1 }
 0x3a2   : > { %10209 = vst [vmem:[#allocation26_spill] sm:$0xff] %v9408_v36 }
 0x3a3   : > { %v9413_v46 = vpop.f32.mrf.mxu0  ;;  %v9415_v50 = vpop.f32.mrf.mxu1 }
 0x3a4   : > { %10210 = vst [vmem:[#allocation27_spill] sm:$0xff] %v9413_v46  ;;  %v10214_v46 = vmov 0.0  }
 0x3a5   : > { %v9417_v58 = vpop.f32.mrf.mxu0  ;;  %v9419_v0 = vpop.f32.mrf.mxu1  ;;  %7199 = vmatprep.subr.bf16.mxu1 %v10214_v46  ;;  %7207 = vmatprep.mubr.msk.bf16.mxu1 %vm7704_vm1, %v10214_v46 }
 0x3a6   : > { %10211 = vst [vmem:[#allocation69_spill] sm:$0xff] %v9417_v58  ;;  %7200 = vmatpush3.bf16.msra.mxu1 %v7587_v35  ;;  %7267 = vmatprep.mubr.msk.bf16.mxu0 %vm7704_vm1, %v10214_v46 }
 0x3a7   : > { %v9424_v48 = vpop.f32.mrf.mxu0  ;;  %v9426_v31 = vpop.f32.mrf.mxu1  ;;  %7201 = vmatprep.subr.bf16.mxu1 %v10214_v46 }
 0x3a8   : > { %10212 = vst [vmem:[#allocation25_spill] sm:$0xff] %v9424_v48 }
 0x3a9   : > { %v9428_v36 = vpop.f32.mrf.mxu0  ;;  %v9430_v55 = vpop.f32.mrf.mxu1 }
 0x3aa   : > { %10213 = vst [vmem:[#allocation23_spill] sm:$0xff] %v9428_v36  ;;  %7202 = vmatpush3.bf16.msra.mxu1 %v7588_v49 }
 0x3ab   : > { %v9433_v34 = vpop.f32.mrf.mxu0  ;;  %v9435_v58 = vpop.f32.mrf.mxu1  ;;  %7203 = vmatprep.subr.bf16.mxu1 %v10214_v46 }
 0x3ac   : > { %10215 = vst [vmem:[#allocation24_spill] sm:$0xff] %v9433_v34  ;;  %v7589_v34 = vld [vmem:[%s9982_s5 + $0xf8] sm:$0xff]  }
 0x3ad   : > { %v4796_v18 = vpop.f32.mrf.mxu0  ;;  %v9437_v15 = vpop.f32.mrf.mxu1  ;;  %7252 = vmatpush3.bf16.msra.mxu0 %v7589_v34 }
 0x3ae   : > { %7253 = vmatprep.subr.bf16.mxu0 %v10214_v46 }
 0x3af   : > { %v4797_v14 = vpop.f32.mrf.mxu0  ;;  %v9439_v33 = vpop.f32.mrf.mxu1 }
 0x3b1   : > { %v9441_v48 = vpop.f32.mrf.mxu0  ;;  %v4351_v23 = vpop.f32.mrf.mxu1 }
 0x3b3   : > { %v9446_v36 = vpop.f32.mrf.mxu0  ;;  %v4353_v54 = vpop.f32.mrf.mxu1 }
 0x3b4   : > { %v7590_v54 = vld [vmem:[%s9982_s5 + $0xf0] sm:$0xff]  }
 0x3b5   : > { %v9451_v18 = vpop.f32.mrf.mxu0  ;;  %v9453_v14 = vpop.f32.mrf.mxu1  ;;  %7254 = vmatpush3.bf16.msra.mxu0 %v7590_v54 }
 0x3b6   : > { %7255 = vmatprep.subr.bf16.mxu0 %v10214_v46 }
 0x3b7   : > { %v9457_v23 = vpop.f32.mrf.mxu0  ;;  %v9459_v28 = vpop.f32.mrf.mxu1 }
 0x3b9   : > { %v9464_v1 = vpop.f32.mrf.mxu0  ;;  %v9466_v35 = vpop.f32.mrf.mxu1  ;;  %7256 = vmatpush3.bf16.msra.mxu0 %v7592_v62  ;;  %v7594_v62 = vld [vmem:[%s9982_s5 + $0xd8] sm:$0xff]  }
 0x3ba   : > { %7257 = vmatprep.subr.bf16.mxu0 %v10214_v46 }
 0x3bb   : > { %v9472_v34 = vpop.f32.mrf.mxu0  ;;  %v9474_v44 = vpop.f32.mrf.mxu1 }
 0x3bd   : > { %v9479_v32 = vpop.f32.mrf.mxu0  ;;  %v9481_v51 = vpop.f32.mrf.mxu1  ;;  %7258 = vmatpush3.bf16.msra.mxu0 %v7593_v21  ;;  %v7596_v21 = vld [vmem:[%s9982_s5 + $0xd0] sm:$0xff]  }
 0x3be   : > { %7259 = vmatprep.subr.bf16.mxu0 %v10214_v46 }
 0x3bf   : > { %v9485_v54 = vpop.f32.mrf.mxu0  ;;  %v9487_v25 = vpop.f32.mrf.mxu1 }
 0x3c1   : > { %v5464_v17 = vpop.f32.mrf.mxu0  ;;  %v9492_v11 = vpop.f32.mrf.mxu1  ;;  %7260 = vmatpush3.bf16.msra.mxu0 %v7594_v62 }
 0x3c2   : > { %10216 = vst [vmem:[#allocation70_spill] sm:$0xff] %v9492_v11  ;;  %v7591_v17 = vld [vmem:[%s9982_s5 + $0x48] sm:$0xff]   ;;  %7261 = vmatprep.subr.bf16.mxu0 %v10214_v46 }
 0x3c3   : > { %v5466_v49 = vpop.f32.mrf.mxu0  ;;  %v9495_v53 = vpop.f32.mrf.mxu1  ;;  %7204 = vmatpush3.bf16.msra.mxu1 %v7591_v17 }
 0x3c4   : > { %10217 = vst [vmem:[#allocation31_spill] sm:$0xff] %v9495_v53  ;;  %7205 = vmatprep.subr.bf16.mxu1 %v10214_v46 }
 0x3c5   : > { %v9500_v63 = vpop.f32.mrf.mxu0  ;;  %v4375_v10 = vpop.f32.mrf.mxu1  ;;  %7262 = vmatpush3.bf16.msra.mxu0 %v7596_v21 }
 0x3c6   : > { %v7595_v10 = vld [vmem:[%s9982_s5 + $0x40] sm:$0xff]   ;;  %7263 = vmatprep.subr.bf16.mxu0 %v10214_v46 }
 0x3c7   : > { %v9509_v49 = vpop.f32.mrf.mxu0  ;;  %v4377_v13 = vpop.f32.mrf.mxu1  ;;  %7206 = vmatpush3.bf16.msra.mxu1 %v7595_v10 }
 0x3c8   : > { %v7597_v13 = vld [vmem:[%s9982_s5 + $0xc8] sm:$0xff]   ;;  %7211 = vmatprep.subr.bf16.mxu1 %v10214_v46 }
 0x3c9   : > { %v9518_v62 = vpop.f32.mrf.mxu0  ;;  %v9520_v6 = vpop.f32.mrf.mxu1  ;;  %7264 = vmatpush3.bf16.msra.mxu0 %v7597_v13 }
 0x3ca   : > { %10218 = vst [vmem:[#allocation32_spill] sm:$0xff] %v9518_v62  ;;  %10219 = vst [vmem:[#allocation71_spill] sm:$0xff] %v9520_v6  ;;  %7265 = vmatprep.subr.bf16.mxu0 %v10214_v46 }
 0x3cb   : > { %v9527_v39 = vpop.f32.mrf.mxu0  ;;  %v9529_v17 = vpop.f32.mrf.mxu1 }
 0x3cc   : > { %10220 = vst [vmem:[#allocation30_spill] sm:$0xff] %v9527_v39  ;;  %10221 = vst [vmem:[#allocation28_spill] sm:$0xff] %v9529_v17  ;;  %v7599_v39 = vld [vmem:[%s9982_s5 + $0xc0] sm:$0xff]  }
 0x3cd   : > { %v9531_v9 = vpop.f32.mrf.mxu0  ;;  %v9533_v53 = vpop.f32.mrf.mxu1  ;;  %7266 = vmatpush3.bf16.msra.mxu0 %v7599_v39 }
 0x3ce   : > { %10222 = vst [vmem:[#allocation29_spill] sm:$0xff] %v9531_v9  ;;  %10223 = vst [vmem:[#allocation72_spill] sm:$0xff] %v9533_v53  ;;  %7291 = vmatprep.subr.bf16.mxu0 %v10214_v46 }
 0x3cf   : > { %v9537_v21 = vpop.f32.mrf.mxu0  ;;  %v9539_v6 = vpop.f32.mrf.mxu1 }
 0x3d0   : > { %10224 = vst [vmem:[#allocation36_spill] sm:$0xff] %v9537_v21  ;;  %10225 = vst [vmem:[#allocation37_spill] sm:$0xff] %v9539_v6 }
 0x3d1   : > { %v9544_v62 = vpop.f32.mrf.mxu0  ;;  %v9546_v10 = vpop.f32.mrf.mxu1 }
 0x3d2   : > { %10226 = vst [vmem:[#allocation73_spill] sm:$0xff] %v9544_v62  ;;  %10227 = vst [vmem:[#allocation35_spill] sm:$0xff] %v9546_v10 }
 0x3d3   : > { %v9549_v13 = vpop.f32.mrf.mxu0  ;;  %v9551_v53 = vpop.f32.mrf.mxu1 }
 0x3d4   : > { %10228 = vst [vmem:[#allocation33_spill] sm:$0xff] %v9549_v13 }
 0x3d5   : > { %v5488_v17 = vpop.f32.mrf.mxu0  ;;  %v9553_v9 = vpop.f32.mrf.mxu1 }
 0x3d6   : > { %10229 = vst [vmem:[#allocation34_spill] sm:$0xff] %v9553_v9 }
 0x3d7   : > { %v5490_v21 = vpop.f32.mrf.mxu0  ;;  %v9555_v6 = vpop.f32.mrf.mxu1 }
 0x3d8   : > { %10230 = vst [vmem:[#allocation74_spill] sm:$0xff] %v9555_v6 }
 0x3d9   : > { %v9557_v8 = vpop.f32.mrf.mxu0  ;;  %v4401_v11 = vpop.f32.mrf.mxu1 }
 0x3da   : > { %10231 = vst [vmem:[#allocation41_spill] sm:$0xff] %v9557_v8 }
 0x3db   : > { %v9559_v61 = vpop.f32.mrf.mxu0  ;;  %v4403_v62 = vpop.f32.mrf.mxu1 }
 0x3dc   : > { %10232 = vst [vmem:[#allocation42_spill] sm:$0xff] %v9559_v61 }
 0x3dd   : > { %v9561_v10 = vpop.f32.mrf.mxu0  ;;  %v9563_v39 = vpop.f32.mrf.mxu1 }
 0x3de   : > { %10233 = vst [vmem:[#allocation75_spill] sm:$0xff] %v9561_v10  ;;  %10234 = vst [vmem:[#allocation38_spill] sm:$0xff] %v9563_v39 }
 0x3df   : > { %v9565_v46 = vpop.f32.mrf.mxu0  ;;  %v9567_v13 = vpop.f32.mrf.mxu1 }
 0x3e0   : > { %10235 = vst [vmem:[#allocation39_spill] sm:$0xff] %v9565_v46  ;;  %10236 = vst [vmem:[#allocation40_spill] sm:$0xff] %v9567_v13 }
 0x3e1   : > { %v9569_v17 = vpop.f32.mrf.mxu0  ;;  %v9571_v9 = vpop.f32.mrf.mxu1 }
 0x3e2   : > { %10237 = vst [vmem:[#allocation46_spill] sm:$0xff] %v9571_v9  ;;  %v4466_v9 = vadd.f32 %v9410_v3, %v9265_v27  ;;  %v4469_v27 = vadd.f32 %v9426_v31, %v9275_v38  ;;  %v4472_v31 = vadd.f32 %v9437_v15, %v9287_v47 }
 0x3e3   : > { %v9573_v21 = vpop.f32.mrf.mxu0  ;;  %v9575_v6 = vpop.f32.mrf.mxu1 }
 0x3e4   : > { %10238 = vst [vmem:[#allocation47_spill] sm:$0xff] %v9573_v21  ;;  %10239 = vst [vmem:[#allocation76_spill] sm:$0xff] %v9575_v6 }
 0x3e5   : > { %v9577_v11 = vpop.f32.mrf.mxu0  ;;  %v9579_v61 = vpop.f32.mrf.mxu1 }
 0x3e6   : > { %10240 = vst [vmem:[#allocation43_spill] sm:$0xff] %v9577_v11  ;;  %10241 = vst [vmem:[#allocation44_spill] sm:$0xff] %v9579_v61  ;;  %v4467_v11 = vadd.f32 %v9415_v50, %v9269_v2  ;;  %v4470_v50 = vadd.f32 %v9430_v55, %v9277_v41 }
 0x3e7   : > { %v9581_v62 = vpop.f32.mrf.mxu0  ;;  %v9583_v10 = vpop.f32.mrf.mxu1 }
 0x3e8   : > { %10242 = vst [vmem:[#allocation45_spill] sm:$0xff] %v9581_v62 }
 0x3e9   : > { %v5514_v39 = vpop.f32.mrf.mxu0  ;;  %v9585_v46 = vpop.f32.mrf.mxu1 }
 0x3ea   : > { %10243 = vst [vmem:[#allocation77_spill] sm:$0xff] %v9585_v46  ;;  %v4468_v39 = vadd.f32 %v9419_v0, %v9271_v7  ;;  %v4837_v46 = vadd.f32 %v9279_v37, %v4466_v9  ;;  %v4471_v37 = vadd.f32 %v9435_v58, %v9283_v59 }
 0x3eb   : > { %v5516_v13 = vpop.f32.mrf.mxu0  ;;  %v9587_v8 = vpop.f32.mrf.mxu1 }
 0x3ec   : > { %10244 = vst [vmem:[#allocation48_spill] sm:$0xff] %v9587_v8  ;;  %v4839_v7 = vadd.f32 %v9289_v57, %v4468_v39  ;;  %v9624_v57 = vld [vmem:[%s9981_s4] ss:$0 sm:$0xff]  ;;  %v4842_v47 = vadd.f32 %v9299_v43, %v4471_v37 }
 0x3ed   : > { %v9591_v21 = vpop.f32.mrf.mxu0  ;;  %v4425_v6 = vpop.f32.mrf.mxu1 }
 0x3ee   : > { %10245 = vst [vmem:[#allocation78_spill] sm:$0xff] %v9591_v21  ;;  %v4838_v6 = vadd.f32 %v9285_v22, %v4467_v11 }
 0x3ef   : > { %v9595_v61 = vpop.f32.mrf.mxu0  ;;  %v4426_v62 = vpop.f32.mrf.mxu1 }
 0x3f1   : > { %v9600_v13 = vpop.f32.mrf.mxu0  ;;  %v5073_v8 = vpop.f32.mrf.mxu1 }
 0x3f2   : > { %v5208_v3 = vadd.f32 %v5073_v8, %v4837_v46  ;;  %v4840_v46 = vadd.f32 %v9294_v45, %v4469_v27 }
 0x3f3   : > { %v9605_v21 = vpop.f32.mrf.mxu0  ;;  %v5075_v2 = vpop.f32.mrf.mxu1 }
 0x3f4   : > { %v5209_v62 = vadd.f32 %v5075_v2, %v4838_v6  ;;  %v5579_v38 = vadd.f32 %v9441_v48, %v5208_v3  ;;  %v4841_v48 = vadd.f32 %v9296_v20, %v4470_v50  ;;  %v4843_v20 = vadd.f32 %v9303_v60, %v4472_v31 }
 0x3f5   : > { %v9612_v9 = vpop.f32.mrf.mxu0  ;;  %v5077_v0 = vpop.f32.mrf.mxu1 }
 0x3f6   : > { %v5580_v8 = vadd.f32 %v9446_v36, %v5209_v62  ;;  %v5210_v22 = vadd.f32 %v5077_v0, %v4839_v7  ;;  %v4473_v36 = vadd.f32 %v9439_v33, %v9292_v12 }
 0x3f7   : > { %v9619_v41 = vpop.f32.mrf.mxu0  ;;  %v5079_v59 = vpop.f32.mrf.mxu1 }
 0x3f8   : > { %v5693_v55 = vmax.f32 %v5579_v38, %v5580_v8  ;;  %v5211_v58 = vadd.f32 %v5079_v59, %v4840_v46  ;;  %v5581_v39 = vadd.f32 %v9451_v18, %v5210_v22  ;;  %v4844_v0 = vadd.f32 %v9308_v26, %v4473_v36 }
 0x3f9   : > { %v9629_v11 = vpop.f32.mrf.mxu0  ;;  %v5083_v45 = vpop.f32.mrf.mxu1  ;;  %v4476_v38 = vadd.f32 %v9453_v14, %v9301_v19  ;;  %v4477_v59 = vadd.f32 %v9459_v28, %v9305_v24  ;;  %v4478_v19 = vadd.f32 %v9466_v35, %v9310_v52  ;;  %v4481_v35 = vadd.f32 %v9487_v25, %v9319_v5 }
 0x3fa   : > { %v5719_v15 = vadd.f32 %v9624_v57, %v5693_v55  ;;  %v5582_v27 = vadd.f32 %v9457_v23, %v5211_v58  ;;  %v5212_v3 = vadd.f32 %v5083_v45, %v4841_v48  ;;  %v4479_v45 = vadd.f32 %v9474_v44, %v9312_v29 }
 0x3fb   : > { %v9635_v6 = vpop.f32.mrf.mxu0  ;;  %v5085_v2 = vpop.f32.mrf.mxu1  ;;  %v4847_v48 = vadd.f32 %v9317_v30, %v4476_v38  ;;  %v4848_v28 = vadd.f32 %v9321_v40, %v4477_v59  ;;  %v4849_v52 = vadd.f32 %v9326_v56, %v4478_v19 }
 0x3fc   : > { %v5738_v50 = vmax.f32 %v5719_v15, 0.0  ;;  %v5694_v62 = vmax.f32 %v5581_v39, %v5582_v27  ;;  %v5213_v12 = vadd.f32 %v5085_v2, %v4842_v47  ;;  %v5583_v18 = vadd.f32 %v9464_v1, %v5212_v3 }
 0x3fd   : > { %v5538_v33 = vpop.f32.mrf.mxu0  ;;  %v5087_v7 = vpop.f32.mrf.mxu1  ;;  %v4850_v29 = vadd.f32 %v9330_v4, %v4479_v45 }
 0x3fe   : > { %5757 = vst [vmem:[#allocation6] sm:$0xff] %v5738_v50  ;;  %v5720_v43 = vadd.f32 %v9624_v57, %v5694_v62  ;;  %v5584_v23 = vadd.f32 %v9472_v34, %v5213_v12  ;;  %v5214_v37 = vadd.f32 %v5087_v7, %v4843_v20  ;;  %v10247_v20 = vld [vmem:[#allocation70_spill] sm:$0xff]  ;;  %v10249_v33 = vld [vmem:[#allocation31_spill] sm:$0xff] }
 0x3ff   : > { %v5539_v8 = vpop.f32.mrf.mxu0  ;;  %v5089_v60 = vpop.f32.mrf.mxu1  ;;  %v10248_v12 = vld [vmem:[#allocation50_spill] sm:$0xff]  ;;  %v10250_v7 = vld [vmem:[#allocation51_spill] sm:$0xff] }
 0x400   : > { %v5739_v22 = vmax.f32 %v5720_v43, 0.0  ;;  %v5695_v46 = vmax.f32 %v5583_v18, %v5584_v23  ;;  %v5215_v31 = vadd.f32 %v5089_v60, %v4844_v0  ;;  %v5585_v1 = vadd.f32 %v9479_v32, %v5214_v37  ;;  %v10253_v60 = vld [vmem:[#allocation53_spill] sm:$0xff] }
 0x401   : > { %v5093_v26 = vpop.f32.mrf.mxu1  ;;  %v4483_v5 = vadd.f32 %v10249_v33, %v10248_v12  ;;  %v4852_v4 = vadd.f32 %v10250_v7, %v4481_v35 }
 0x402   : > { %5758 = vst [vmem:[#allocation6 + $0x8] sm:$0xff] %v5739_v22  ;;  %v5721_v55 = vadd.f32 %v9624_v57, %v5695_v46  ;;  %v5586_v34 = vadd.f32 %v9485_v54, %v5215_v31  ;;  %v4480_v54 = vadd.f32 %v9481_v51, %v9315_v16  ;;  %v10246_v51 = vld [vmem:[#allocation49_spill] sm:$0xff]  ;;  %v10254_v31 = vld [vmem:[#allocation54_spill] sm:$0xff] }
 0x403   : > { %v5095_v58 = vpop.f32.mrf.mxu1  ;;  %v4482_v50 = vadd.f32 %v10247_v20, %v10246_v51  ;;  %v4854_v59 = vadd.f32 %v10254_v31, %v4483_v5  ;;  %v10265_v20 = vld [vmem:[#allocation59_spill] sm:$0xff]  ;;  %v10268_v5 = vld [vmem:[#allocation60_spill] sm:$0xff]  ;;  %v10274_v31 = vld [vmem:[#allocation41_spill] sm:$0xff] }
 0x404   : > { %v5740_v14 = vmax.f32 %v5721_v55, 0.0  ;;  %v5696_v36 = vmax.f32 %v5585_v1, %v5586_v34  ;;  %v4851_v16 = vadd.f32 %v9333_v42, %v4480_v54  ;;  %v10255_v55 = vld [vmem:[#allocation29_spill] sm:$0xff]  ;;  %v10256_v34 = vld [vmem:[#allocation36_spill] sm:$0xff] }
 0x405   : > { %v5097_v24 = vpop.f32.mrf.mxu1  ;;  %v4853_v22 = vadd.f32 %v10253_v60, %v4482_v50  ;;  %v10260_v54 = vld [vmem:[#allocation28_spill] sm:$0xff] }
 0x406   : > { %5759 = vst [vmem:[#allocation6 + $0x10] sm:$0xff] %v5740_v14  ;;  %v5722_v47 = vadd.f32 %v9624_v57, %v5696_v36  ;;  %v5218_v32 = vadd.f32 %v5097_v24, %v4847_v48  ;;  %v10257_v14 = vld [vmem:[#allocation52_spill] sm:$0xff]  ;;  %v10258_v36 = vld [vmem:[#allocation71_spill] sm:$0xff] }
 0x407   : > { %v5099_v15 = vpop.f32.mrf.mxu1  ;;  %v4486_v45 = vadd.f32 %v10258_v36, %v10257_v14 }
 0x408   : > { %v5741_v30 = vmax.f32 %v5722_v47, 0.0  ;;  %v5219_v39 = vadd.f32 %v5099_v15, %v4848_v28  ;;  %v5589_v40 = vadd.f32 %v9500_v63, %v5218_v32  ;;  %v10251_v63 = vld [vmem:[#allocation32_spill] sm:$0xff]  ;;  %v10259_v32 = vld [vmem:[#allocation55_spill] sm:$0xff] }
 0x409   : > { %v5103_v27 = vpop.f32.mrf.mxu1  ;;  %v4487_v15 = vadd.f32 %v10260_v54, %v10259_v32  ;;  %v4857_v50 = vadd.f32 %v10265_v20, %v4486_v45  ;;  %v10278_v45 = vld [vmem:[#allocation17_spill] sm:$0xff]  ;;  %v10281_v54 = vld [vmem:[#allocation18_spill] sm:$0xff] }
 0x40a   : > { %5760 = vst [vmem:[#allocation6 + $0x18] sm:$0xff] %v5741_v30  ;;  %v5590_v44 = vadd.f32 %v9509_v49, %v5219_v39  ;;  %v5220_v3 = vadd.f32 %v5103_v27, %v4849_v52  ;;  %v10252_v49 = vld [vmem:[#allocation30_spill] sm:$0xff]  ;;  %v10261_v52 = vld [vmem:[#allocation73_spill] sm:$0xff] }
 0x40b   : > { %v5105_v2 = vpop.f32.mrf.mxu1  ;;  %v10262_v27 = vld [vmem:[#allocation33_spill] sm:$0xff] }
 0x40c   : > { %v5698_v62 = vmax.f32 %v5589_v40, %v5590_v44  ;;  %v5221_v56 = vadd.f32 %v5105_v2, %v4850_v29  ;;  %v5591_v43 = vadd.f32 %v10251_v63, %v5220_v3  ;;  %v10263_v40 = vld [vmem:[#allocation56_spill] sm:$0xff] }
 0x40d   : > { %v5107_v25 = vpop.f32.mrf.mxu1  ;;  %v10264_v44 = vld [vmem:[#allocation72_spill] sm:$0xff] }
 0x40e   : > { %v5724_v0 = vadd.f32 %v9624_v57, %v5698_v62  ;;  %v5592_v18 = vadd.f32 %v10252_v49, %v5221_v56  ;;  %v5222_v23 = vadd.f32 %v5107_v25, %v4851_v16  ;;  %v4488_v3 = vadd.f32 %v10264_v44, %v10263_v40  ;;  %v10266_v62 = vld [vmem:[#allocation57_spill] sm:$0xff]  ;;  %v10269_v63 = vld [vmem:[#allocation12_spill] sm:$0xff]  ;;  %v10270_v49 = vld [vmem:[#allocation58_spill] sm:$0xff] }
 0x40f   : > { %v5109_v37 = vpop.f32.mrf.mxu1  ;;  %v10267_v56 = vld [vmem:[#allocation37_spill] sm:$0xff]  ;;  %v4858_v25 = vadd.f32 %v10268_v5, %v4487_v15  ;;  %v10284_v44 = vld [vmem:[#allocation16_spill] sm:$0xff] }
 0x410   : > { %v5743_v42 = vmax.f32 %v5724_v0, 0.0  ;;  %v5699_v38 = vmax.f32 %v5591_v43, %v5592_v18  ;;  %v5223_v8 = vadd.f32 %v5109_v37, %v4852_v4  ;;  %v5593_v1 = vadd.f32 %v10255_v55, %v5222_v23  ;;  %v10271_v18 = vld [vmem:[#allocation35_spill] sm:$0xff] }
 0x411   : > { %v5113_v46 = vpop.f32.mrf.mxu1  ;;  %v4489_v12 = vadd.f32 %v10267_v56, %v10266_v62  ;;  %v4859_v43 = vadd.f32 %v10269_v63, %v4488_v3  ;;  %v4490_v23 = vadd.f32 %v10271_v18, %v10270_v49 }
 0x412   : > { %5762 = vst [vmem:[#allocation6 + $0x28] sm:$0xff] %v5743_v42  ;;  %v5725_v26 = vadd.f32 %v9624_v57, %v5699_v38  ;;  %v5594_v58 = vadd.f32 %v10256_v34, %v5223_v8  ;;  %v5224_v48 = vadd.f32 %v5113_v46, %v4853_v22  ;;  %v10272_v38 = vld [vmem:[#allocation61_spill] sm:$0xff]  ;;  %v10273_v22 = vld [vmem:[#allocation63_spill] sm:$0xff]  ;;  %v10276_v34 = vld [vmem:[#allocation62_spill] sm:$0xff] }
 0x413   : > { %v5115_v19 = vpop.f32.mrf.mxu1  ;;  %v4491_v8 = vadd.f32 %v9551_v53, %v10272_v38  ;;  %v4860_v46 = vadd.f32 %v10273_v22, %v4489_v12 }
 0x414   : > { %v5744_v24 = vmax.f32 %v5725_v26, 0.0  ;;  %v5700_v28 = vmax.f32 %v5593_v1, %v5594_v58  ;;  %v5225_v47 = vadd.f32 %v5115_v19, %v4854_v59  ;;  %v5595_v35 = vadd.f32 %v10261_v52, %v5224_v48  ;;  %v10275_v26 = vld [vmem:[#allocation42_spill] sm:$0xff] }
 0x415   : > { %v5117_v30 = vpop.f32.mrf.mxu1  ;;  %v10277_v58 = vld [vmem:[#allocation34_spill] sm:$0xff]  ;;  %v4862_v15 = vadd.f32 %v10281_v54, %v4491_v8  ;;  %v10300_v54 = vld [vmem:[#allocation44_spill] sm:$0xff] }
 0x416   : > { %5763 = vst [vmem:[#allocation6 + $0x30] sm:$0xff] %v5744_v24  ;;  %v5726_v39 = vadd.f32 %v9624_v57, %v5700_v28  ;;  %v5596_v29 = vadd.f32 %v10262_v27, %v5225_v47  ;;  %v4492_v48 = vadd.f32 %v10277_v58, %v10276_v34  ;;  %v4861_v24 = vadd.f32 %v10278_v45, %v4490_v23  ;;  %v10279_v28 = vld [vmem:[#allocation13_spill] sm:$0xff]  ;;  %v10280_v47 = vld [vmem:[#allocation74_spill] sm:$0xff] }
 0x417   : > { %v5119_v2 = vpop.f32.mrf.mxu1  ;;  %v4493_v53 = vadd.f32 %v10280_v47, %v10279_v28  ;;  %v10289_v23 = vld [vmem:[#allocation14_spill] sm:$0xff] }
 0x418   : > { %v5745_v16 = vmax.f32 %v5726_v39, 0.0  ;;  %v5701_v51 = vmax.f32 %v5595_v35, %v5596_v29  ;;  %v10282_v39 = vld [vmem:[#allocation75_spill] sm:$0xff]  ;;  %v4863_v3 = vadd.f32 %v10284_v44, %v4492_v48 }
 0x419   : > { %v5123_v33 = vpop.f32.mrf.mxu1  ;;  %v10283_v35 = vld [vmem:[#allocation39_spill] sm:$0xff] }
 0x41a   : > { %5764 = vst [vmem:[#allocation6 + $0x38] sm:$0xff] %v5745_v16  ;;  %v5727_v7 = vadd.f32 %v9624_v57, %v5701_v51  ;;  %v5228_v4 = vadd.f32 %v5123_v33, %v4857_v50  ;;  %v10285_v50 = vld [vmem:[#allocation15_spill] sm:$0xff] }
 0x41b   : > { %v5125_v0 = vpop.f32.mrf.mxu1  ;;  %v4864_v62 = vadd.f32 %v10285_v50, %v4493_v53  ;;  %v10286_v33 = vld [vmem:[#allocation47_spill] sm:$0xff] }
 0x41c   : > { %v5746_v37 = vmax.f32 %v5727_v7, 0.0  ;;  %v5229_v42 = vadd.f32 %v5125_v0, %v4858_v25  ;;  %v5599_v59 = vadd.f32 %v10274_v31, %v5228_v4  ;;  %v10287_v7 = vld [vmem:[#allocation64_spill] sm:$0xff]  ;;  %v10288_v4 = vld [vmem:[#allocation38_spill] sm:$0xff] }
 0x41d   : > { %v5127_v60 = vpop.f32.mrf.mxu1  ;;  %v4496_v0 = vadd.f32 %v10288_v4, %v10287_v7 }
 0x41e   : > { %5765 = vst [vmem:[#allocation6 + $0x40] sm:$0xff] %v5746_v37  ;;  %v5600_v55 = vadd.f32 %v10275_v26, %v5229_v42  ;;  %v5230_v1 = vadd.f32 %v5127_v60, %v4859_v43  ;;  %v10290_v37 = vld [vmem:[#allocation40_spill] sm:$0xff]  ;;  %v10291_v60 = vld [vmem:[#allocation43_spill] sm:$0xff] }
 0x41f   : > { %v5129_v19 = vpop.f32.mrf.mxu1  ;;  %v4497_v42 = vadd.f32 %v10290_v37, %v10289_v23 }
 0x420   : > { %v5703_v14 = vmax.f32 %v5599_v59, %v5600_v55  ;;  %v5231_v36 = vadd.f32 %v5129_v19, %v4860_v46  ;;  %v5601_v52 = vadd.f32 %v10282_v39, %v5230_v1  ;;  %v10293_v59 = vld [vmem:[#allocation19_spill] sm:$0xff]  ;;  %v10294_v55 = vld [vmem:[#allocation65_spill] sm:$0xff]  ;;  %v10295_v1 = vld [vmem:[#allocation46_spill] sm:$0xff] }
 0x421   : > { %v5133_v32 = vpop.f32.mrf.mxu1  ;;  %v4867_v26 = vadd.f32 %v10293_v59, %v4496_v0  ;;  %v4498_v34 = vadd.f32 %v10295_v1, %v10294_v55  ;;  %v10296_v19 = vld [vmem:[#allocation21_spill] sm:$0xff]  ;;  %v10308_v0 = vld [vmem:[#allocation20_spill] sm:$0xff] }
 0x422   : > { %v5729_v30 = vadd.f32 %v9624_v57, %v5703_v14  ;;  %v5602_v27 = vadd.f32 %v10283_v35, %v5231_v36  ;;  %v5232_v29 = vadd.f32 %v5133_v32, %v4861_v24  ;;  %v10297_v14 = vld [vmem:[#allocation76_spill] sm:$0xff]  ;;  %v10299_v32 = vld [vmem:[#allocation22_spill] sm:$0xff] }
 0x423   : > { %v5135_v40 = vpop.f32.mrf.mxu1  ;;  %v4499_v36 = vadd.f32 %v10297_v14, %v10296_v19  ;;  %v10298_v24 = vld [vmem:[#allocation68_spill] sm:$0xff]  ;;  %v10301_v35 = vld [vmem:[#allocation26_spill] sm:$0xff] }
 0x424   : > { %v5748_v2 = vmax.f32 %v5729_v30, 0.0  ;;  %v5704_v16 = vmax.f32 %v5601_v52, %v5602_v27  ;;  %v5233_v51 = vadd.f32 %v5135_v40, %v4862_v15  ;;  %v5603_v12 = vadd.f32 %v9569_v17, %v5232_v29  ;;  %v10292_v17 = vld [vmem:[#allocation45_spill] sm:$0xff]  ;;  %v10302_v29 = vld [vmem:[#allocation66_spill] sm:$0xff]  ;;  %v10312_v59 = vld [vmem:[#allocation24_spill] sm:$0xff] }
 0x425   : > { %v5137_v20 = vpop.f32.mrf.mxu1  ;;  %v4868_v28 = vadd.f32 %v10298_v24, %v4497_v42  ;;  %v4500_v15 = vadd.f32 %v10300_v54, %v10299_v32  ;;  %v4869_v27 = vadd.f32 %v10301_v35, %v4498_v34  ;;  %v4501_v40 = vadd.f32 %v9583_v10, %v10302_v29  ;;  %v7600_v35 = vld [vmem:[%s9982_s5 + $0x30] sm:$0xff]   ;;  %v7601_v29 = vld [vmem:[%s9982_s5 + $0x28] sm:$0xff]  }
 0x426   : > { %5767 = vst [vmem:[#allocation6 + $0x50] sm:$0xff] %v5748_v2  ;;  %v5730_v56 = vadd.f32 %v9624_v57, %v5704_v16  ;;  %v5604_v5 = vadd.f32 %v10286_v33, %v5233_v51  ;;  %v5234_v25 = vadd.f32 %v5137_v20, %v4863_v3  ;;  %v10303_v3 = vld [vmem:[#allocation27_spill] sm:$0xff]  ;;  %v10304_v16 = vld [vmem:[#allocation78_spill] sm:$0xff] }
 0x427   : > { %v5139_v63 = vpop.f32.mrf.mxu1  ;;  %v4870_v2 = vadd.f32 %v10303_v3, %v4499_v36  ;;  %v10306_v33 = vld [vmem:[#allocation67_spill] sm:$0xff]  ;;  %v7604_v3 = vld [vmem:[%s9982_s5 + $0x10] sm:$0xff]  }
 0x428   : > { %v5749_v43 = vmax.f32 %v5730_v56, 0.0  ;;  %v5705_v49 = vmax.f32 %v5603_v12, %v5604_v5  ;;  %v5235_v18 = vadd.f32 %v5139_v63, %v4864_v62  ;;  %v5605_v22 = vadd.f32 %v10291_v60, %v5234_v25  ;;  %v10305_v56 = vld [vmem:[#allocation69_spill] sm:$0xff]  ;;  %v10309_v63 = vld [vmem:[#allocation48_spill] sm:$0xff] }
 0x429   : > { %v5143_v38 = vpop.f32.mrf.mxu1  ;;  %v4871_v12 = vadd.f32 %v10305_v56, %v4500_v15  ;;  %v10307_v5 = vld [vmem:[#allocation77_spill] sm:$0xff]  ;;  %v4503_v10 = vadd.f32 %v10309_v63, %v10308_v0 }
 0x42a   : > { %5768 = vst [vmem:[#allocation6 + $0x58] sm:$0xff] %v5749_v43  ;;  %v5731_v8 = vadd.f32 %v9624_v57, %v5705_v49  ;;  %v5606_v46 = vadd.f32 %v10292_v17, %v5235_v18  ;;  %v4502_v25 = vadd.f32 %v10307_v5, %v10306_v33  ;;  %v10310_v49 = vld [vmem:[#allocation25_spill] sm:$0xff]  ;;  %v10311_v17 = vld [vmem:[#allocation23_spill] sm:$0xff]  ;;  %v7610_v5 = vld [vmem:[%s9982_s5 + $0xa0] sm:$0xff]  }
 0x42b   : > { %v5145_v31 = vpop.f32.mrf.mxu1  ;;  %v4872_v18 = vadd.f32 %v10310_v49, %v4501_v40  ;;  %v7602_v40 = vld [vmem:[%s9982_s5 + $0x20] sm:$0xff]   ;;  %v7609_v33 = vld [vmem:[%s9982_s5 + $0xa8] sm:$0xff]   ;;  %v7615_v49 = vld [vmem:[%s9982_s5 + $0x138] sm:$0xff]  }
 0x42c   : > { %v5750_v58 = vmax.f32 %v5731_v8, 0.0  ;;  %v5706_v48 = vmax.f32 %v5605_v22, %v5606_v46  ;;  %v4873_v46 = vadd.f32 %v10311_v17, %v4502_v25  ;;  %v7611_v25 = vld [vmem:[%s9982_s5 + $0x98] sm:$0xff]   ;;  %v7622_v17 = vld [vmem:[%s9982_s5 + $0x100] sm:$0xff]  }
 0x42d   : > { %v5147_v45 = vpop.f32.mrf.mxu1 }
 0x42e   : > { %5769 = vst [vmem:[#allocation6 + $0x60] sm:$0xff] %v5750_v58  ;;  %v5732_v47 = vadd.f32 %v9624_v57, %v5706_v48  ;;  %v5238_v53 = vadd.f32 %v5147_v45, %v4867_v26  ;;  %v4874_v26 = vadd.f32 %v10312_v59, %v4503_v10  ;;  %v7614_v10 = vld [vmem:[%s9982_s5 + $0x80] sm:$0xff]   ;;  %v7623_v59 = vld [vmem:[%s9984_s7 + $0x38] sm:$0xff]  }
 0x42f   : > { %v5149_v30 = vpop.f32.mrf.mxu1 }
 0x430   : > { %v5751_v39 = vmax.f32 %v5732_v47, 0.0  ;;  %v5239_v52 = vadd.f32 %v5149_v30, %v4868_v28  ;;  %v5609_v51 = vadd.f32 %v10304_v16, %v5238_v53  ;;  %v7598_v30 = vld [vmem:[%s9982_s5 + $0x38] sm:$0xff]  }
 0x431   : > { %v5153_v44 = vpop.f32.mrf.mxu1 }
 0x432   : > { %5770 = vst [vmem:[#allocation6 + $0x68] sm:$0xff] %v5751_v39  ;;  %v5610_v20 = vadd.f32 %v9595_v61, %v5239_v52  ;;  %v5240_v50 = vadd.f32 %v5153_v44, %v4869_v27  ;;  %v7603_v44 = vld [vmem:[%s9982_s5 + $0x18] sm:$0xff]  }
 0x433   : > { %v5155_v62 = vpop.f32.mrf.mxu1 }
 0x434   : > { %v5708_v7 = vmax.f32 %v5609_v51, %v5610_v20  ;;  %v5241_v4 = vadd.f32 %v5155_v62, %v4870_v2  ;;  %v5611_v37 = vadd.f32 %v9600_v13, %v5240_v50  ;;  %v7605_v2 = vld [vmem:[%s9982_s5 + $0x8] sm:$0xff]   ;;  %v7606_v20 = vld [vmem:[%s9982_s5] sm:$0xff]   ;;  %v7607_v62 = vld [vmem:[%s9982_s5 + $0xb8] sm:$0xff]  }
 0x435   : > { %v5157_v43 = vpop.f32.mrf.mxu1 }
 0x436   : > { %v5734_v23 = vadd.f32 %v9624_v57, %v5708_v7  ;;  %v5612_v61 = vadd.f32 %v9605_v21, %v5241_v4  ;;  %v5242_v42 = vadd.f32 %v5157_v43, %v4871_v12  ;;  %v7608_v12 = vld [vmem:[%s9982_s5 + $0xb0] sm:$0xff]   ;;  %v7613_v4 = vld [vmem:[%s9982_s5 + $0x88] sm:$0xff]  }
 0x437   : > { %v5159_v38 = vpop.f32.mrf.mxu1  ;;  %v7612_v7 = vld [vmem:[%s9982_s5 + $0x90] sm:$0xff]  }
 0x438   : > { %v5753_v8 = vmax.f32 %v5734_v23, 0.0  ;;  %v5709_v60 = vmax.f32 %v5611_v37, %v5612_v61  ;;  %v5243_v22 = vadd.f32 %v5159_v38, %v4872_v18  ;;  %v5613_v1 = vadd.f32 %v9612_v9, %v5242_v42  ;;  %v7616_v23 = vld [vmem:[%s9982_s5 + $0x130] sm:$0xff]   ;;  %v7617_v37 = vld [vmem:[%s9982_s5 + $0x128] sm:$0xff]   ;;  %v7618_v61 = vld [vmem:[%s9982_s5 + $0x120] sm:$0xff]  }
 0x439   : > { %v5163_v31 = vpop.f32.mrf.mxu1  ;;  %v7619_v42 = vld [vmem:[%s9982_s5 + $0x118] sm:$0xff]   ;;  %v7620_v38 = vld [vmem:[%s9982_s5 + $0x110] sm:$0xff]  }
 0x43a   : > { %5772 = vst [vmem:[#allocation6 + $0x78] sm:$0xff] %v5753_v8  ;;  %v5735_v55 = vadd.f32 %v9624_v57, %v5709_v60  ;;  %v5614_v34 = vadd.f32 %v9619_v41, %v5243_v22  ;;  %v5244_v13 = vadd.f32 %v5163_v31, %v4873_v46  ;;  %v7621_v8 = vld [vmem:[%s9982_s5 + $0x108] sm:$0xff]  }
 0x43b   : > { %v5165_v58 = vpop.f32.mrf.mxu1 }
 0x43c   : > { %v5754_v21 = vmax.f32 %v5735_v55, 0.0  ;;  %v5710_v48 = vmax.f32 %v5613_v1, %v5614_v34  ;;  %v5245_v19 = vadd.f32 %v5165_v58, %v4874_v26  ;;  %v5615_v45 = vadd.f32 %v9629_v11, %v5244_v13  ;;  %v7624_v26 = vld [vmem:[%s9984_s7 + $0x30] sm:$0xff]   ;;  %v7625_v55 = vld [vmem:[%s9984_s7 + $0x28] sm:$0xff]   ;;  %v7626_v1 = vld [vmem:[%s9984_s7 + $0x20] sm:$0xff]  }
 0x43d   : > { %v5167_v14 = vpop.f32.mrf.mxu1  ;;  %v7627_v34 = vld [vmem:[%s9984_s7 + $0x18] sm:$0xff]   ;;  %v7628_v13 = vld [vmem:[%s9984_s7 + $0x10] sm:$0xff]   ;;  %v7629_v58 = vld [vmem:[%s9984_s7 + $0x8] sm:$0xff]  }
 0x43e   : > { %5773 = vst [vmem:[#allocation6 + $0x80] sm:$0xff] %v5754_v21  ;;  %v5736_v36 = vadd.f32 %v9624_v57, %v5710_v48  ;;  %v5616_v24 = vadd.f32 %v9635_v6, %v5245_v19  ;;  %v7630_v21 = vld [vmem:[%s9984_s7] sm:$0xff]   ;;  %v7631_v48 = vld [vmem:[%s9986_s9 + $0x38] sm:$0xff]   ;;  %v7632_v19 = vld [vmem:[%s9986_s9 + $0x30] sm:$0xff]  }
 0x43f   : > { %v5168_v28 = vpop.f32.mrf.mxu1  ;;  %v7633_v14 = vld [vmem:[%s9986_s9 + $0x28] sm:$0xff]  }
 0x440   : > { %v5755_v47 = vmax.f32 %v5736_v36, 0.0  ;;  %v5711_v53 = vmax.f32 %v5615_v45, %v5616_v24  ;;  %v7634_v36 = vld [vmem:[%s9986_s9 + $0x20] sm:$0xff]   ;;  %v7635_v45 = vld [vmem:[%s9986_s9 + $0x18] sm:$0xff]   ;;  %v7636_v24 = vld [vmem:[%s9986_s9 + $0x10] sm:$0xff]  }
 0x442   : > { %5774 = vst [vmem:[#allocation6 + $0x88] sm:$0xff] %v5755_v47  ;;  %v5737_v9 = vadd.f32 %v9624_v57, %v5711_v53  ;;  %v10313_v57 = vmov 0.0  }
 0x444   : > { %v5756_v41 = vmax.f32 %v5737_v9, 0.0 }
 0x446   : > { %5775 = vst [vmem:[#allocation6 + $0x90] sm:$0xff] %v5756_v41 }
 0x449   : > { %v5798_v32 = vld [vmem:[#allocation6 + $0x2] ss:$20 sm:$0xff]  ;;  %v5800_v54 = vld [vmem:[#allocation6 + $0x3] ss:$20 sm:$0xff]  ;;  %v5776_v16 = vld [vmem:[#allocation6] ss:$20 sm:$0xff] }
 0x44a   : > { %v5801_v15 = vmax.f32 %v5798_v32, %v5800_v54  ;;  %v5778_v51 = vld [vmem:[#allocation6 + $0x1] ss:$20 sm:$0xff] }
 0x44b   : > { %v5779_v50 = vmax.f32 %v5776_v16, %v5778_v51  ;;  %v7105_v16 = vld [vmem:[%s9983_s6] ss:$0 sm:$0xff] }
 0x44c   : > { %v5802_v39 = vpack.c.bf16 %v5801_v15, %v5801_v15 }
 0x44d   : > { %v6109_v52 = vld [vmem:[#allocation6 + $0x6] ss:$20 sm:$0xff]  ;;  %v6111_v11 = vld [vmem:[#allocation6 + $0x7] ss:$20 sm:$0xff]  ;;  %v5780_v56 = vpack.c.bf16 %v5779_v50, %v5779_v50  ;;  %v5997_v0 = vld [vmem:[#allocation6 + $0x4] ss:$20 sm:$0xff] }
 0x44e   : > { %7208 = vmatmul.mubr.bf16.vlgmr.msra.gmra.mxu1 %v5802_v39  ;;  %v6112_v6 = vmax.f32 %v6109_v52, %v6111_v11  ;;  %v5999_v63 = vld [vmem:[#allocation6 + $0x5] ss:$20 sm:$0xff]  ;;  %v6221_v60 = vld [vmem:[#allocation6 + $0x8] ss:$20 sm:$0xff] }
 0x44f   : > { %7212 = vmatpush3.bf16.msra.mxu1 %v7598_v30  ;;  %7227 = vmatprep.mubr.msk.bf16.mxu1 %vm7704_vm1, %v10313_v57  ;;  %v6000_v43 = vmax.f32 %v5997_v0, %v5999_v63  ;;  %v6223_v22 = vld [vmem:[#allocation6 + $0x9] ss:$20 sm:$0xff] }
 0x450   : > { %7213 = vmatprep.subr.bf16.mxu1 %v10313_v57  ;;  %v6113_v27 = vpack.c.bf16 %v6112_v6, %v6112_v6  ;;  %v6224_v46 = vmax.f32 %v6221_v60, %v6223_v22 }
 0x451   : > { %v6001_v18 = vpack.c.bf16 %v6000_v43, %v6000_v43 }
 0x452   : > { %7268 = vmatmul.mubr.bf16.vlgmr.msra.gmra.mxu0 %v6113_v27  ;;  %v6225_v31 = vpack.c.bf16 %v6224_v46, %v6224_v46 }
 0x453   : > { %7214 = vmatpush3.bf16.msra.mxu1 %v7600_v35  ;;  %7307 = vmatprep.mubr.msk.bf16.mxu0 %vm7704_vm1, %v10313_v57 }
 0x454   : > { %7215 = vmatprep.subr.bf16.mxu1 %v10313_v57  ;;  %7292 = vmatpush3.bf16.msra.mxu0 %v7623_v59 }
 0x455   : > { %7293 = vmatprep.subr.bf16.mxu0 %v10313_v57 }
 0x457   : > { %7216 = vmatpush3.bf16.msra.mxu1 %v7601_v29 }
 0x458   : > { %7217 = vmatprep.subr.bf16.mxu1 %v10313_v57  ;;  %7294 = vmatpush3.bf16.msra.mxu0 %v7624_v26 }
 0x459   : > { %7295 = vmatprep.subr.bf16.mxu0 %v10313_v57 }
 0x45b   : > { %7218 = vmatpush3.bf16.msra.mxu1 %v7602_v40 }
 0x45c   : > { %7219 = vmatprep.subr.bf16.mxu1 %v10313_v57  ;;  %7296 = vmatpush3.bf16.msra.mxu0 %v7625_v55 }
 0x45d   : > { %7297 = vmatprep.subr.bf16.mxu0 %v10313_v57 }
 0x45f   : > { %7220 = vmatpush3.bf16.msra.mxu1 %v7603_v44 }
 0x460   : > { %7221 = vmatprep.subr.bf16.mxu1 %v10313_v57  ;;  %7298 = vmatpush3.bf16.msra.mxu0 %v7626_v1 }
 0x461   : > { %7299 = vmatprep.subr.bf16.mxu0 %v10313_v57 }
 0x463   : > { %7222 = vmatpush3.bf16.msra.mxu1 %v7604_v3 }
 0x464   : > { %7223 = vmatprep.subr.bf16.mxu1 %v10313_v57  ;;  %7300 = vmatpush3.bf16.msra.mxu0 %v7627_v34 }
 0x465   : > { %7301 = vmatprep.subr.bf16.mxu0 %v10313_v57 }
 0x467   : > { %7224 = vmatpush3.bf16.msra.mxu1 %v7605_v2 }
 0x468   : > { %7225 = vmatprep.subr.bf16.mxu1 %v10313_v57  ;;  %7302 = vmatpush3.bf16.msra.mxu0 %v7628_v13 }
 0x469   : > { %7303 = vmatprep.subr.bf16.mxu0 %v10313_v57 }
 0x46b   : > { %7226 = vmatpush3.bf16.msra.mxu1 %v7606_v20 }
 0x46c   : > { %7231 = vmatprep.subr.bf16.mxu1 %v10313_v57  ;;  %7304 = vmatpush3.bf16.msra.mxu0 %v7629_v58 }
 0x46d   : > { %7305 = vmatprep.subr.bf16.mxu0 %v10313_v57 }
 0x46e   : > { %7228 = vmatmul.mubr.bf16.vlgmr.msra.gmra.mxu1 %v5780_v56 }
 0x46f   : > { %7232 = vmatpush3.bf16.msra.mxu1 %v7607_v62  ;;  %7247 = vmatprep.mubr.msk.bf16.mxu1 %vm7704_vm1, %v10313_v57 }
 0x470   : > { %7233 = vmatprep.subr.bf16.mxu1 %v10313_v57  ;;  %7306 = vmatpush3.bf16.msra.mxu0 %v7630_v21 }
 0x473   : > { %7234 = vmatpush3.bf16.msra.mxu1 %v7608_v12 }
 0x474   : > { %7235 = vmatprep.subr.bf16.mxu1 %v10313_v57 }
 0x477   : > { %7236 = vmatpush3.bf16.msra.mxu1 %v7609_v33 }
 0x478   : > { %7237 = vmatprep.subr.bf16.mxu1 %v10313_v57 }
 0x47b   : > { %7238 = vmatpush3.bf16.msra.mxu1 %v7610_v5  ;;  %v7637_v5 = vld [vmem:[%s9986_s9 + $0x8] sm:$0xff]  }
 0x47c   : > { %7239 = vmatprep.subr.bf16.mxu1 %v10313_v57 }
 0x47f   : > { %7240 = vmatpush3.bf16.msra.mxu1 %v7611_v25  ;;  %v7638_v25 = vld [vmem:[%s9986_s9] sm:$0xff]  }
 0x480   : > { %7241 = vmatprep.subr.bf16.mxu1 %v10313_v57 }
 0x483   : > { %7242 = vmatpush3.bf16.msra.mxu1 %v7612_v7  ;;  %v7106_v7 = vld [vmem:[%s9985_s8] ss:$0 sm:$0xff] }
 0x484   : > { %7243 = vmatprep.subr.bf16.mxu1 %v10313_v57 }
 0x487   : > { %7244 = vmatpush3.bf16.msra.mxu1 %v7613_v4 }
 0x488   : > { %7245 = vmatprep.subr.bf16.mxu1 %v10313_v57 }
 0x48b   : > { %7246 = vmatpush3.bf16.msra.mxu1 %v7614_v10 }
 0x48c   : > { %7271 = vmatprep.subr.bf16.mxu1 %v10313_v57 }
 0x48e   : > { %7248 = vmatmul.mubr.bf16.vlgmr.msra.gmra.mxu1 %v6001_v18 }
 0x48f   : > { %7272 = vmatpush3.bf16.msra.mxu1 %v7615_v49  ;;  %7287 = vmatprep.mubr.msk.bf16.mxu1 %vm7704_vm1, %v10313_v57 }
 0x490   : > { %7273 = vmatprep.subr.bf16.mxu1 %v10313_v57 }
 0x493   : > { %7274 = vmatpush3.bf16.msra.mxu1 %v7616_v23 }
 0x494   : > { %7275 = vmatprep.subr.bf16.mxu1 %v10313_v57 }
 0x497   : > { %7276 = vmatpush3.bf16.msra.mxu1 %v7617_v37 }
 0x498   : > { %7277 = vmatprep.subr.bf16.mxu1 %v10313_v57 }
 0x49b   : > { %7278 = vmatpush3.bf16.msra.mxu1 %v7618_v61 }
 0x49c   : > { %7279 = vmatprep.subr.bf16.mxu1 %v10313_v57 }
 0x49f   : > { %7280 = vmatpush3.bf16.msra.mxu1 %v7619_v42 }
 0x4a0   : > { %7281 = vmatprep.subr.bf16.mxu1 %v10313_v57 }
 0x4a3   : > { %7282 = vmatpush3.bf16.msra.mxu1 %v7620_v38 }
 0x4a4   : > { %7283 = vmatprep.subr.bf16.mxu1 %v10313_v57 }
 0x4a7   : > { %7284 = vmatpush3.bf16.msra.mxu1 %v7621_v8 }
 0x4a8   : > { %7285 = vmatprep.subr.bf16.mxu1 %v10313_v57 }
 0x4ab   : > { %7286 = vmatpush3.bf16.msra.mxu1 %v7622_v17 }
 0x4ac   : > { %7311 = vmatprep.subr.bf16.mxu1 %v10313_v57 }
 0x4ae   : > { %7288 = vmatmul.mubr.bf16.vlgmr.msra.gmra.mxu1 %v6225_v31 }
 0x4af   : > { %7327 = vmatprep.mubr.msk.bf16.mxu1 %vm7704_vm1, %v10313_v57  ;;  %7312 = vmatpush3.bf16.msra.mxu1 %v7631_v48 }
 0x4b0   : > { %7313 = vmatprep.subr.bf16.mxu1 %v10313_v57 }
 0x4b3   : > { %7314 = vmatpush3.bf16.msra.mxu1 %v7632_v19 }
 0x4b4   : > { %7315 = vmatprep.subr.bf16.mxu1 %v10313_v57 }
 0x4b7   : > { %7316 = vmatpush3.bf16.msra.mxu1 %v7633_v14 }
 0x4b8   : > { %7317 = vmatprep.subr.bf16.mxu1 %v10313_v57 }
 0x4bb   : > { %7318 = vmatpush3.bf16.msra.mxu1 %v7634_v36 }
 0x4bc   : > { %7319 = vmatprep.subr.bf16.mxu1 %v10313_v57 }
 0x4bf   : > { %7320 = vmatpush3.bf16.msra.mxu1 %v7635_v45 }
 0x4c0   : > { %7321 = vmatprep.subr.bf16.mxu1 %v10313_v57 }
 0x4c3   : > { %7322 = vmatpush3.bf16.msra.mxu1 %v7636_v24 }
 0x4c4   : > { %7323 = vmatprep.subr.bf16.mxu1 %v10313_v57 }
 0x4c7   : > { %7324 = vmatpush3.bf16.msra.mxu1 %v7637_v5 }
 0x4c8   : > { %7325 = vmatprep.subr.bf16.mxu1 %v10313_v57  ;;  %v7115_v57 = vld [vmem:[%s9987_s10] ss:$0 sm:$0xff] }
 0x4cb   : > { %7326 = vmatpush3.bf16.msra.mxu1 %v7638_v25 }
 0x50e   : > { %v5902_v28 = vpop.f32.mrf.mxu1 }
 0x510   : > { %v7209_v47 = vpop.f32.mrf.mxu1 }
 0x512   : > { %v5905_v53 = vpop.f32.mrf.mxu1  ;;  %v6213_v9 = vpop.f32.mrf.mxu0 }
 0x514   : > { %v7210_v41 = vpop.f32.mrf.mxu1  ;;  %v7269_v32 = vpop.f32.mrf.mxu0 }
 0x516   : > { %v6216_v54 = vpop.f32.mrf.mxu0 }
 0x518   : > { %v7270_v15 = vpop.f32.mrf.mxu0 }
 0x52e   : > { %v5990_v30 = vpop.f32.mrf.mxu1 }
 0x52f   : > { %v5991_v6 = vadd.f32 %v5990_v30, %v5902_v28 }
 0x530   : > { %v7229_v39 = vpop.f32.mrf.mxu1 }
 0x532   : > { %v5993_v52 = vpop.f32.mrf.mxu1 }
 0x534   : > { %v7230_v11 = vpop.f32.mrf.mxu1 }
 0x54e   : > { %v6101_v35 = vpop.f32.mrf.mxu1 }
 0x54f   : > { %v6107_v27 = vadd.f32 %v6101_v35, %v5991_v6 }
 0x550   : > { %v7249_v29 = vpop.f32.mrf.mxu1 }
 0x551   : > { %v6219_v40 = vadd.f32 %v6213_v9, %v6107_v27 }
 0x552   : > { %v6104_v44 = vpop.f32.mrf.mxu1 }
 0x554   : > { %v7250_v3 = vpop.f32.mrf.mxu1 }
 0x56e   : > { %v6325_v2 = vpop.f32.mrf.mxu1 }
 0x56f   : > { %v6331_v51 = vadd.f32 %v6325_v2, %v6219_v40 }
 0x570   : > { %v7289_v20 = vpop.f32.mrf.mxu1 }
 0x571   : > { %v6339_v50 = vadd.f32 %v7105_v16, %v6331_v51 }
 0x572   : > { %v6328_v62 = vpop.f32.mrf.mxu1 }
 0x573   : > { %v6340_v56 = vmax.f32 %v6339_v50, 0.0 }
 0x574   : > { %v7290_v12 = vpop.f32.mrf.mxu1 }
 0x575   : > { %v6341_v33 = vpack.c.bf16 %v6340_v56, %v6340_v56 }
 0x577   : > { %7308 = vmatmul.mubr.bf16.vlgmr.msra.gmra.mxu0 %v6341_v33 }
 0x637   : > { %v6447_v4 = vpop.f32.mrf.mxu0 }
 0x638   : > { %v6448_v0 = vadd.f32 %v7106_v7, %v6447_v4 }
 0x639   : > { %v7309_v63 = vpop.f32.mrf.mxu0 }
 0x63a   : > { %v6453_v10 = vmax.f32 %v6448_v0, 0.0 }
 0x63b   : > { %v6450_v43 = vpop.f32.mrf.mxu0 }
 0x63c   : > { %v6454_v49 = vpack.c.bf16 %v6453_v10, %v6453_v10 }
 0x63d   : > { %v7310_v18 = vpop.f32.mrf.mxu0 }
 0x63e   : > { %7328 = vmatmul.mubr.bf16.vlgmr.msra.gmra.mxu1 %v6454_v49 }
 0x6fe   : > { %v6560_v23 = vpop.f32.mrf.mxu1 }
 0x6ff   : > { %v6561_v37 = vadd.f32 %v7115_v57, %v6560_v23 }
 0x700   : > { %v7329_v61 = vpop.f32.mrf.mxu1 }
 0x701   : > { %6567 = vst.msk [vmem:[%s380_s30] sm:$0xff] %vm6566_vm2, %v6561_v37 }
 0x702   : > { %v6563_v42 = vpop.f32.mrf.mxu1 }
 0x703   : > { %7653 = shalt.err (!%p7650_p3)
}
 0x704   : > { %s7654_s25 = scalar_lea.hbm %s9936_s26, 128  ;;  %s7658_s30 = scalar_lea.hbm %s9988_s11, 256 }
 0x705   : > { %p7655_p4 = scmp.ne.s32.totalorder %s9936_s26, %s7654_s25  ;;  %p7659_p9 = scmp.lt.s32.totalorder %s9936_s26, %s9988_s11 }
 0x706   : > { %p7660_p10 = scmp.lt.s32.totalorder %s7658_s30, %s7654_s25 }
 0x707   : > { %p7656_p7 = pnand %p7655_p4, %p7804_p5 }
 0x708   : > { %p7661_p11 = por %p7660_p10, %p7659_p9 }
 0x709   : > { %p7657_p8 = pneg %p7656_p7 }
 0x70b   : > { %p7662_p12 = pnand %p7661_p11, %p7657_p8 }
 0x70d   : > { %7665 = shalt.err (!%p7662_p12)
}
 0x70e   : > { %7331 = dma.vmem_to_hbm [thread:$0]  (%p7804_p5), %s9938_s19, 128, %s9936_s26, %s6569_s15   ;;  %v7330_v38 = vpop.f32.mrf.mxu1 }
 0x70f PF: > { %p7337_p13 = scmp.ge.s32.totalorder %s7700_s20, 2  ;;  %s6594_s21 = sand.u32 1, %s7688_s17  }
 0x710   : > { %s6595_s13 = scalar_lea.sflag [#allocation8], %s6594_s21 }
 0x711   : > { %p7334_p0 = pnand %p7337_p13, %p7808_p6 }
 0x713   : > { %p7335_p1 = pneg %p7334_p0 }
 0x715   : > { %7683 = dma.done.wait (%p7335_p1), %s6595_s13, 128  }
 0x716   : > { %7685 = vsyncadd (%p7335_p1), %s6595_s13, 4294967168  ;;  %s10314_s16 = sld [smem:[#allocation10_spill]]  ;;  %p21_p2 = scmp.ge.s32.totalorder %s7791_s23, 4  }
 0x717   : > { %s10315_s19 = sld [smem:[#allocation11_spill]]  ;;  %s10316_s17 = smov %s7692_s18 }
 0x718   : > { %s10318_s20 = smov %s7791_s23  ;;  %23 = sbr.rel (!%p21_p2) target bundleno = 3 (0x3), region = 159 }
 0x71c   : > { %s10317_s18 = smov %s10314_s16 }
 0x71d   :  { %6600 = vsyncpa [#allocation8], 1 }
 0x71e   :  { %6602 = vsyncpa [#allocation8 + $0x1], 1 }

</bundles_post_ra>
